<compile_context>
chip_gen: v5e
topology: v5e:2x2
jax: 0.10.0
libtpu: 0.0.40
codegen_flags: <defaults>
</compile_context>

<pallas_src>
import functools

import jax
import jax.numpy as jnp
from jax import lax
from jax.experimental import pallas as pl
from jax.experimental.pallas import tpu as pltpu


def _meta_kernel(xs_ref, ys_ref, xq_ref, yq_ref,
                 w1_ref, b1_ref, w2t_ref, b2_ref,
                 loss_ref, corr_ref,
                 *, update_lr, num_inner_steps, task_num):
    tpb, setsz, d = xs_ref.shape
    qsz = xq_ref.shape[1]
    hdim = w1_ref.shape[1]
    n_cls = w2t_ref.shape[0]
    f32 = jnp.float32

    xs = xs_ref[...]                      # (t, n, d)  f32
    xq = xq_ref[...]                      # (t, q, d)  f32
    ys_lbl = ys_ref[...]                  # (t, n, 1)  int32
    yq_lbl = yq_ref[...]                  # (t, q, 1)  int32
    w1 = w1_ref[...]                      # (d, H)     f32 (shared master)
    b1 = b1_ref[...]                      # (1, H)

    # ---- once-per-chunk d-contractions: the only MXU work in the kernel ----
    xs2 = xs.reshape(tpb * setsz, d)
    xq2 = xq.reshape(tpb * qsz, d)
    hs0 = (jnp.dot(xs2, w1, preferred_element_type=f32)
           .reshape(tpb, setsz, hdim) + b1[None])            # x_s @ w1_0 + b1
    hq0 = (jnp.dot(xq2, w1, preferred_element_type=f32)
           .reshape(tpb, qsz, hdim) + b1[None])              # x_q @ w1_0 + b1
    Gs = jnp.einsum('tnd,tmd->tnm', xs, xs, preferred_element_type=f32)
    Gq = jnp.einsum('tqd,tmd->tqm', xq, xs, preferred_element_type=f32)

    # one-hot support labels built in-kernel (iota compare)
    col_s = lax.broadcasted_iota(jnp.int32, (tpb, setsz, n_cls), 2)
    ys_oh = (col_s == ys_lbl).astype(f32)

    scale = update_lr / float(setsz)      # lr * (1/n) folded into one scalar
    row_iota = lax.broadcasted_iota(jnp.int32, (tpb, n_cls, hdim), 1)

    def logits_of(h, w2t, b2):
        # logits[t,n,c] = sum_h h*w2t[c] + b2[c]; per-class lane reduce,
        # no MXU pass for the n_way-sized contraction.
        rows = h.shape[1]
        col = lax.broadcasted_iota(jnp.int32, (tpb, rows, n_cls), 2)
        logits = jnp.broadcast_to(b2, (tpb, rows, n_cls))
        for c in range(n_cls):
            lc = jnp.sum(h * w2t[:, c:c + 1, :], axis=-1, keepdims=True)
            logits = logits + jnp.where(col == c, lc, 0.0)
        return logits

    def inner_step(_, carry):
        A, dpre_sum, w2t, b2 = carry
        h = jnp.maximum(A, 0.0)                               # (t, n, H)
        logits = logits_of(h, w2t, b2)                        # (t, n, C)
        m = jnp.max(logits, axis=-1, keepdims=True)
        e = jnp.exp(logits - m)
        p = e / jnp.sum(e, axis=-1, keepdims=True)            # exact softmax
        g = p - ys_oh                                         # = setsz * dlogits
        # dh = g @ w2^T  : unrolled VPU broadcast-FMA over the class axis
        dh = jnp.zeros_like(h)
        for c in range(n_cls):
            dh = dh + g[:, :, c:c + 1] * w2t[:, c:c + 1, :]
        dpre = dh * (A > 0.0).astype(f32)                     # (t, n, H)
        # dW2^T (class-major layout): per-class sum over support samples
        dW2t = jnp.zeros((tpb, n_cls, hdim), f32)
        for c in range(n_cls):
            row = jnp.sum(h * g[:, :, c:c + 1], axis=1, keepdims=True)
            dW2t = dW2t + jnp.where(row_iota == c, row, 0.0)
        db2 = jnp.sum(g, axis=1, keepdims=True)               # (t, 1, C)
        # A <- A - scale*(Gs@dpre + 1*db1) : Gram update, unrolled over setsz
        gsd = jnp.zeros_like(A)
        for s in range(setsz):
            gsd = gsd + Gs[:, :, s:s + 1] * dpre[:, s:s + 1, :]
        db1 = jnp.sum(dpre, axis=1, keepdims=True)            # (t, 1, H)
        return (A - scale * (gsd + db1),
                dpre_sum + dpre,
                w2t - scale * dW2t,
                b2 - scale * db2)

    carry0 = (hs0,
              jnp.zeros_like(hs0),
              jnp.broadcast_to(w2t_ref[...][None], (tpb, n_cls, hdim)),
              jnp.broadcast_to(b2_ref[...][None], (tpb, 1, n_cls)))
    # Reference runs 1 pre-clone-gradient step + update_step more.
    _, dpre_sum, w2t, b2 = lax.fori_loop(
        0, num_inner_steps, inner_step, carry0,
        unroll=(num_inner_steps <= 8))

    # ---- query evaluation with adapted weights (low-rank / Gram form) ----
    gqs = jnp.zeros((tpb, qsz, hdim), f32)
    for s in range(setsz):
        gqs = gqs + Gq[:, :, s:s + 1] * dpre_sum[:, s:s + 1, :]
    db1_sum = jnp.sum(dpre_sum, axis=1, keepdims=True)        # (t, 1, H)
    Aq = hq0 - scale * (gqs + db1_sum)
    hq = jnp.maximum(Aq, 0.0)
    logits_q = logits_of(hq, w2t, b2)                         # (t, q, C)

    mq = jnp.max(logits_q, axis=-1, keepdims=True)
    eq = jnp.exp(logits_q - mq)
    logz = jnp.log(jnp.sum(eq, axis=-1, keepdims=True)) + mq
    col_q = lax.broadcasted_iota(jnp.int32, (tpb, qsz, n_cls), 2)
    yq_oh = (col_q == yq_lbl).astype(f32)
    loss_chunk = (-jnp.sum(yq_oh * (logits_q - logz))) * (
        1.0 / (float(qsz) * float(task_num)))

    # softmax argmax == first index attaining the max (matches torch.argmax)
    pred = jnp.min(jnp.where(logits_q >= mq, col_q, n_cls), axis=-1,
                   keepdims=True)                             # (t, q, 1)
    correct = jnp.sum((pred == yq_lbl).astype(f32))

    # single masked row store per chunk (block (1,1,128))
    loss_ref[...] = jnp.zeros_like(loss_ref) + loss_chunk
    corr_ref[...] = jnp.zeros_like(corr_ref) + correct


def _tensorcores_per_chip():
    """Best-effort TensorCore count per chip: 2 on v7x, 1 on v5e/v6e."""
    try:
        kind = jax.devices()[0].device_kind.lower()
    except Exception:
        return 1
    if "v7" in kind or "7x" in kind:
        return 2
    return 1


def meta_forward(x_spt, y_spt, x_qry, y_qry, params, *,
                 n_way, k_qry, update_lr, update_step, num_chunks=None):
    """x_spt: [b, setsz, C, H, W] f32, y_spt: [b, setsz] int (likewise qry)."""
    w1, b1, w2, b2 = params
    task_num, setsz = x_spt.shape[0], x_spt.shape[1]
    qsz = x_qry.shape[1]
    d = int(x_spt.shape[2] * x_spt.shape[3] * x_spt.shape[4])
    hdim = w1.shape[1]

    if num_chunks is None:
        # 1 chunk on single-TensorCore chips (v5e/v6e); 2 on v7x so each core
        # gets one chunk via dimension_semantics=("parallel",).
        n_tc = _tensorcores_per_chip()
        num_chunks = 2 if (n_tc >= 2 and task_num >= 2
                           and task_num % 2 == 0) else 1
    assert task_num % num_chunks == 0
    tpb = task_num // num_chunks  # tasks per grid step

    xs = x_spt.reshape(task_num, setsz, d).astype(jnp.float32)
    xq = x_qry.reshape(task_num, qsz, d).astype(jnp.float32)
    ys = y_spt.reshape(task_num, setsz, 1).astype(jnp.int32)
    yq = y_qry.reshape(task_num, qsz, 1).astype(jnp.int32)
    w2t = jnp.transpose(w2.astype(jnp.float32))          # (n_way, hdim)

    kernel = functools.partial(
        _meta_kernel,
        update_lr=float(update_lr),
        num_inner_steps=int(update_step) + 1,            # reference step count
        task_num=task_num)

    loss_out, corr_out = pl.pallas_call(
        kernel,
        out_shape=(jax.ShapeDtypeStruct((num_chunks, 1, 128), jnp.float32),
                   jax.ShapeDtypeStruct((num_chunks, 1, 128), jnp.float32)),
        grid_spec=pltpu.PrefetchScalarGridSpec(
            num_scalar_prefetch=0,
            grid=(num_chunks,),
            in_specs=[
                pl.BlockSpec((tpb, setsz, d), lambda c: (c, 0, 0)),
                pl.BlockSpec((tpb, setsz, 1), lambda c: (c, 0, 0)),
                pl.BlockSpec((tpb, qsz, d), lambda c: (c, 0, 0)),
                pl.BlockSpec((tpb, qsz, 1), lambda c: (c, 0, 0)),
                pl.BlockSpec((d, hdim), lambda c: (0, 0)),
                pl.BlockSpec((1, hdim), lambda c: (0, 0)),
                pl.BlockSpec((n_way, hdim), lambda c: (0, 0)),
                pl.BlockSpec((1, n_way), lambda c: (0, 0)),
            ],
            out_specs=[
                pl.BlockSpec((1, 1, 128), lambda c: (c, 0, 0)),
                pl.BlockSpec((1, 1, 128), lambda c: (c, 0, 0)),
            ],
        ),
        compiler_params=pltpu.CompilerParams(
            dimension_semantics=("parallel",)),
    )(xs, ys, xq, yq,
      w1.astype(jnp.float32), b1.astype(jnp.float32),
      w2t, b2.astype(jnp.float32))

    lossfull = jnp.sum(loss_out[:, 0, 0])
    total_correct = jnp.sum(corr_out[:, 0, 0])
    # Reference Meta.forward only ever populates corrects[0]; slots 1.. stay 0.
    corrects = jnp.zeros((update_step,), jnp.float32).at[0].set(total_correct)
    accs = corrects / float(k_qry * n_way * task_num)
    return accs, lossfull


if __name__ == "__main__":
    # Small, deterministic configuration (SMAML-style args).
    n_way, k_spt, k_qry = 4, 2, 2
    task_num = 2
    update_lr = 0.01
    update_step = 2
    C, H, W = 1, 16, 16
    hidden = 32
    setsz = n_way * k_spt
    querysz = n_way * k_qry
    d = C * H * W

    key = jax.random.PRNGKey(0)
    k1, k2, k3, k4, k5, k6 = jax.random.split(key, 6)

    x_spt = jax.random.normal(k1, (task_num, setsz, C, H, W), jnp.float32)
    y_spt = jax.random.randint(k2, (task_num, setsz), 0, n_way, jnp.int32)
    x_qry = jax.random.normal(k3, (task_num, querysz, C, H, W), jnp.float32)
    y_qry = jax.random.randint(k4, (task_num, querysz), 0, n_way, jnp.int32)

    # Deterministic "SCNN2"-stand-in MLP parameters (f32 masters).
    w1 = 0.05 * jax.random.normal(k5, (d, hidden), jnp.float32)
    b1 = jnp.zeros((1, hidden), jnp.float32)
    w2 = 0.05 * jax.random.normal(k6, (hidden, n_way), jnp.float32)
    b2 = jnp.zeros((1, n_way), jnp.float32)

    accs, lossfull = meta_forward(
        x_spt, y_spt, x_qry, y_qry, (w1, b1, w2, b2),
        n_way=n_way, k_qry=k_qry, update_lr=update_lr, update_step=update_step)
    jax.block_until_ready((accs, lossfull))
    print("KERNEL_OK")
</pallas_src>

<mosaic_0001>
module attributes {stable_mosaic.version = 11 : i64} {
  func.func @_meta_kernel(%arg0: i32, %arg1: memref<2x8x256xf32, #tpu.memory_space<vmem>>, %arg2: memref<2x8x1xi32, #tpu.memory_space<vmem>>, %arg3: memref<2x8x256xf32, #tpu.memory_space<vmem>>, %arg4: memref<2x8x1xi32, #tpu.memory_space<vmem>>, %arg5: memref<256x32xf32, #tpu.memory_space<vmem>>, %arg6: memref<1x32xf32, #tpu.memory_space<vmem>>, %arg7: memref<4x32xf32, #tpu.memory_space<vmem>>, %arg8: memref<1x4xf32, #tpu.memory_space<vmem>>, %arg9: memref<1x1x128xf32, #tpu.memory_space<vmem>>, %arg10: memref<1x1x128xf32, #tpu.memory_space<vmem>>) attributes {dimension_semantics = [#tpu.dimension_semantics<parallel>], iteration_bounds = array<i64: 1>, scalar_prefetch = 0 : i64, scratch_operands = 0 : i64, tpu.core_type = #tpu.core_type<tc>, window_params = [{transform_indices = @transform_0, window_bounds = array<i64: 2, 8, 256>}, {transform_indices = @transform_1, window_bounds = array<i64: 2, 8, 1>}, {transform_indices = @transform_2, window_bounds = array<i64: 2, 8, 256>}, {transform_indices = @transform_3, window_bounds = array<i64: 2, 8, 1>}, {pipeline_mode = #tpu.pipeline_mode<synchronous>, transform_indices = @transform_4, window_bounds = array<i64: 256, 32>}, {pipeline_mode = #tpu.pipeline_mode<synchronous>, transform_indices = @transform_5, window_bounds = array<i64: 1, 32>}, {pipeline_mode = #tpu.pipeline_mode<synchronous>, transform_indices = @transform_6, window_bounds = array<i64: 4, 32>}, {pipeline_mode = #tpu.pipeline_mode<synchronous>, transform_indices = @transform_7, window_bounds = array<i64: 1, 4>}, {transform_indices = @transform_8, window_bounds = array<i64: 1, 1, 128>}, {transform_indices = @transform_9, window_bounds = array<i64: 1, 1, 128>}]} {
    %c0 = arith.constant 0 : index
    %c0_0 = arith.constant 0 : index
    %c0_1 = arith.constant 0 : index
    %0 = vector.load %arg1[%c0, %c0_0, %c0_1] : memref<2x8x256xf32, #tpu.memory_space<vmem>>, vector<2x8x256xf32>
    %c0_2 = arith.constant 0 : index
    %c0_3 = arith.constant 0 : index
    %c0_4 = arith.constant 0 : index
    %1 = vector.load %arg3[%c0_2, %c0_3, %c0_4] : memref<2x8x256xf32, #tpu.memory_space<vmem>>, vector<2x8x256xf32>
    %c0_5 = arith.constant 0 : index
    %c0_6 = arith.constant 0 : index
    %c0_7 = arith.constant 0 : index
    %2 = vector.load %arg2[%c0_5, %c0_6, %c0_7] : memref<2x8x1xi32, #tpu.memory_space<vmem>>, vector<2x8x1xi32>
    %c0_8 = arith.constant 0 : index
    %c0_9 = arith.constant 0 : index
    %c0_10 = arith.constant 0 : index
    %3 = vector.load %arg4[%c0_8, %c0_9, %c0_10] : memref<2x8x1xi32, #tpu.memory_space<vmem>>, vector<2x8x1xi32>
    %c0_11 = arith.constant 0 : index
    %c0_12 = arith.constant 0 : index
    %4 = vector.load %arg5[%c0_11, %c0_12] : memref<256x32xf32, #tpu.memory_space<vmem>>, vector<256x32xf32>
    %c0_13 = arith.constant 0 : index
    %c0_14 = arith.constant 0 : index
    %5 = vector.load %arg6[%c0_13, %c0_14] : memref<1x32xf32, #tpu.memory_space<vmem>>, vector<1x32xf32>
    %6 = vector.shape_cast %0 : vector<2x8x256xf32> to vector<16x256xf32>
    %7 = vector.shape_cast %1 : vector<2x8x256xf32> to vector<16x256xf32>
    %cst = arith.constant dense<0.000000e+00> : vector<16x32xf32>
    %8 = tpu.matmul %6, %4, %cst {dimension_numbers = #tpu.dot_dimension_numbers<[1], [0], [0], [1], [0, 0, 1, 1], [], []>} : vector<16x256xf32>, vector<256x32xf32>, vector<16x32xf32> -> vector<16x32xf32>
    %9 = vector.shape_cast %8 : vector<16x32xf32> to vector<2x8x32xf32>
    %10 = vector.shape_cast %5 : vector<1x32xf32> to vector<1x1x32xf32>
    %11 = vector.broadcast %10 : vector<1x1x32xf32> to vector<2x8x32xf32>
    %12 = arith.addf %9, %11 : vector<2x8x32xf32>
    %cst_15 = arith.constant dense<0.000000e+00> : vector<16x32xf32>
    %13 = tpu.matmul %7, %4, %cst_15 {dimension_numbers = #tpu.dot_dimension_numbers<[1], [0], [0], [1], [0, 0, 1, 1], [], []>} : vector<16x256xf32>, vector<256x32xf32>, vector<16x32xf32> -> vector<16x32xf32>
    %14 = vector.shape_cast %13 : vector<16x32xf32> to vector<2x8x32xf32>
    %15 = vector.shape_cast %5 : vector<1x32xf32> to vector<1x1x32xf32>
    %16 = vector.broadcast %15 : vector<1x1x32xf32> to vector<2x8x32xf32>
    %17 = arith.addf %14, %16 : vector<2x8x32xf32>
    "tpu.trace_start"() <{level = 10 : i32, message = "tnd,tmd->tnm"}> : () -> ()
    %cst_16 = arith.constant dense<0.000000e+00> : vector<2x8x8xf32>
    %18 = tpu.matmul %0, %0, %cst_16 {dimension_numbers = #tpu.dot_dimension_numbers<[2], [2], [1], [1], [0, 0, 0, 1, 1, 1], [0], [0]>} : vector<2x8x256xf32>, vector<2x8x256xf32>, vector<2x8x8xf32> -> vector<2x8x8xf32>
    "tpu.trace_stop"() : () -> ()
    "tpu.trace_start"() <{level = 10 : i32, message = "tqd,tmd->tqm"}> : () -> ()
    %cst_17 = arith.constant dense<0.000000e+00> : vector<2x8x8xf32>
    %19 = tpu.matmul %1, %0, %cst_17 {dimension_numbers = #tpu.dot_dimension_numbers<[2], [2], [1], [1], [0, 0, 0, 1, 1, 1], [0], [0]>} : vector<2x8x256xf32>, vector<2x8x256xf32>, vector<2x8x8xf32> -> vector<2x8x8xf32>
    "tpu.trace_stop"() : () -> ()
    %20 = tpu.iota {dimensions = array<i32: 2>} : vector<2x8x4xi32>
    %21 = vector.broadcast %2 : vector<2x8x1xi32> to vector<2x8x4xi32>
    %22 = arith.cmpi eq, %20, %21 : vector<2x8x4xi32>
    %23 = arith.extui %22 : vector<2x8x4xi1> to vector<2x8x4xi32>
    %24 = arith.sitofp %23 : vector<2x8x4xi32> to vector<2x8x4xf32>
    %25 = tpu.iota {dimensions = array<i32: 1>} : vector<2x4x32xi32>
    %cst_18 = arith.constant 0.000000e+00 : f32
    %26 = vector.broadcast %cst_18 : f32 to vector<2x8x32xf32>
    %c0_19 = arith.constant 0 : index
    %c0_20 = arith.constant 0 : index
    %27 = vector.load %arg7[%c0_19, %c0_20] : memref<4x32xf32, #tpu.memory_space<vmem>>, vector<4x32xf32>
    %28 = vector.shape_cast %27 : vector<4x32xf32> to vector<1x4x32xf32>
    %29 = vector.shape_cast %28 : vector<1x4x32xf32> to vector<1x4x32xf32>
    %30 = vector.broadcast %29 : vector<1x4x32xf32> to vector<2x4x32xf32>
    %c0_21 = arith.constant 0 : index
    %c0_22 = arith.constant 0 : index
    %31 = vector.load %arg8[%c0_21, %c0_22] : memref<1x4xf32, #tpu.memory_space<vmem>>, vector<1x4xf32>
    %32 = vector.shape_cast %31 : vector<1x4xf32> to vector<1x1x4xf32>
    %33 = vector.shape_cast %32 : vector<1x1x4xf32> to vector<1x1x4xf32>
    %34 = vector.broadcast %33 : vector<1x1x4xf32> to vector<2x1x4xf32>
    %c0_i32 = arith.constant 0 : i32
    %cst_23 = arith.constant 0.000000e+00 : f32
    %35 = vector.broadcast %cst_23 : f32 to vector<2x8x32xf32>
    %36 = arith.maximumf %12, %35 : vector<2x8x32xf32>
    %37 = tpu.iota {dimensions = array<i32: 2>} : vector<2x8x4xi32>
    %38 = vector.shape_cast %34 : vector<2x1x4xf32> to vector<2x1x4xf32>
    %39 = vector.broadcast %38 : vector<2x1x4xf32> to vector<2x8x4xf32>
    %40 = vector.extract_strided_slice %30 {offsets = [0, 0, 0], sizes = [2, 1, 32], strides = [1, 1, 1]} : vector<2x4x32xf32> to vector<2x1x32xf32>
    %41 = vector.broadcast %40 : vector<2x1x32xf32> to vector<2x8x32xf32>
    %42 = arith.mulf %36, %41 : vector<2x8x32xf32>
    %cst_24 = arith.constant dense<0.000000e+00> : vector<2x8xf32>
    %43 = vector.multi_reduction <add>, %42, %cst_24 [2] : vector<2x8x32xf32> to vector<2x8xf32>
    %44 = vector.shape_cast %43 : vector<2x8xf32> to vector<2x8x1xf32>
    %c0_i32_25 = arith.constant 0 : i32
    %45 = vector.broadcast %c0_i32_25 : i32 to vector<2x8x4xi32>
    %46 = arith.cmpi eq, %37, %45 : vector<2x8x4xi32>
    %cst_26 = arith.constant 0.000000e+00 : f32
    %47 = vector.shape_cast %44 : vector<2x8x1xf32> to vector<2x8x1xf32>
    %48 = vector.broadcast %47 : vector<2x8x1xf32> to vector<2x8x4xf32>
    %49 = vector.broadcast %cst_26 : f32 to vector<2x8x4xf32>
    %50 = arith.select %46, %48, %49 : vector<2x8x4xi1>, vector<2x8x4xf32>
    %51 = arith.addf %39, %50 : vector<2x8x4xf32>
    %52 = vector.extract_strided_slice %30 {offsets = [0, 1, 0], sizes = [2, 1, 32], strides = [1, 1, 1]} : vector<2x4x32xf32> to vector<2x1x32xf32>
    %53 = vector.broadcast %52 : vector<2x1x32xf32> to vector<2x8x32xf32>
    %54 = arith.mulf %36, %53 : vector<2x8x32xf32>
    %cst_27 = arith.constant dense<0.000000e+00> : vector<2x8xf32>
    %55 = vector.multi_reduction <add>, %54, %cst_27 [2] : vector<2x8x32xf32> to vector<2x8xf32>
    %56 = vector.shape_cast %55 : vector<2x8xf32> to vector<2x8x1xf32>
    %c1_i32 = arith.constant 1 : i32
    %57 = vector.broadcast %c1_i32 : i32 to vector<2x8x4xi32>
    %58 = arith.cmpi eq, %37, %57 : vector<2x8x4xi32>
    %cst_28 = arith.constant 0.000000e+00 : f32
    %59 = vector.shape_cast %56 : vector<2x8x1xf32> to vector<2x8x1xf32>
    %60 = vector.broadcast %59 : vector<2x8x1xf32> to vector<2x8x4xf32>
    %61 = vector.broadcast %cst_28 : f32 to vector<2x8x4xf32>
    %62 = arith.select %58, %60, %61 : vector<2x8x4xi1>, vector<2x8x4xf32>
    %63 = arith.addf %51, %62 : vector<2x8x4xf32>
    %64 = vector.extract_strided_slice %30 {offsets = [0, 2, 0], sizes = [2, 1, 32], strides = [1, 1, 1]} : vector<2x4x32xf32> to vector<2x1x32xf32>
    %65 = vector.broadcast %64 : vector<2x1x32xf32> to vector<2x8x32xf32>
    %66 = arith.mulf %36, %65 : vector<2x8x32xf32>
    %cst_29 = arith.constant dense<0.000000e+00> : vector<2x8xf32>
    %67 = vector.multi_reduction <add>, %66, %cst_29 [2] : vector<2x8x32xf32> to vector<2x8xf32>
    %68 = vector.shape_cast %67 : vector<2x8xf32> to vector<2x8x1xf32>
    %c2_i32 = arith.constant 2 : i32
    %69 = vector.broadcast %c2_i32 : i32 to vector<2x8x4xi32>
    %70 = arith.cmpi eq, %37, %69 : vector<2x8x4xi32>
    %cst_30 = arith.constant 0.000000e+00 : f32
    %71 = vector.shape_cast %68 : vector<2x8x1xf32> to vector<2x8x1xf32>
    %72 = vector.broadcast %71 : vector<2x8x1xf32> to vector<2x8x4xf32>
    %73 = vector.broadcast %cst_30 : f32 to vector<2x8x4xf32>
    %74 = arith.select %70, %72, %73 : vector<2x8x4xi1>, vector<2x8x4xf32>
    %75 = arith.addf %63, %74 : vector<2x8x4xf32>
    %76 = vector.extract_strided_slice %30 {offsets = [0, 3, 0], sizes = [2, 1, 32], strides = [1, 1, 1]} : vector<2x4x32xf32> to vector<2x1x32xf32>
    %77 = vector.broadcast %76 : vector<2x1x32xf32> to vector<2x8x32xf32>
    %78 = arith.mulf %36, %77 : vector<2x8x32xf32>
    %cst_31 = arith.constant dense<0.000000e+00> : vector<2x8xf32>
    %79 = vector.multi_reduction <add>, %78, %cst_31 [2] : vector<2x8x32xf32> to vector<2x8xf32>
    %80 = vector.shape_cast %79 : vector<2x8xf32> to vector<2x8x1xf32>
    %c3_i32 = arith.constant 3 : i32
    %81 = vector.broadcast %c3_i32 : i32 to vector<2x8x4xi32>
    %82 = arith.cmpi eq, %37, %81 : vector<2x8x4xi32>
    %cst_32 = arith.constant 0.000000e+00 : f32
    %83 = vector.shape_cast %80 : vector<2x8x1xf32> to vector<2x8x1xf32>
    %84 = vector.broadcast %83 : vector<2x8x1xf32> to vector<2x8x4xf32>
    %85 = vector.broadcast %cst_32 : f32 to vector<2x8x4xf32>
    %86 = arith.select %82, %84, %85 : vector<2x8x4xi1>, vector<2x8x4xf32>
    %87 = arith.addf %75, %86 : vector<2x8x4xf32>
    %cst_33 = arith.constant dense<0xFF800000> : vector<2x8xf32>
    %88 = vector.multi_reduction <maximumf>, %87, %cst_33 [2] : vector<2x8x4xf32> to vector<2x8xf32>
    %89 = vector.shape_cast %88 : vector<2x8xf32> to vector<2x8x1xf32>
    %90 = vector.broadcast %89 : vector<2x8x1xf32> to vector<2x8x4xf32>
    %91 = arith.subf %87, %90 : vector<2x8x4xf32>
    %92 = math.exp %91 : vector<2x8x4xf32>
    %cst_34 = arith.constant dense<0.000000e+00> : vector<2x8xf32>
    %93 = vector.multi_reduction <add>, %92, %cst_34 [2] : vector<2x8x4xf32> to vector<2x8xf32>
    %94 = vector.shape_cast %93 : vector<2x8xf32> to vector<2x8x1xf32>
    %95 = vector.broadcast %94 : vector<2x8x1xf32> to vector<2x8x4xf32>
    %96 = arith.divf %92, %95 : vector<2x8x4xf32>
    %97 = arith.subf %96, %24 : vector<2x8x4xf32>
    %cst_35 = arith.constant 0.000000e+00 : f32
    %98 = vector.broadcast %cst_35 : f32 to vector<2x8x32xf32>
    %99 = vector.extract_strided_slice %97 {offsets = [0, 0, 0], sizes = [2, 8, 1], strides = [1, 1, 1]} : vector<2x8x4xf32> to vector<2x8x1xf32>
    %100 = vector.extract_strided_slice %30 {offsets = [0, 0, 0], sizes = [2, 1, 32], strides = [1, 1, 1]} : vector<2x4x32xf32> to vector<2x1x32xf32>
    %101 = vector.broadcast %99 : vector<2x8x1xf32> to vector<2x8x32xf32>
    %102 = vector.broadcast %100 : vector<2x1x32xf32> to vector<2x8x32xf32>
    %103 = arith.mulf %101, %102 : vector<2x8x32xf32>
    %104 = arith.addf %98, %103 : vector<2x8x32xf32>
    %105 = vector.extract_strided_slice %97 {offsets = [0, 0, 1], sizes = [2, 8, 1], strides = [1, 1, 1]} : vector<2x8x4xf32> to vector<2x8x1xf32>
    %106 = vector.extract_strided_slice %30 {offsets = [0, 1, 0], sizes = [2, 1, 32], strides = [1, 1, 1]} : vector<2x4x32xf32> to vector<2x1x32xf32>
    %107 = vector.broadcast %105 : vector<2x8x1xf32> to vector<2x8x32xf32>
    %108 = vector.broadcast %106 : vector<2x1x32xf32> to vector<2x8x32xf32>
    %109 = arith.mulf %107, %108 : vector<2x8x32xf32>
    %110 = arith.addf %104, %109 : vector<2x8x32xf32>
    %111 = vector.extract_strided_slice %97 {offsets = [0, 0, 2], sizes = [2, 8, 1], strides = [1, 1, 1]} : vector<2x8x4xf32> to vector<2x8x1xf32>
    %112 = vector.extract_strided_slice %30 {offsets = [0, 2, 0], sizes = [2, 1, 32], strides = [1, 1, 1]} : vector<2x4x32xf32> to vector<2x1x32xf32>
    %113 = vector.broadcast %111 : vector<2x8x1xf32> to vector<2x8x32xf32>
    %114 = vector.broadcast %112 : vector<2x1x32xf32> to vector<2x8x32xf32>
    %115 = arith.mulf %113, %114 : vector<2x8x32xf32>
    %116 = arith.addf %110, %115 : vector<2x8x32xf32>
    %117 = vector.extract_strided_slice %97 {offsets = [0, 0, 3], sizes = [2, 8, 1], strides = [1, 1, 1]} : vector<2x8x4xf32> to vector<2x8x1xf32>
    %118 = vector.extract_strided_slice %30 {offsets = [0, 3, 0], sizes = [2, 1, 32], strides = [1, 1, 1]} : vector<2x4x32xf32> to vector<2x1x32xf32>
    %119 = vector.broadcast %117 : vector<2x8x1xf32> to vector<2x8x32xf32>
    %120 = vector.broadcast %118 : vector<2x1x32xf32> to vector<2x8x32xf32>
    %121 = arith.mulf %119, %120 : vector<2x8x32xf32>
    %122 = arith.addf %116, %121 : vector<2x8x32xf32>
    %cst_36 = arith.constant 0.000000e+00 : f32
    %123 = vector.broadcast %cst_36 : f32 to vector<2x8x32xf32>
    %124 = arith.cmpf ogt, %12, %123 : vector<2x8x32xf32>
    %125 = arith.extui %124 : vector<2x8x32xi1> to vector<2x8x32xi32>
    %126 = arith.sitofp %125 : vector<2x8x32xi32> to vector<2x8x32xf32>
    %127 = arith.mulf %122, %126 : vector<2x8x32xf32>
    %cst_37 = arith.constant 0.000000e+00 : f32
    %128 = vector.broadcast %cst_37 : f32 to vector<2x4x32xf32>
    %129 = vector.extract_strided_slice %97 {offsets = [0, 0, 0], sizes = [2, 8, 1], strides = [1, 1, 1]} : vector<2x8x4xf32> to vector<2x8x1xf32>
    %130 = vector.broadcast %129 : vector<2x8x1xf32> to vector<2x8x32xf32>
    %131 = arith.mulf %36, %130 : vector<2x8x32xf32>
    %cst_38 = arith.constant dense<0.000000e+00> : vector<2x32xf32>
    %132 = vector.multi_reduction <add>, %131, %cst_38 [1] : vector<2x8x32xf32> to vector<2x32xf32>
    %133 = vector.shape_cast %132 : vector<2x32xf32> to vector<2x1x32xf32>
    %c0_i32_39 = arith.constant 0 : i32
    %134 = vector.broadcast %c0_i32_39 : i32 to vector<2x4x32xi32>
    %135 = arith.cmpi eq, %25, %134 : vector<2x4x32xi32>
    %cst_40 = arith.constant 0.000000e+00 : f32
    %136 = vector.shape_cast %133 : vector<2x1x32xf32> to vector<2x1x32xf32>
    %137 = vector.broadcast %136 : vector<2x1x32xf32> to vector<2x4x32xf32>
    %138 = vector.broadcast %cst_40 : f32 to vector<2x4x32xf32>
    %139 = arith.select %135, %137, %138 : vector<2x4x32xi1>, vector<2x4x32xf32>
    %140 = arith.addf %128, %139 : vector<2x4x32xf32>
    %141 = vector.extract_strided_slice %97 {offsets = [0, 0, 1], sizes = [2, 8, 1], strides = [1, 1, 1]} : vector<2x8x4xf32> to vector<2x8x1xf32>
    %142 = vector.broadcast %141 : vector<2x8x1xf32> to vector<2x8x32xf32>
    %143 = arith.mulf %36, %142 : vector<2x8x32xf32>
    %cst_41 = arith.constant dense<0.000000e+00> : vector<2x32xf32>
    %144 = vector.multi_reduction <add>, %143, %cst_41 [1] : vector<2x8x32xf32> to vector<2x32xf32>
    %145 = vector.shape_cast %144 : vector<2x32xf32> to vector<2x1x32xf32>
    %c1_i32_42 = arith.constant 1 : i32
    %146 = vector.broadcast %c1_i32_42 : i32 to vector<2x4x32xi32>
    %147 = arith.cmpi eq, %25, %146 : vector<2x4x32xi32>
    %cst_43 = arith.constant 0.000000e+00 : f32
    %148 = vector.shape_cast %145 : vector<2x1x32xf32> to vector<2x1x32xf32>
    %149 = vector.broadcast %148 : vector<2x1x32xf32> to vector<2x4x32xf32>
    %150 = vector.broadcast %cst_43 : f32 to vector<2x4x32xf32>
    %151 = arith.select %147, %149, %150 : vector<2x4x32xi1>, vector<2x4x32xf32>
    %152 = arith.addf %140, %151 : vector<2x4x32xf32>
    %153 = vector.extract_strided_slice %97 {offsets = [0, 0, 2], sizes = [2, 8, 1], strides = [1, 1, 1]} : vector<2x8x4xf32> to vector<2x8x1xf32>
    %154 = vector.broadcast %153 : vector<2x8x1xf32> to vector<2x8x32xf32>
    %155 = arith.mulf %36, %154 : vector<2x8x32xf32>
    %cst_44 = arith.constant dense<0.000000e+00> : vector<2x32xf32>
    %156 = vector.multi_reduction <add>, %155, %cst_44 [1] : vector<2x8x32xf32> to vector<2x32xf32>
    %157 = vector.shape_cast %156 : vector<2x32xf32> to vector<2x1x32xf32>
    %c2_i32_45 = arith.constant 2 : i32
    %158 = vector.broadcast %c2_i32_45 : i32 to vector<2x4x32xi32>
    %159 = arith.cmpi eq, %25, %158 : vector<2x4x32xi32>
    %cst_46 = arith.constant 0.000000e+00 : f32
    %160 = vector.shape_cast %157 : vector<2x1x32xf32> to vector<2x1x32xf32>
    %161 = vector.broadcast %160 : vector<2x1x32xf32> to vector<2x4x32xf32>
    %162 = vector.broadcast %cst_46 : f32 to vector<2x4x32xf32>
    %163 = arith.select %159, %161, %162 : vector<2x4x32xi1>, vector<2x4x32xf32>
    %164 = arith.addf %152, %163 : vector<2x4x32xf32>
    %165 = vector.extract_strided_slice %97 {offsets = [0, 0, 3], sizes = [2, 8, 1], strides = [1, 1, 1]} : vector<2x8x4xf32> to vector<2x8x1xf32>
    %166 = vector.broadcast %165 : vector<2x8x1xf32> to vector<2x8x32xf32>
    %167 = arith.mulf %36, %166 : vector<2x8x32xf32>
    %cst_47 = arith.constant dense<0.000000e+00> : vector<2x32xf32>
    %168 = vector.multi_reduction <add>, %167, %cst_47 [1] : vector<2x8x32xf32> to vector<2x32xf32>
    %169 = vector.shape_cast %168 : vector<2x32xf32> to vector<2x1x32xf32>
    %c3_i32_48 = arith.constant 3 : i32
    %170 = vector.broadcast %c3_i32_48 : i32 to vector<2x4x32xi32>
    %171 = arith.cmpi eq, %25, %170 : vector<2x4x32xi32>
    %cst_49 = arith.constant 0.000000e+00 : f32
    %172 = vector.shape_cast %169 : vector<2x1x32xf32> to vector<2x1x32xf32>
    %173 = vector.broadcast %172 : vector<2x1x32xf32> to vector<2x4x32xf32>
    %174 = vector.broadcast %cst_49 : f32 to vector<2x4x32xf32>
    %175 = arith.select %171, %173, %174 : vector<2x4x32xi1>, vector<2x4x32xf32>
    %176 = arith.addf %164, %175 : vector<2x4x32xf32>
    %cst_50 = arith.constant dense<0.000000e+00> : vector<2x4xf32>
    %177 = vector.multi_reduction <add>, %97, %cst_50 [1] : vector<2x8x4xf32> to vector<2x4xf32>
    %178 = vector.shape_cast %177 : vector<2x4xf32> to vector<2x1x4xf32>
    %cst_51 = arith.constant 0.000000e+00 : f32
    %179 = vector.broadcast %cst_51 : f32 to vector<2x8x32xf32>
    %180 = vector.extract_strided_slice %18 {offsets = [0, 0, 0], sizes = [2, 8, 1], strides = [1, 1, 1]} : vector<2x8x8xf32> to vector<2x8x1xf32>
    %181 = vector.extract_strided_slice %127 {offsets = [0, 0, 0], sizes = [2, 1, 32], strides = [1, 1, 1]} : vector<2x8x32xf32> to vector<2x1x32xf32>
    %182 = vector.broadcast %180 : vector<2x8x1xf32> to vector<2x8x32xf32>
    %183 = vector.broadcast %181 : vector<2x1x32xf32> to vector<2x8x32xf32>
    %184 = arith.mulf %182, %183 : vector<2x8x32xf32>
    %185 = arith.addf %179, %184 : vector<2x8x32xf32>
    %186 = vector.extract_strided_slice %18 {offsets = [0, 0, 1], sizes = [2, 8, 1], strides = [1, 1, 1]} : vector<2x8x8xf32> to vector<2x8x1xf32>
    %187 = vector.extract_strided_slice %127 {offsets = [0, 1, 0], sizes = [2, 1, 32], strides = [1, 1, 1]} : vector<2x8x32xf32> to vector<2x1x32xf32>
    %188 = vector.broadcast %186 : vector<2x8x1xf32> to vector<2x8x32xf32>
    %189 = vector.broadcast %187 : vector<2x1x32xf32> to vector<2x8x32xf32>
    %190 = arith.mulf %188, %189 : vector<2x8x32xf32>
    %191 = arith.addf %185, %190 : vector<2x8x32xf32>
    %192 = vector.extract_strided_slice %18 {offsets = [0, 0, 2], sizes = [2, 8, 1], strides = [1, 1, 1]} : vector<2x8x8xf32> to vector<2x8x1xf32>
    %193 = vector.extract_strided_slice %127 {offsets = [0, 2, 0], sizes = [2, 1, 32], strides = [1, 1, 1]} : vector<2x8x32xf32> to vector<2x1x32xf32>
    %194 = vector.broadcast %192 : vector<2x8x1xf32> to vector<2x8x32xf32>
    %195 = vector.broadcast %193 : vector<2x1x32xf32> to vector<2x8x32xf32>
    %196 = arith.mulf %194, %195 : vector<2x8x32xf32>
    %197 = arith.addf %191, %196 : vector<2x8x32xf32>
    %198 = vector.extract_strided_slice %18 {offsets = [0, 0, 3], sizes = [2, 8, 1], strides = [1, 1, 1]} : vector<2x8x8xf32> to vector<2x8x1xf32>
    %199 = vector.extract_strided_slice %127 {offsets = [0, 3, 0], sizes = [2, 1, 32], strides = [1, 1, 1]} : vector<2x8x32xf32> to vector<2x1x32xf32>
    %200 = vector.broadcast %198 : vector<2x8x1xf32> to vector<2x8x32xf32>
    %201 = vector.broadcast %199 : vector<2x1x32xf32> to vector<2x8x32xf32>
    %202 = arith.mulf %200, %201 : vector<2x8x32xf32>
    %203 = arith.addf %197, %202 : vector<2x8x32xf32>
    %204 = vector.extract_strided_slice %18 {offsets = [0, 0, 4], sizes = [2, 8, 1], strides = [1, 1, 1]} : vector<2x8x8xf32> to vector<2x8x1xf32>
    %205 = vector.extract_strided_slice %127 {offsets = [0, 4, 0], sizes = [2, 1, 32], strides = [1, 1, 1]} : vector<2x8x32xf32> to vector<2x1x32xf32>
    %206 = vector.broadcast %204 : vector<2x8x1xf32> to vector<2x8x32xf32>
    %207 = vector.broadcast %205 : vector<2x1x32xf32> to vector<2x8x32xf32>
    %208 = arith.mulf %206, %207 : vector<2x8x32xf32>
    %209 = arith.addf %203, %208 : vector<2x8x32xf32>
    %210 = vector.extract_strided_slice %18 {offsets = [0, 0, 5], sizes = [2, 8, 1], strides = [1, 1, 1]} : vector<2x8x8xf32> to vector<2x8x1xf32>
    %211 = vector.extract_strided_slice %127 {offsets = [0, 5, 0], sizes = [2, 1, 32], strides = [1, 1, 1]} : vector<2x8x32xf32> to vector<2x1x32xf32>
    %212 = vector.broadcast %210 : vector<2x8x1xf32> to vector<2x8x32xf32>
    %213 = vector.broadcast %211 : vector<2x1x32xf32> to vector<2x8x32xf32>
    %214 = arith.mulf %212, %213 : vector<2x8x32xf32>
    %215 = arith.addf %209, %214 : vector<2x8x32xf32>
    %216 = vector.extract_strided_slice %18 {offsets = [0, 0, 6], sizes = [2, 8, 1], strides = [1, 1, 1]} : vector<2x8x8xf32> to vector<2x8x1xf32>
    %217 = vector.extract_strided_slice %127 {offsets = [0, 6, 0], sizes = [2, 1, 32], strides = [1, 1, 1]} : vector<2x8x32xf32> to vector<2x1x32xf32>
    %218 = vector.broadcast %216 : vector<2x8x1xf32> to vector<2x8x32xf32>
    %219 = vector.broadcast %217 : vector<2x1x32xf32> to vector<2x8x32xf32>
    %220 = arith.mulf %218, %219 : vector<2x8x32xf32>
    %221 = arith.addf %215, %220 : vector<2x8x32xf32>
    %222 = vector.extract_strided_slice %18 {offsets = [0, 0, 7], sizes = [2, 8, 1], strides = [1, 1, 1]} : vector<2x8x8xf32> to vector<2x8x1xf32>
    %223 = vector.extract_strided_slice %127 {offsets = [0, 7, 0], sizes = [2, 1, 32], strides = [1, 1, 1]} : vector<2x8x32xf32> to vector<2x1x32xf32>
    %224 = vector.broadcast %222 : vector<2x8x1xf32> to vector<2x8x32xf32>
    %225 = vector.broadcast %223 : vector<2x1x32xf32> to vector<2x8x32xf32>
    %226 = arith.mulf %224, %225 : vector<2x8x32xf32>
    %227 = arith.addf %221, %226 : vector<2x8x32xf32>
    %cst_52 = arith.constant dense<0.000000e+00> : vector<2x32xf32>
    %228 = vector.multi_reduction <add>, %127, %cst_52 [1] : vector<2x8x32xf32> to vector<2x32xf32>
    %229 = vector.shape_cast %228 : vector<2x32xf32> to vector<2x1x32xf32>
    %230 = vector.broadcast %229 : vector<2x1x32xf32> to vector<2x8x32xf32>
    %231 = arith.addf %227, %230 : vector<2x8x32xf32>
    %cst_53 = arith.constant 1.250000e-03 : f32
    %232 = vector.broadcast %cst_53 : f32 to vector<2x8x32xf32>
    %233 = arith.mulf %232, %231 : vector<2x8x32xf32>
    %234 = arith.subf %12, %233 : vector<2x8x32xf32>
    %235 = arith.addf %26, %127 : vector<2x8x32xf32>
    %cst_54 = arith.constant 1.250000e-03 : f32
    %236 = vector.broadcast %cst_54 : f32 to vector<2x4x32xf32>
    %237 = arith.mulf %236, %176 : vector<2x4x32xf32>
    %238 = arith.subf %30, %237 : vector<2x4x32xf32>
    %cst_55 = arith.constant 1.250000e-03 : f32
    %239 = vector.broadcast %cst_55 : f32 to vector<2x1x4xf32>
    %240 = arith.mulf %239, %178 : vector<2x1x4xf32>
    %241 = arith.subf %34, %240 : vector<2x1x4xf32>
    %c1_i32_56 = arith.constant 1 : i32
    %cst_57 = arith.constant 0.000000e+00 : f32
    %242 = vector.broadcast %cst_57 : f32 to vector<2x8x32xf32>
    %243 = arith.maximumf %234, %242 : vector<2x8x32xf32>
    %244 = tpu.iota {dimensions = array<i32: 2>} : vector<2x8x4xi32>
    %245 = vector.shape_cast %241 : vector<2x1x4xf32> to vector<2x1x4xf32>
    %246 = vector.broadcast %245 : vector<2x1x4xf32> to vector<2x8x4xf32>
    %247 = vector.extract_strided_slice %238 {offsets = [0, 0, 0], sizes = [2, 1, 32], strides = [1, 1, 1]} : vector<2x4x32xf32> to vector<2x1x32xf32>
    %248 = vector.broadcast %247 : vector<2x1x32xf32> to vector<2x8x32xf32>
    %249 = arith.mulf %243, %248 : vector<2x8x32xf32>
    %cst_58 = arith.constant dense<0.000000e+00> : vector<2x8xf32>
    %250 = vector.multi_reduction <add>, %249, %cst_58 [2] : vector<2x8x32xf32> to vector<2x8xf32>
    %251 = vector.shape_cast %250 : vector<2x8xf32> to vector<2x8x1xf32>
    %c0_i32_59 = arith.constant 0 : i32
    %252 = vector.broadcast %c0_i32_59 : i32 to vector<2x8x4xi32>
    %253 = arith.cmpi eq, %244, %252 : vector<2x8x4xi32>
    %cst_60 = arith.constant 0.000000e+00 : f32
    %254 = vector.shape_cast %251 : vector<2x8x1xf32> to vector<2x8x1xf32>
    %255 = vector.broadcast %254 : vector<2x8x1xf32> to vector<2x8x4xf32>
    %256 = vector.broadcast %cst_60 : f32 to vector<2x8x4xf32>
    %257 = arith.select %253, %255, %256 : vector<2x8x4xi1>, vector<2x8x4xf32>
    %258 = arith.addf %246, %257 : vector<2x8x4xf32>
    %259 = vector.extract_strided_slice %238 {offsets = [0, 1, 0], sizes = [2, 1, 32], strides = [1, 1, 1]} : vector<2x4x32xf32> to vector<2x1x32xf32>
    %260 = vector.broadcast %259 : vector<2x1x32xf32> to vector<2x8x32xf32>
    %261 = arith.mulf %243, %260 : vector<2x8x32xf32>
    %cst_61 = arith.constant dense<0.000000e+00> : vector<2x8xf32>
    %262 = vector.multi_reduction <add>, %261, %cst_61 [2] : vector<2x8x32xf32> to vector<2x8xf32>
    %263 = vector.shape_cast %262 : vector<2x8xf32> to vector<2x8x1xf32>
    %c1_i32_62 = arith.constant 1 : i32
    %264 = vector.broadcast %c1_i32_62 : i32 to vector<2x8x4xi32>
    %265 = arith.cmpi eq, %244, %264 : vector<2x8x4xi32>
    %cst_63 = arith.constant 0.000000e+00 : f32
    %266 = vector.shape_cast %263 : vector<2x8x1xf32> to vector<2x8x1xf32>
    %267 = vector.broadcast %266 : vector<2x8x1xf32> to vector<2x8x4xf32>
    %268 = vector.broadcast %cst_63 : f32 to vector<2x8x4xf32>
    %269 = arith.select %265, %267, %268 : vector<2x8x4xi1>, vector<2x8x4xf32>
    %270 = arith.addf %258, %269 : vector<2x8x4xf32>
    %271 = vector.extract_strided_slice %238 {offsets = [0, 2, 0], sizes = [2, 1, 32], strides = [1, 1, 1]} : vector<2x4x32xf32> to vector<2x1x32xf32>
    %272 = vector.broadcast %271 : vector<2x1x32xf32> to vector<2x8x32xf32>
    %273 = arith.mulf %243, %272 : vector<2x8x32xf32>
    %cst_64 = arith.constant dense<0.000000e+00> : vector<2x8xf32>
    %274 = vector.multi_reduction <add>, %273, %cst_64 [2] : vector<2x8x32xf32> to vector<2x8xf32>
    %275 = vector.shape_cast %274 : vector<2x8xf32> to vector<2x8x1xf32>
    %c2_i32_65 = arith.constant 2 : i32
    %276 = vector.broadcast %c2_i32_65 : i32 to vector<2x8x4xi32>
    %277 = arith.cmpi eq, %244, %276 : vector<2x8x4xi32>
    %cst_66 = arith.constant 0.000000e+00 : f32
    %278 = vector.shape_cast %275 : vector<2x8x1xf32> to vector<2x8x1xf32>
    %279 = vector.broadcast %278 : vector<2x8x1xf32> to vector<2x8x4xf32>
    %280 = vector.broadcast %cst_66 : f32 to vector<2x8x4xf32>
    %281 = arith.select %277, %279, %280 : vector<2x8x4xi1>, vector<2x8x4xf32>
    %282 = arith.addf %270, %281 : vector<2x8x4xf32>
    %283 = vector.extract_strided_slice %238 {offsets = [0, 3, 0], sizes = [2, 1, 32], strides = [1, 1, 1]} : vector<2x4x32xf32> to vector<2x1x32xf32>
    %284 = vector.broadcast %283 : vector<2x1x32xf32> to vector<2x8x32xf32>
    %285 = arith.mulf %243, %284 : vector<2x8x32xf32>
    %cst_67 = arith.constant dense<0.000000e+00> : vector<2x8xf32>
    %286 = vector.multi_reduction <add>, %285, %cst_67 [2] : vector<2x8x32xf32> to vector<2x8xf32>
    %287 = vector.shape_cast %286 : vector<2x8xf32> to vector<2x8x1xf32>
    %c3_i32_68 = arith.constant 3 : i32
    %288 = vector.broadcast %c3_i32_68 : i32 to vector<2x8x4xi32>
    %289 = arith.cmpi eq, %244, %288 : vector<2x8x4xi32>
    %cst_69 = arith.constant 0.000000e+00 : f32
    %290 = vector.shape_cast %287 : vector<2x8x1xf32> to vector<2x8x1xf32>
    %291 = vector.broadcast %290 : vector<2x8x1xf32> to vector<2x8x4xf32>
    %292 = vector.broadcast %cst_69 : f32 to vector<2x8x4xf32>
    %293 = arith.select %289, %291, %292 : vector<2x8x4xi1>, vector<2x8x4xf32>
    %294 = arith.addf %282, %293 : vector<2x8x4xf32>
    %cst_70 = arith.constant dense<0xFF800000> : vector<2x8xf32>
    %295 = vector.multi_reduction <maximumf>, %294, %cst_70 [2] : vector<2x8x4xf32> to vector<2x8xf32>
    %296 = vector.shape_cast %295 : vector<2x8xf32> to vector<2x8x1xf32>
    %297 = vector.broadcast %296 : vector<2x8x1xf32> to vector<2x8x4xf32>
    %298 = arith.subf %294, %297 : vector<2x8x4xf32>
    %299 = math.exp %298 : vector<2x8x4xf32>
    %cst_71 = arith.constant dense<0.000000e+00> : vector<2x8xf32>
    %300 = vector.multi_reduction <add>, %299, %cst_71 [2] : vector<2x8x4xf32> to vector<2x8xf32>
    %301 = vector.shape_cast %300 : vector<2x8xf32> to vector<2x8x1xf32>
    %302 = vector.broadcast %301 : vector<2x8x1xf32> to vector<2x8x4xf32>
    %303 = arith.divf %299, %302 : vector<2x8x4xf32>
    %304 = arith.subf %303, %24 : vector<2x8x4xf32>
    %cst_72 = arith.constant 0.000000e+00 : f32
    %305 = vector.broadcast %cst_72 : f32 to vector<2x8x32xf32>
    %306 = vector.extract_strided_slice %304 {offsets = [0, 0, 0], sizes = [2, 8, 1], strides = [1, 1, 1]} : vector<2x8x4xf32> to vector<2x8x1xf32>
    %307 = vector.extract_strided_slice %238 {offsets = [0, 0, 0], sizes = [2, 1, 32], strides = [1, 1, 1]} : vector<2x4x32xf32> to vector<2x1x32xf32>
    %308 = vector.broadcast %306 : vector<2x8x1xf32> to vector<2x8x32xf32>
    %309 = vector.broadcast %307 : vector<2x1x32xf32> to vector<2x8x32xf32>
    %310 = arith.mulf %308, %309 : vector<2x8x32xf32>
    %311 = arith.addf %305, %310 : vector<2x8x32xf32>
    %312 = vector.extract_strided_slice %304 {offsets = [0, 0, 1], sizes = [2, 8, 1], strides = [1, 1, 1]} : vector<2x8x4xf32> to vector<2x8x1xf32>
    %313 = vector.extract_strided_slice %238 {offsets = [0, 1, 0], sizes = [2, 1, 32], strides = [1, 1, 1]} : vector<2x4x32xf32> to vector<2x1x32xf32>
    %314 = vector.broadcast %312 : vector<2x8x1xf32> to vector<2x8x32xf32>
    %315 = vector.broadcast %313 : vector<2x1x32xf32> to vector<2x8x32xf32>
    %316 = arith.mulf %314, %315 : vector<2x8x32xf32>
    %317 = arith.addf %311, %316 : vector<2x8x32xf32>
    %318 = vector.extract_strided_slice %304 {offsets = [0, 0, 2], sizes = [2, 8, 1], strides = [1, 1, 1]} : vector<2x8x4xf32> to vector<2x8x1xf32>
    %319 = vector.extract_strided_slice %238 {offsets = [0, 2, 0], sizes = [2, 1, 32], strides = [1, 1, 1]} : vector<2x4x32xf32> to vector<2x1x32xf32>
    %320 = vector.broadcast %318 : vector<2x8x1xf32> to vector<2x8x32xf32>
    %321 = vector.broadcast %319 : vector<2x1x32xf32> to vector<2x8x32xf32>
    %322 = arith.mulf %320, %321 : vector<2x8x32xf32>
    %323 = arith.addf %317, %322 : vector<2x8x32xf32>
    %324 = vector.extract_strided_slice %304 {offsets = [0, 0, 3], sizes = [2, 8, 1], strides = [1, 1, 1]} : vector<2x8x4xf32> to vector<2x8x1xf32>
    %325 = vector.extract_strided_slice %238 {offsets = [0, 3, 0], sizes = [2, 1, 32], strides = [1, 1, 1]} : vector<2x4x32xf32> to vector<2x1x32xf32>
    %326 = vector.broadcast %324 : vector<2x8x1xf32> to vector<2x8x32xf32>
    %327 = vector.broadcast %325 : vector<2x1x32xf32> to vector<2x8x32xf32>
    %328 = arith.mulf %326, %327 : vector<2x8x32xf32>
    %329 = arith.addf %323, %328 : vector<2x8x32xf32>
    %cst_73 = arith.constant 0.000000e+00 : f32
    %330 = vector.broadcast %cst_73 : f32 to vector<2x8x32xf32>
    %331 = arith.cmpf ogt, %234, %330 : vector<2x8x32xf32>
    %332 = arith.extui %331 : vector<2x8x32xi1> to vector<2x8x32xi32>
    %333 = arith.sitofp %332 : vector<2x8x32xi32> to vector<2x8x32xf32>
    %334 = arith.mulf %329, %333 : vector<2x8x32xf32>
    %cst_74 = arith.constant 0.000000e+00 : f32
    %335 = vector.broadcast %cst_74 : f32 to vector<2x4x32xf32>
    %336 = vector.extract_strided_slice %304 {offsets = [0, 0, 0], sizes = [2, 8, 1], strides = [1, 1, 1]} : vector<2x8x4xf32> to vector<2x8x1xf32>
    %337 = vector.broadcast %336 : vector<2x8x1xf32> to vector<2x8x32xf32>
    %338 = arith.mulf %243, %337 : vector<2x8x32xf32>
    %cst_75 = arith.constant dense<0.000000e+00> : vector<2x32xf32>
    %339 = vector.multi_reduction <add>, %338, %cst_75 [1] : vector<2x8x32xf32> to vector<2x32xf32>
    %340 = vector.shape_cast %339 : vector<2x32xf32> to vector<2x1x32xf32>
    %c0_i32_76 = arith.constant 0 : i32
    %341 = vector.broadcast %c0_i32_76 : i32 to vector<2x4x32xi32>
    %342 = arith.cmpi eq, %25, %341 : vector<2x4x32xi32>
    %cst_77 = arith.constant 0.000000e+00 : f32
    %343 = vector.shape_cast %340 : vector<2x1x32xf32> to vector<2x1x32xf32>
    %344 = vector.broadcast %343 : vector<2x1x32xf32> to vector<2x4x32xf32>
    %345 = vector.broadcast %cst_77 : f32 to vector<2x4x32xf32>
    %346 = arith.select %342, %344, %345 : vector<2x4x32xi1>, vector<2x4x32xf32>
    %347 = arith.addf %335, %346 : vector<2x4x32xf32>
    %348 = vector.extract_strided_slice %304 {offsets = [0, 0, 1], sizes = [2, 8, 1], strides = [1, 1, 1]} : vector<2x8x4xf32> to vector<2x8x1xf32>
    %349 = vector.broadcast %348 : vector<2x8x1xf32> to vector<2x8x32xf32>
    %350 = arith.mulf %243, %349 : vector<2x8x32xf32>
    %cst_78 = arith.constant dense<0.000000e+00> : vector<2x32xf32>
    %351 = vector.multi_reduction <add>, %350, %cst_78 [1] : vector<2x8x32xf32> to vector<2x32xf32>
    %352 = vector.shape_cast %351 : vector<2x32xf32> to vector<2x1x32xf32>
    %c1_i32_79 = arith.constant 1 : i32
    %353 = vector.broadcast %c1_i32_79 : i32 to vector<2x4x32xi32>
    %354 = arith.cmpi eq, %25, %353 : vector<2x4x32xi32>
    %cst_80 = arith.constant 0.000000e+00 : f32
    %355 = vector.shape_cast %352 : vector<2x1x32xf32> to vector<2x1x32xf32>
    %356 = vector.broadcast %355 : vector<2x1x32xf32> to vector<2x4x32xf32>
    %357 = vector.broadcast %cst_80 : f32 to vector<2x4x32xf32>
    %358 = arith.select %354, %356, %357 : vector<2x4x32xi1>, vector<2x4x32xf32>
    %359 = arith.addf %347, %358 : vector<2x4x32xf32>
    %360 = vector.extract_strided_slice %304 {offsets = [0, 0, 2], sizes = [2, 8, 1], strides = [1, 1, 1]} : vector<2x8x4xf32> to vector<2x8x1xf32>
    %361 = vector.broadcast %360 : vector<2x8x1xf32> to vector<2x8x32xf32>
    %362 = arith.mulf %243, %361 : vector<2x8x32xf32>
    %cst_81 = arith.constant dense<0.000000e+00> : vector<2x32xf32>
    %363 = vector.multi_reduction <add>, %362, %cst_81 [1] : vector<2x8x32xf32> to vector<2x32xf32>
    %364 = vector.shape_cast %363 : vector<2x32xf32> to vector<2x1x32xf32>
    %c2_i32_82 = arith.constant 2 : i32
    %365 = vector.broadcast %c2_i32_82 : i32 to vector<2x4x32xi32>
    %366 = arith.cmpi eq, %25, %365 : vector<2x4x32xi32>
    %cst_83 = arith.constant 0.000000e+00 : f32
    %367 = vector.shape_cast %364 : vector<2x1x32xf32> to vector<2x1x32xf32>
    %368 = vector.broadcast %367 : vector<2x1x32xf32> to vector<2x4x32xf32>
    %369 = vector.broadcast %cst_83 : f32 to vector<2x4x32xf32>
    %370 = arith.select %366, %368, %369 : vector<2x4x32xi1>, vector<2x4x32xf32>
    %371 = arith.addf %359, %370 : vector<2x4x32xf32>
    %372 = vector.extract_strided_slice %304 {offsets = [0, 0, 3], sizes = [2, 8, 1], strides = [1, 1, 1]} : vector<2x8x4xf32> to vector<2x8x1xf32>
    %373 = vector.broadcast %372 : vector<2x8x1xf32> to vector<2x8x32xf32>
    %374 = arith.mulf %243, %373 : vector<2x8x32xf32>
    %cst_84 = arith.constant dense<0.000000e+00> : vector<2x32xf32>
    %375 = vector.multi_reduction <add>, %374, %cst_84 [1] : vector<2x8x32xf32> to vector<2x32xf32>
    %376 = vector.shape_cast %375 : vector<2x32xf32> to vector<2x1x32xf32>
    %c3_i32_85 = arith.constant 3 : i32
    %377 = vector.broadcast %c3_i32_85 : i32 to vector<2x4x32xi32>
    %378 = arith.cmpi eq, %25, %377 : vector<2x4x32xi32>
    %cst_86 = arith.constant 0.000000e+00 : f32
    %379 = vector.shape_cast %376 : vector<2x1x32xf32> to vector<2x1x32xf32>
    %380 = vector.broadcast %379 : vector<2x1x32xf32> to vector<2x4x32xf32>
    %381 = vector.broadcast %cst_86 : f32 to vector<2x4x32xf32>
    %382 = arith.select %378, %380, %381 : vector<2x4x32xi1>, vector<2x4x32xf32>
    %383 = arith.addf %371, %382 : vector<2x4x32xf32>
    %cst_87 = arith.constant dense<0.000000e+00> : vector<2x4xf32>
    %384 = vector.multi_reduction <add>, %304, %cst_87 [1] : vector<2x8x4xf32> to vector<2x4xf32>
    %385 = vector.shape_cast %384 : vector<2x4xf32> to vector<2x1x4xf32>
    %cst_88 = arith.constant 0.000000e+00 : f32
    %386 = vector.broadcast %cst_88 : f32 to vector<2x8x32xf32>
    %387 = vector.extract_strided_slice %18 {offsets = [0, 0, 0], sizes = [2, 8, 1], strides = [1, 1, 1]} : vector<2x8x8xf32> to vector<2x8x1xf32>
    %388 = vector.extract_strided_slice %334 {offsets = [0, 0, 0], sizes = [2, 1, 32], strides = [1, 1, 1]} : vector<2x8x32xf32> to vector<2x1x32xf32>
    %389 = vector.broadcast %387 : vector<2x8x1xf32> to vector<2x8x32xf32>
    %390 = vector.broadcast %388 : vector<2x1x32xf32> to vector<2x8x32xf32>
    %391 = arith.mulf %389, %390 : vector<2x8x32xf32>
    %392 = arith.addf %386, %391 : vector<2x8x32xf32>
    %393 = vector.extract_strided_slice %18 {offsets = [0, 0, 1], sizes = [2, 8, 1], strides = [1, 1, 1]} : vector<2x8x8xf32> to vector<2x8x1xf32>
    %394 = vector.extract_strided_slice %334 {offsets = [0, 1, 0], sizes = [2, 1, 32], strides = [1, 1, 1]} : vector<2x8x32xf32> to vector<2x1x32xf32>
    %395 = vector.broadcast %393 : vector<2x8x1xf32> to vector<2x8x32xf32>
    %396 = vector.broadcast %394 : vector<2x1x32xf32> to vector<2x8x32xf32>
    %397 = arith.mulf %395, %396 : vector<2x8x32xf32>
    %398 = arith.addf %392, %397 : vector<2x8x32xf32>
    %399 = vector.extract_strided_slice %18 {offsets = [0, 0, 2], sizes = [2, 8, 1], strides = [1, 1, 1]} : vector<2x8x8xf32> to vector<2x8x1xf32>
    %400 = vector.extract_strided_slice %334 {offsets = [0, 2, 0], sizes = [2, 1, 32], strides = [1, 1, 1]} : vector<2x8x32xf32> to vector<2x1x32xf32>
    %401 = vector.broadcast %399 : vector<2x8x1xf32> to vector<2x8x32xf32>
    %402 = vector.broadcast %400 : vector<2x1x32xf32> to vector<2x8x32xf32>
    %403 = arith.mulf %401, %402 : vector<2x8x32xf32>
    %404 = arith.addf %398, %403 : vector<2x8x32xf32>
    %405 = vector.extract_strided_slice %18 {offsets = [0, 0, 3], sizes = [2, 8, 1], strides = [1, 1, 1]} : vector<2x8x8xf32> to vector<2x8x1xf32>
    %406 = vector.extract_strided_slice %334 {offsets = [0, 3, 0], sizes = [2, 1, 32], strides = [1, 1, 1]} : vector<2x8x32xf32> to vector<2x1x32xf32>
    %407 = vector.broadcast %405 : vector<2x8x1xf32> to vector<2x8x32xf32>
    %408 = vector.broadcast %406 : vector<2x1x32xf32> to vector<2x8x32xf32>
    %409 = arith.mulf %407, %408 : vector<2x8x32xf32>
    %410 = arith.addf %404, %409 : vector<2x8x32xf32>
    %411 = vector.extract_strided_slice %18 {offsets = [0, 0, 4], sizes = [2, 8, 1], strides = [1, 1, 1]} : vector<2x8x8xf32> to vector<2x8x1xf32>
    %412 = vector.extract_strided_slice %334 {offsets = [0, 4, 0], sizes = [2, 1, 32], strides = [1, 1, 1]} : vector<2x8x32xf32> to vector<2x1x32xf32>
    %413 = vector.broadcast %411 : vector<2x8x1xf32> to vector<2x8x32xf32>
    %414 = vector.broadcast %412 : vector<2x1x32xf32> to vector<2x8x32xf32>
    %415 = arith.mulf %413, %414 : vector<2x8x32xf32>
    %416 = arith.addf %410, %415 : vector<2x8x32xf32>
    %417 = vector.extract_strided_slice %18 {offsets = [0, 0, 5], sizes = [2, 8, 1], strides = [1, 1, 1]} : vector<2x8x8xf32> to vector<2x8x1xf32>
    %418 = vector.extract_strided_slice %334 {offsets = [0, 5, 0], sizes = [2, 1, 32], strides = [1, 1, 1]} : vector<2x8x32xf32> to vector<2x1x32xf32>
    %419 = vector.broadcast %417 : vector<2x8x1xf32> to vector<2x8x32xf32>
    %420 = vector.broadcast %418 : vector<2x1x32xf32> to vector<2x8x32xf32>
    %421 = arith.mulf %419, %420 : vector<2x8x32xf32>
    %422 = arith.addf %416, %421 : vector<2x8x32xf32>
    %423 = vector.extract_strided_slice %18 {offsets = [0, 0, 6], sizes = [2, 8, 1], strides = [1, 1, 1]} : vector<2x8x8xf32> to vector<2x8x1xf32>
    %424 = vector.extract_strided_slice %334 {offsets = [0, 6, 0], sizes = [2, 1, 32], strides = [1, 1, 1]} : vector<2x8x32xf32> to vector<2x1x32xf32>
    %425 = vector.broadcast %423 : vector<2x8x1xf32> to vector<2x8x32xf32>
    %426 = vector.broadcast %424 : vector<2x1x32xf32> to vector<2x8x32xf32>
    %427 = arith.mulf %425, %426 : vector<2x8x32xf32>
    %428 = arith.addf %422, %427 : vector<2x8x32xf32>
    %429 = vector.extract_strided_slice %18 {offsets = [0, 0, 7], sizes = [2, 8, 1], strides = [1, 1, 1]} : vector<2x8x8xf32> to vector<2x8x1xf32>
    %430 = vector.extract_strided_slice %334 {offsets = [0, 7, 0], sizes = [2, 1, 32], strides = [1, 1, 1]} : vector<2x8x32xf32> to vector<2x1x32xf32>
    %431 = vector.broadcast %429 : vector<2x8x1xf32> to vector<2x8x32xf32>
    %432 = vector.broadcast %430 : vector<2x1x32xf32> to vector<2x8x32xf32>
    %433 = arith.mulf %431, %432 : vector<2x8x32xf32>
    %434 = arith.addf %428, %433 : vector<2x8x32xf32>
    %cst_89 = arith.constant dense<0.000000e+00> : vector<2x32xf32>
    %435 = vector.multi_reduction <add>, %334, %cst_89 [1] : vector<2x8x32xf32> to vector<2x32xf32>
    %436 = vector.shape_cast %435 : vector<2x32xf32> to vector<2x1x32xf32>
    %437 = vector.broadcast %436 : vector<2x1x32xf32> to vector<2x8x32xf32>
    %438 = arith.addf %434, %437 : vector<2x8x32xf32>
    %cst_90 = arith.constant 1.250000e-03 : f32
    %439 = vector.broadcast %cst_90 : f32 to vector<2x8x32xf32>
    %440 = arith.mulf %439, %438 : vector<2x8x32xf32>
    %441 = arith.subf %234, %440 : vector<2x8x32xf32>
    %442 = arith.addf %235, %334 : vector<2x8x32xf32>
    %cst_91 = arith.constant 1.250000e-03 : f32
    %443 = vector.broadcast %cst_91 : f32 to vector<2x4x32xf32>
    %444 = arith.mulf %443, %383 : vector<2x4x32xf32>
    %445 = arith.subf %238, %444 : vector<2x4x32xf32>
    %cst_92 = arith.constant 1.250000e-03 : f32
    %446 = vector.broadcast %cst_92 : f32 to vector<2x1x4xf32>
    %447 = arith.mulf %446, %385 : vector<2x1x4xf32>
    %448 = arith.subf %241, %447 : vector<2x1x4xf32>
    %c2_i32_93 = arith.constant 2 : i32
    %cst_94 = arith.constant 0.000000e+00 : f32
    %449 = vector.broadcast %cst_94 : f32 to vector<2x8x32xf32>
    %450 = arith.maximumf %441, %449 : vector<2x8x32xf32>
    %451 = tpu.iota {dimensions = array<i32: 2>} : vector<2x8x4xi32>
    %452 = vector.shape_cast %448 : vector<2x1x4xf32> to vector<2x1x4xf32>
    %453 = vector.broadcast %452 : vector<2x1x4xf32> to vector<2x8x4xf32>
    %454 = vector.extract_strided_slice %445 {offsets = [0, 0, 0], sizes = [2, 1, 32], strides = [1, 1, 1]} : vector<2x4x32xf32> to vector<2x1x32xf32>
    %455 = vector.broadcast %454 : vector<2x1x32xf32> to vector<2x8x32xf32>
    %456 = arith.mulf %450, %455 : vector<2x8x32xf32>
    %cst_95 = arith.constant dense<0.000000e+00> : vector<2x8xf32>
    %457 = vector.multi_reduction <add>, %456, %cst_95 [2] : vector<2x8x32xf32> to vector<2x8xf32>
    %458 = vector.shape_cast %457 : vector<2x8xf32> to vector<2x8x1xf32>
    %c0_i32_96 = arith.constant 0 : i32
    %459 = vector.broadcast %c0_i32_96 : i32 to vector<2x8x4xi32>
    %460 = arith.cmpi eq, %451, %459 : vector<2x8x4xi32>
    %cst_97 = arith.constant 0.000000e+00 : f32
    %461 = vector.shape_cast %458 : vector<2x8x1xf32> to vector<2x8x1xf32>
    %462 = vector.broadcast %461 : vector<2x8x1xf32> to vector<2x8x4xf32>
    %463 = vector.broadcast %cst_97 : f32 to vector<2x8x4xf32>
    %464 = arith.select %460, %462, %463 : vector<2x8x4xi1>, vector<2x8x4xf32>
    %465 = arith.addf %453, %464 : vector<2x8x4xf32>
    %466 = vector.extract_strided_slice %445 {offsets = [0, 1, 0], sizes = [2, 1, 32], strides = [1, 1, 1]} : vector<2x4x32xf32> to vector<2x1x32xf32>
    %467 = vector.broadcast %466 : vector<2x1x32xf32> to vector<2x8x32xf32>
    %468 = arith.mulf %450, %467 : vector<2x8x32xf32>
    %cst_98 = arith.constant dense<0.000000e+00> : vector<2x8xf32>
    %469 = vector.multi_reduction <add>, %468, %cst_98 [2] : vector<2x8x32xf32> to vector<2x8xf32>
    %470 = vector.shape_cast %469 : vector<2x8xf32> to vector<2x8x1xf32>
    %c1_i32_99 = arith.constant 1 : i32
    %471 = vector.broadcast %c1_i32_99 : i32 to vector<2x8x4xi32>
    %472 = arith.cmpi eq, %451, %471 : vector<2x8x4xi32>
    %cst_100 = arith.constant 0.000000e+00 : f32
    %473 = vector.shape_cast %470 : vector<2x8x1xf32> to vector<2x8x1xf32>
    %474 = vector.broadcast %473 : vector<2x8x1xf32> to vector<2x8x4xf32>
    %475 = vector.broadcast %cst_100 : f32 to vector<2x8x4xf32>
    %476 = arith.select %472, %474, %475 : vector<2x8x4xi1>, vector<2x8x4xf32>
    %477 = arith.addf %465, %476 : vector<2x8x4xf32>
    %478 = vector.extract_strided_slice %445 {offsets = [0, 2, 0], sizes = [2, 1, 32], strides = [1, 1, 1]} : vector<2x4x32xf32> to vector<2x1x32xf32>
    %479 = vector.broadcast %478 : vector<2x1x32xf32> to vector<2x8x32xf32>
    %480 = arith.mulf %450, %479 : vector<2x8x32xf32>
    %cst_101 = arith.constant dense<0.000000e+00> : vector<2x8xf32>
    %481 = vector.multi_reduction <add>, %480, %cst_101 [2] : vector<2x8x32xf32> to vector<2x8xf32>
    %482 = vector.shape_cast %481 : vector<2x8xf32> to vector<2x8x1xf32>
    %c2_i32_102 = arith.constant 2 : i32
    %483 = vector.broadcast %c2_i32_102 : i32 to vector<2x8x4xi32>
    %484 = arith.cmpi eq, %451, %483 : vector<2x8x4xi32>
    %cst_103 = arith.constant 0.000000e+00 : f32
    %485 = vector.shape_cast %482 : vector<2x8x1xf32> to vector<2x8x1xf32>
    %486 = vector.broadcast %485 : vector<2x8x1xf32> to vector<2x8x4xf32>
    %487 = vector.broadcast %cst_103 : f32 to vector<2x8x4xf32>
    %488 = arith.select %484, %486, %487 : vector<2x8x4xi1>, vector<2x8x4xf32>
    %489 = arith.addf %477, %488 : vector<2x8x4xf32>
    %490 = vector.extract_strided_slice %445 {offsets = [0, 3, 0], sizes = [2, 1, 32], strides = [1, 1, 1]} : vector<2x4x32xf32> to vector<2x1x32xf32>
    %491 = vector.broadcast %490 : vector<2x1x32xf32> to vector<2x8x32xf32>
    %492 = arith.mulf %450, %491 : vector<2x8x32xf32>
    %cst_104 = arith.constant dense<0.000000e+00> : vector<2x8xf32>
    %493 = vector.multi_reduction <add>, %492, %cst_104 [2] : vector<2x8x32xf32> to vector<2x8xf32>
    %494 = vector.shape_cast %493 : vector<2x8xf32> to vector<2x8x1xf32>
    %c3_i32_105 = arith.constant 3 : i32
    %495 = vector.broadcast %c3_i32_105 : i32 to vector<2x8x4xi32>
    %496 = arith.cmpi eq, %451, %495 : vector<2x8x4xi32>
    %cst_106 = arith.constant 0.000000e+00 : f32
    %497 = vector.shape_cast %494 : vector<2x8x1xf32> to vector<2x8x1xf32>
    %498 = vector.broadcast %497 : vector<2x8x1xf32> to vector<2x8x4xf32>
    %499 = vector.broadcast %cst_106 : f32 to vector<2x8x4xf32>
    %500 = arith.select %496, %498, %499 : vector<2x8x4xi1>, vector<2x8x4xf32>
    %501 = arith.addf %489, %500 : vector<2x8x4xf32>
    %cst_107 = arith.constant dense<0xFF800000> : vector<2x8xf32>
    %502 = vector.multi_reduction <maximumf>, %501, %cst_107 [2] : vector<2x8x4xf32> to vector<2x8xf32>
    %503 = vector.shape_cast %502 : vector<2x8xf32> to vector<2x8x1xf32>
    %504 = vector.broadcast %503 : vector<2x8x1xf32> to vector<2x8x4xf32>
    %505 = arith.subf %501, %504 : vector<2x8x4xf32>
    %506 = math.exp %505 : vector<2x8x4xf32>
    %cst_108 = arith.constant dense<0.000000e+00> : vector<2x8xf32>
    %507 = vector.multi_reduction <add>, %506, %cst_108 [2] : vector<2x8x4xf32> to vector<2x8xf32>
    %508 = vector.shape_cast %507 : vector<2x8xf32> to vector<2x8x1xf32>
    %509 = vector.broadcast %508 : vector<2x8x1xf32> to vector<2x8x4xf32>
    %510 = arith.divf %506, %509 : vector<2x8x4xf32>
    %511 = arith.subf %510, %24 : vector<2x8x4xf32>
    %cst_109 = arith.constant 0.000000e+00 : f32
    %512 = vector.broadcast %cst_109 : f32 to vector<2x8x32xf32>
    %513 = vector.extract_strided_slice %511 {offsets = [0, 0, 0], sizes = [2, 8, 1], strides = [1, 1, 1]} : vector<2x8x4xf32> to vector<2x8x1xf32>
    %514 = vector.extract_strided_slice %445 {offsets = [0, 0, 0], sizes = [2, 1, 32], strides = [1, 1, 1]} : vector<2x4x32xf32> to vector<2x1x32xf32>
    %515 = vector.broadcast %513 : vector<2x8x1xf32> to vector<2x8x32xf32>
    %516 = vector.broadcast %514 : vector<2x1x32xf32> to vector<2x8x32xf32>
    %517 = arith.mulf %515, %516 : vector<2x8x32xf32>
    %518 = arith.addf %512, %517 : vector<2x8x32xf32>
    %519 = vector.extract_strided_slice %511 {offsets = [0, 0, 1], sizes = [2, 8, 1], strides = [1, 1, 1]} : vector<2x8x4xf32> to vector<2x8x1xf32>
    %520 = vector.extract_strided_slice %445 {offsets = [0, 1, 0], sizes = [2, 1, 32], strides = [1, 1, 1]} : vector<2x4x32xf32> to vector<2x1x32xf32>
    %521 = vector.broadcast %519 : vector<2x8x1xf32> to vector<2x8x32xf32>
    %522 = vector.broadcast %520 : vector<2x1x32xf32> to vector<2x8x32xf32>
    %523 = arith.mulf %521, %522 : vector<2x8x32xf32>
    %524 = arith.addf %518, %523 : vector<2x8x32xf32>
    %525 = vector.extract_strided_slice %511 {offsets = [0, 0, 2], sizes = [2, 8, 1], strides = [1, 1, 1]} : vector<2x8x4xf32> to vector<2x8x1xf32>
    %526 = vector.extract_strided_slice %445 {offsets = [0, 2, 0], sizes = [2, 1, 32], strides = [1, 1, 1]} : vector<2x4x32xf32> to vector<2x1x32xf32>
    %527 = vector.broadcast %525 : vector<2x8x1xf32> to vector<2x8x32xf32>
    %528 = vector.broadcast %526 : vector<2x1x32xf32> to vector<2x8x32xf32>
    %529 = arith.mulf %527, %528 : vector<2x8x32xf32>
    %530 = arith.addf %524, %529 : vector<2x8x32xf32>
    %531 = vector.extract_strided_slice %511 {offsets = [0, 0, 3], sizes = [2, 8, 1], strides = [1, 1, 1]} : vector<2x8x4xf32> to vector<2x8x1xf32>
    %532 = vector.extract_strided_slice %445 {offsets = [0, 3, 0], sizes = [2, 1, 32], strides = [1, 1, 1]} : vector<2x4x32xf32> to vector<2x1x32xf32>
    %533 = vector.broadcast %531 : vector<2x8x1xf32> to vector<2x8x32xf32>
    %534 = vector.broadcast %532 : vector<2x1x32xf32> to vector<2x8x32xf32>
    %535 = arith.mulf %533, %534 : vector<2x8x32xf32>
    %536 = arith.addf %530, %535 : vector<2x8x32xf32>
    %cst_110 = arith.constant 0.000000e+00 : f32
    %537 = vector.broadcast %cst_110 : f32 to vector<2x8x32xf32>
    %538 = arith.cmpf ogt, %441, %537 : vector<2x8x32xf32>
    %539 = arith.extui %538 : vector<2x8x32xi1> to vector<2x8x32xi32>
    %540 = arith.sitofp %539 : vector<2x8x32xi32> to vector<2x8x32xf32>
    %541 = arith.mulf %536, %540 : vector<2x8x32xf32>
    %cst_111 = arith.constant 0.000000e+00 : f32
    %542 = vector.broadcast %cst_111 : f32 to vector<2x4x32xf32>
    %543 = vector.extract_strided_slice %511 {offsets = [0, 0, 0], sizes = [2, 8, 1], strides = [1, 1, 1]} : vector<2x8x4xf32> to vector<2x8x1xf32>
    %544 = vector.broadcast %543 : vector<2x8x1xf32> to vector<2x8x32xf32>
    %545 = arith.mulf %450, %544 : vector<2x8x32xf32>
    %cst_112 = arith.constant dense<0.000000e+00> : vector<2x32xf32>
    %546 = vector.multi_reduction <add>, %545, %cst_112 [1] : vector<2x8x32xf32> to vector<2x32xf32>
    %547 = vector.shape_cast %546 : vector<2x32xf32> to vector<2x1x32xf32>
    %c0_i32_113 = arith.constant 0 : i32
    %548 = vector.broadcast %c0_i32_113 : i32 to vector<2x4x32xi32>
    %549 = arith.cmpi eq, %25, %548 : vector<2x4x32xi32>
    %cst_114 = arith.constant 0.000000e+00 : f32
    %550 = vector.shape_cast %547 : vector<2x1x32xf32> to vector<2x1x32xf32>
    %551 = vector.broadcast %550 : vector<2x1x32xf32> to vector<2x4x32xf32>
    %552 = vector.broadcast %cst_114 : f32 to vector<2x4x32xf32>
    %553 = arith.select %549, %551, %552 : vector<2x4x32xi1>, vector<2x4x32xf32>
    %554 = arith.addf %542, %553 : vector<2x4x32xf32>
    %555 = vector.extract_strided_slice %511 {offsets = [0, 0, 1], sizes = [2, 8, 1], strides = [1, 1, 1]} : vector<2x8x4xf32> to vector<2x8x1xf32>
    %556 = vector.broadcast %555 : vector<2x8x1xf32> to vector<2x8x32xf32>
    %557 = arith.mulf %450, %556 : vector<2x8x32xf32>
    %cst_115 = arith.constant dense<0.000000e+00> : vector<2x32xf32>
    %558 = vector.multi_reduction <add>, %557, %cst_115 [1] : vector<2x8x32xf32> to vector<2x32xf32>
    %559 = vector.shape_cast %558 : vector<2x32xf32> to vector<2x1x32xf32>
    %c1_i32_116 = arith.constant 1 : i32
    %560 = vector.broadcast %c1_i32_116 : i32 to vector<2x4x32xi32>
    %561 = arith.cmpi eq, %25, %560 : vector<2x4x32xi32>
    %cst_117 = arith.constant 0.000000e+00 : f32
    %562 = vector.shape_cast %559 : vector<2x1x32xf32> to vector<2x1x32xf32>
    %563 = vector.broadcast %562 : vector<2x1x32xf32> to vector<2x4x32xf32>
    %564 = vector.broadcast %cst_117 : f32 to vector<2x4x32xf32>
    %565 = arith.select %561, %563, %564 : vector<2x4x32xi1>, vector<2x4x32xf32>
    %566 = arith.addf %554, %565 : vector<2x4x32xf32>
    %567 = vector.extract_strided_slice %511 {offsets = [0, 0, 2], sizes = [2, 8, 1], strides = [1, 1, 1]} : vector<2x8x4xf32> to vector<2x8x1xf32>
    %568 = vector.broadcast %567 : vector<2x8x1xf32> to vector<2x8x32xf32>
    %569 = arith.mulf %450, %568 : vector<2x8x32xf32>
    %cst_118 = arith.constant dense<0.000000e+00> : vector<2x32xf32>
    %570 = vector.multi_reduction <add>, %569, %cst_118 [1] : vector<2x8x32xf32> to vector<2x32xf32>
    %571 = vector.shape_cast %570 : vector<2x32xf32> to vector<2x1x32xf32>
    %c2_i32_119 = arith.constant 2 : i32
    %572 = vector.broadcast %c2_i32_119 : i32 to vector<2x4x32xi32>
    %573 = arith.cmpi eq, %25, %572 : vector<2x4x32xi32>
    %cst_120 = arith.constant 0.000000e+00 : f32
    %574 = vector.shape_cast %571 : vector<2x1x32xf32> to vector<2x1x32xf32>
    %575 = vector.broadcast %574 : vector<2x1x32xf32> to vector<2x4x32xf32>
    %576 = vector.broadcast %cst_120 : f32 to vector<2x4x32xf32>
    %577 = arith.select %573, %575, %576 : vector<2x4x32xi1>, vector<2x4x32xf32>
    %578 = arith.addf %566, %577 : vector<2x4x32xf32>
    %579 = vector.extract_strided_slice %511 {offsets = [0, 0, 3], sizes = [2, 8, 1], strides = [1, 1, 1]} : vector<2x8x4xf32> to vector<2x8x1xf32>
    %580 = vector.broadcast %579 : vector<2x8x1xf32> to vector<2x8x32xf32>
    %581 = arith.mulf %450, %580 : vector<2x8x32xf32>
    %cst_121 = arith.constant dense<0.000000e+00> : vector<2x32xf32>
    %582 = vector.multi_reduction <add>, %581, %cst_121 [1] : vector<2x8x32xf32> to vector<2x32xf32>
    %583 = vector.shape_cast %582 : vector<2x32xf32> to vector<2x1x32xf32>
    %c3_i32_122 = arith.constant 3 : i32
    %584 = vector.broadcast %c3_i32_122 : i32 to vector<2x4x32xi32>
    %585 = arith.cmpi eq, %25, %584 : vector<2x4x32xi32>
    %cst_123 = arith.constant 0.000000e+00 : f32
    %586 = vector.shape_cast %583 : vector<2x1x32xf32> to vector<2x1x32xf32>
    %587 = vector.broadcast %586 : vector<2x1x32xf32> to vector<2x4x32xf32>
    %588 = vector.broadcast %cst_123 : f32 to vector<2x4x32xf32>
    %589 = arith.select %585, %587, %588 : vector<2x4x32xi1>, vector<2x4x32xf32>
    %590 = arith.addf %578, %589 : vector<2x4x32xf32>
    %cst_124 = arith.constant dense<0.000000e+00> : vector<2x4xf32>
    %591 = vector.multi_reduction <add>, %511, %cst_124 [1] : vector<2x8x4xf32> to vector<2x4xf32>
    %592 = vector.shape_cast %591 : vector<2x4xf32> to vector<2x1x4xf32>
    %cst_125 = arith.constant 0.000000e+00 : f32
    %593 = vector.broadcast %cst_125 : f32 to vector<2x8x32xf32>
    %594 = vector.extract_strided_slice %18 {offsets = [0, 0, 0], sizes = [2, 8, 1], strides = [1, 1, 1]} : vector<2x8x8xf32> to vector<2x8x1xf32>
    %595 = vector.extract_strided_slice %541 {offsets = [0, 0, 0], sizes = [2, 1, 32], strides = [1, 1, 1]} : vector<2x8x32xf32> to vector<2x1x32xf32>
    %596 = vector.broadcast %594 : vector<2x8x1xf32> to vector<2x8x32xf32>
    %597 = vector.broadcast %595 : vector<2x1x32xf32> to vector<2x8x32xf32>
    %598 = arith.mulf %596, %597 : vector<2x8x32xf32>
    %599 = arith.addf %593, %598 : vector<2x8x32xf32>
    %600 = vector.extract_strided_slice %18 {offsets = [0, 0, 1], sizes = [2, 8, 1], strides = [1, 1, 1]} : vector<2x8x8xf32> to vector<2x8x1xf32>
    %601 = vector.extract_strided_slice %541 {offsets = [0, 1, 0], sizes = [2, 1, 32], strides = [1, 1, 1]} : vector<2x8x32xf32> to vector<2x1x32xf32>
    %602 = vector.broadcast %600 : vector<2x8x1xf32> to vector<2x8x32xf32>
    %603 = vector.broadcast %601 : vector<2x1x32xf32> to vector<2x8x32xf32>
    %604 = arith.mulf %602, %603 : vector<2x8x32xf32>
    %605 = arith.addf %599, %604 : vector<2x8x32xf32>
    %606 = vector.extract_strided_slice %18 {offsets = [0, 0, 2], sizes = [2, 8, 1], strides = [1, 1, 1]} : vector<2x8x8xf32> to vector<2x8x1xf32>
    %607 = vector.extract_strided_slice %541 {offsets = [0, 2, 0], sizes = [2, 1, 32], strides = [1, 1, 1]} : vector<2x8x32xf32> to vector<2x1x32xf32>
    %608 = vector.broadcast %606 : vector<2x8x1xf32> to vector<2x8x32xf32>
    %609 = vector.broadcast %607 : vector<2x1x32xf32> to vector<2x8x32xf32>
    %610 = arith.mulf %608, %609 : vector<2x8x32xf32>
    %611 = arith.addf %605, %610 : vector<2x8x32xf32>
    %612 = vector.extract_strided_slice %18 {offsets = [0, 0, 3], sizes = [2, 8, 1], strides = [1, 1, 1]} : vector<2x8x8xf32> to vector<2x8x1xf32>
    %613 = vector.extract_strided_slice %541 {offsets = [0, 3, 0], sizes = [2, 1, 32], strides = [1, 1, 1]} : vector<2x8x32xf32> to vector<2x1x32xf32>
    %614 = vector.broadcast %612 : vector<2x8x1xf32> to vector<2x8x32xf32>
    %615 = vector.broadcast %613 : vector<2x1x32xf32> to vector<2x8x32xf32>
    %616 = arith.mulf %614, %615 : vector<2x8x32xf32>
    %617 = arith.addf %611, %616 : vector<2x8x32xf32>
    %618 = vector.extract_strided_slice %18 {offsets = [0, 0, 4], sizes = [2, 8, 1], strides = [1, 1, 1]} : vector<2x8x8xf32> to vector<2x8x1xf32>
    %619 = vector.extract_strided_slice %541 {offsets = [0, 4, 0], sizes = [2, 1, 32], strides = [1, 1, 1]} : vector<2x8x32xf32> to vector<2x1x32xf32>
    %620 = vector.broadcast %618 : vector<2x8x1xf32> to vector<2x8x32xf32>
    %621 = vector.broadcast %619 : vector<2x1x32xf32> to vector<2x8x32xf32>
    %622 = arith.mulf %620, %621 : vector<2x8x32xf32>
    %623 = arith.addf %617, %622 : vector<2x8x32xf32>
    %624 = vector.extract_strided_slice %18 {offsets = [0, 0, 5], sizes = [2, 8, 1], strides = [1, 1, 1]} : vector<2x8x8xf32> to vector<2x8x1xf32>
    %625 = vector.extract_strided_slice %541 {offsets = [0, 5, 0], sizes = [2, 1, 32], strides = [1, 1, 1]} : vector<2x8x32xf32> to vector<2x1x32xf32>
    %626 = vector.broadcast %624 : vector<2x8x1xf32> to vector<2x8x32xf32>
    %627 = vector.broadcast %625 : vector<2x1x32xf32> to vector<2x8x32xf32>
    %628 = arith.mulf %626, %627 : vector<2x8x32xf32>
    %629 = arith.addf %623, %628 : vector<2x8x32xf32>
    %630 = vector.extract_strided_slice %18 {offsets = [0, 0, 6], sizes = [2, 8, 1], strides = [1, 1, 1]} : vector<2x8x8xf32> to vector<2x8x1xf32>
    %631 = vector.extract_strided_slice %541 {offsets = [0, 6, 0], sizes = [2, 1, 32], strides = [1, 1, 1]} : vector<2x8x32xf32> to vector<2x1x32xf32>
    %632 = vector.broadcast %630 : vector<2x8x1xf32> to vector<2x8x32xf32>
    %633 = vector.broadcast %631 : vector<2x1x32xf32> to vector<2x8x32xf32>
    %634 = arith.mulf %632, %633 : vector<2x8x32xf32>
    %635 = arith.addf %629, %634 : vector<2x8x32xf32>
    %636 = vector.extract_strided_slice %18 {offsets = [0, 0, 7], sizes = [2, 8, 1], strides = [1, 1, 1]} : vector<2x8x8xf32> to vector<2x8x1xf32>
    %637 = vector.extract_strided_slice %541 {offsets = [0, 7, 0], sizes = [2, 1, 32], strides = [1, 1, 1]} : vector<2x8x32xf32> to vector<2x1x32xf32>
    %638 = vector.broadcast %636 : vector<2x8x1xf32> to vector<2x8x32xf32>
    %639 = vector.broadcast %637 : vector<2x1x32xf32> to vector<2x8x32xf32>
    %640 = arith.mulf %638, %639 : vector<2x8x32xf32>
    %641 = arith.addf %635, %640 : vector<2x8x32xf32>
    %cst_126 = arith.constant dense<0.000000e+00> : vector<2x32xf32>
    %642 = vector.multi_reduction <add>, %541, %cst_126 [1] : vector<2x8x32xf32> to vector<2x32xf32>
    %643 = vector.shape_cast %642 : vector<2x32xf32> to vector<2x1x32xf32>
    %644 = vector.broadcast %643 : vector<2x1x32xf32> to vector<2x8x32xf32>
    %645 = arith.addf %641, %644 : vector<2x8x32xf32>
    %cst_127 = arith.constant 1.250000e-03 : f32
    %646 = vector.broadcast %cst_127 : f32 to vector<2x8x32xf32>
    %647 = arith.mulf %646, %645 : vector<2x8x32xf32>
    %648 = arith.subf %441, %647 : vector<2x8x32xf32>
    %649 = arith.addf %442, %541 : vector<2x8x32xf32>
    %cst_128 = arith.constant 1.250000e-03 : f32
    %650 = vector.broadcast %cst_128 : f32 to vector<2x4x32xf32>
    %651 = arith.mulf %650, %590 : vector<2x4x32xf32>
    %652 = arith.subf %445, %651 : vector<2x4x32xf32>
    %cst_129 = arith.constant 1.250000e-03 : f32
    %653 = vector.broadcast %cst_129 : f32 to vector<2x1x4xf32>
    %654 = arith.mulf %653, %592 : vector<2x1x4xf32>
    %655 = arith.subf %448, %654 : vector<2x1x4xf32>
    %cst_130 = arith.constant 0.000000e+00 : f32
    %656 = vector.broadcast %cst_130 : f32 to vector<2x8x32xf32>
    %657 = vector.extract_strided_slice %19 {offsets = [0, 0, 0], sizes = [2, 8, 1], strides = [1, 1, 1]} : vector<2x8x8xf32> to vector<2x8x1xf32>
    %658 = vector.extract_strided_slice %649 {offsets = [0, 0, 0], sizes = [2, 1, 32], strides = [1, 1, 1]} : vector<2x8x32xf32> to vector<2x1x32xf32>
    %659 = vector.broadcast %657 : vector<2x8x1xf32> to vector<2x8x32xf32>
    %660 = vector.broadcast %658 : vector<2x1x32xf32> to vector<2x8x32xf32>
    %661 = arith.mulf %659, %660 : vector<2x8x32xf32>
    %662 = arith.addf %656, %661 : vector<2x8x32xf32>
    %663 = vector.extract_strided_slice %19 {offsets = [0, 0, 1], sizes = [2, 8, 1], strides = [1, 1, 1]} : vector<2x8x8xf32> to vector<2x8x1xf32>
    %664 = vector.extract_strided_slice %649 {offsets = [0, 1, 0], sizes = [2, 1, 32], strides = [1, 1, 1]} : vector<2x8x32xf32> to vector<2x1x32xf32>
    %665 = vector.broadcast %663 : vector<2x8x1xf32> to vector<2x8x32xf32>
    %666 = vector.broadcast %664 : vector<2x1x32xf32> to vector<2x8x32xf32>
    %667 = arith.mulf %665, %666 : vector<2x8x32xf32>
    %668 = arith.addf %662, %667 : vector<2x8x32xf32>
    %669 = vector.extract_strided_slice %19 {offsets = [0, 0, 2], sizes = [2, 8, 1], strides = [1, 1, 1]} : vector<2x8x8xf32> to vector<2x8x1xf32>
    %670 = vector.extract_strided_slice %649 {offsets = [0, 2, 0], sizes = [2, 1, 32], strides = [1, 1, 1]} : vector<2x8x32xf32> to vector<2x1x32xf32>
    %671 = vector.broadcast %669 : vector<2x8x1xf32> to vector<2x8x32xf32>
    %672 = vector.broadcast %670 : vector<2x1x32xf32> to vector<2x8x32xf32>
    %673 = arith.mulf %671, %672 : vector<2x8x32xf32>
    %674 = arith.addf %668, %673 : vector<2x8x32xf32>
    %675 = vector.extract_strided_slice %19 {offsets = [0, 0, 3], sizes = [2, 8, 1], strides = [1, 1, 1]} : vector<2x8x8xf32> to vector<2x8x1xf32>
    %676 = vector.extract_strided_slice %649 {offsets = [0, 3, 0], sizes = [2, 1, 32], strides = [1, 1, 1]} : vector<2x8x32xf32> to vector<2x1x32xf32>
    %677 = vector.broadcast %675 : vector<2x8x1xf32> to vector<2x8x32xf32>
    %678 = vector.broadcast %676 : vector<2x1x32xf32> to vector<2x8x32xf32>
    %679 = arith.mulf %677, %678 : vector<2x8x32xf32>
    %680 = arith.addf %674, %679 : vector<2x8x32xf32>
    %681 = vector.extract_strided_slice %19 {offsets = [0, 0, 4], sizes = [2, 8, 1], strides = [1, 1, 1]} : vector<2x8x8xf32> to vector<2x8x1xf32>
    %682 = vector.extract_strided_slice %649 {offsets = [0, 4, 0], sizes = [2, 1, 32], strides = [1, 1, 1]} : vector<2x8x32xf32> to vector<2x1x32xf32>
    %683 = vector.broadcast %681 : vector<2x8x1xf32> to vector<2x8x32xf32>
    %684 = vector.broadcast %682 : vector<2x1x32xf32> to vector<2x8x32xf32>
    %685 = arith.mulf %683, %684 : vector<2x8x32xf32>
    %686 = arith.addf %680, %685 : vector<2x8x32xf32>
    %687 = vector.extract_strided_slice %19 {offsets = [0, 0, 5], sizes = [2, 8, 1], strides = [1, 1, 1]} : vector<2x8x8xf32> to vector<2x8x1xf32>
    %688 = vector.extract_strided_slice %649 {offsets = [0, 5, 0], sizes = [2, 1, 32], strides = [1, 1, 1]} : vector<2x8x32xf32> to vector<2x1x32xf32>
    %689 = vector.broadcast %687 : vector<2x8x1xf32> to vector<2x8x32xf32>
    %690 = vector.broadcast %688 : vector<2x1x32xf32> to vector<2x8x32xf32>
    %691 = arith.mulf %689, %690 : vector<2x8x32xf32>
    %692 = arith.addf %686, %691 : vector<2x8x32xf32>
    %693 = vector.extract_strided_slice %19 {offsets = [0, 0, 6], sizes = [2, 8, 1], strides = [1, 1, 1]} : vector<2x8x8xf32> to vector<2x8x1xf32>
    %694 = vector.extract_strided_slice %649 {offsets = [0, 6, 0], sizes = [2, 1, 32], strides = [1, 1, 1]} : vector<2x8x32xf32> to vector<2x1x32xf32>
    %695 = vector.broadcast %693 : vector<2x8x1xf32> to vector<2x8x32xf32>
    %696 = vector.broadcast %694 : vector<2x1x32xf32> to vector<2x8x32xf32>
    %697 = arith.mulf %695, %696 : vector<2x8x32xf32>
    %698 = arith.addf %692, %697 : vector<2x8x32xf32>
    %699 = vector.extract_strided_slice %19 {offsets = [0, 0, 7], sizes = [2, 8, 1], strides = [1, 1, 1]} : vector<2x8x8xf32> to vector<2x8x1xf32>
    %700 = vector.extract_strided_slice %649 {offsets = [0, 7, 0], sizes = [2, 1, 32], strides = [1, 1, 1]} : vector<2x8x32xf32> to vector<2x1x32xf32>
    %701 = vector.broadcast %699 : vector<2x8x1xf32> to vector<2x8x32xf32>
    %702 = vector.broadcast %700 : vector<2x1x32xf32> to vector<2x8x32xf32>
    %703 = arith.mulf %701, %702 : vector<2x8x32xf32>
    %704 = arith.addf %698, %703 : vector<2x8x32xf32>
    %cst_131 = arith.constant dense<0.000000e+00> : vector<2x32xf32>
    %705 = vector.multi_reduction <add>, %649, %cst_131 [1] : vector<2x8x32xf32> to vector<2x32xf32>
    %706 = vector.shape_cast %705 : vector<2x32xf32> to vector<2x1x32xf32>
    %707 = vector.broadcast %706 : vector<2x1x32xf32> to vector<2x8x32xf32>
    %708 = arith.addf %704, %707 : vector<2x8x32xf32>
    %cst_132 = arith.constant 1.250000e-03 : f32
    %709 = vector.broadcast %cst_132 : f32 to vector<2x8x32xf32>
    %710 = arith.mulf %709, %708 : vector<2x8x32xf32>
    %711 = arith.subf %17, %710 : vector<2x8x32xf32>
    %cst_133 = arith.constant 0.000000e+00 : f32
    %712 = vector.broadcast %cst_133 : f32 to vector<2x8x32xf32>
    %713 = arith.maximumf %711, %712 : vector<2x8x32xf32>
    %714 = tpu.iota {dimensions = array<i32: 2>} : vector<2x8x4xi32>
    %715 = vector.shape_cast %655 : vector<2x1x4xf32> to vector<2x1x4xf32>
    %716 = vector.broadcast %715 : vector<2x1x4xf32> to vector<2x8x4xf32>
    %717 = vector.extract_strided_slice %652 {offsets = [0, 0, 0], sizes = [2, 1, 32], strides = [1, 1, 1]} : vector<2x4x32xf32> to vector<2x1x32xf32>
    %718 = vector.broadcast %717 : vector<2x1x32xf32> to vector<2x8x32xf32>
    %719 = arith.mulf %713, %718 : vector<2x8x32xf32>
    %cst_134 = arith.constant dense<0.000000e+00> : vector<2x8xf32>
    %720 = vector.multi_reduction <add>, %719, %cst_134 [2] : vector<2x8x32xf32> to vector<2x8xf32>
    %721 = vector.shape_cast %720 : vector<2x8xf32> to vector<2x8x1xf32>
    %c0_i32_135 = arith.constant 0 : i32
    %722 = vector.broadcast %c0_i32_135 : i32 to vector<2x8x4xi32>
    %723 = arith.cmpi eq, %714, %722 : vector<2x8x4xi32>
    %cst_136 = arith.constant 0.000000e+00 : f32
    %724 = vector.shape_cast %721 : vector<2x8x1xf32> to vector<2x8x1xf32>
    %725 = vector.broadcast %724 : vector<2x8x1xf32> to vector<2x8x4xf32>
    %726 = vector.broadcast %cst_136 : f32 to vector<2x8x4xf32>
    %727 = arith.select %723, %725, %726 : vector<2x8x4xi1>, vector<2x8x4xf32>
    %728 = arith.addf %716, %727 : vector<2x8x4xf32>
    %729 = vector.extract_strided_slice %652 {offsets = [0, 1, 0], sizes = [2, 1, 32], strides = [1, 1, 1]} : vector<2x4x32xf32> to vector<2x1x32xf32>
    %730 = vector.broadcast %729 : vector<2x1x32xf32> to vector<2x8x32xf32>
    %731 = arith.mulf %713, %730 : vector<2x8x32xf32>
    %cst_137 = arith.constant dense<0.000000e+00> : vector<2x8xf32>
    %732 = vector.multi_reduction <add>, %731, %cst_137 [2] : vector<2x8x32xf32> to vector<2x8xf32>
    %733 = vector.shape_cast %732 : vector<2x8xf32> to vector<2x8x1xf32>
    %c1_i32_138 = arith.constant 1 : i32
    %734 = vector.broadcast %c1_i32_138 : i32 to vector<2x8x4xi32>
    %735 = arith.cmpi eq, %714, %734 : vector<2x8x4xi32>
    %cst_139 = arith.constant 0.000000e+00 : f32
    %736 = vector.shape_cast %733 : vector<2x8x1xf32> to vector<2x8x1xf32>
    %737 = vector.broadcast %736 : vector<2x8x1xf32> to vector<2x8x4xf32>
    %738 = vector.broadcast %cst_139 : f32 to vector<2x8x4xf32>
    %739 = arith.select %735, %737, %738 : vector<2x8x4xi1>, vector<2x8x4xf32>
    %740 = arith.addf %728, %739 : vector<2x8x4xf32>
    %741 = vector.extract_strided_slice %652 {offsets = [0, 2, 0], sizes = [2, 1, 32], strides = [1, 1, 1]} : vector<2x4x32xf32> to vector<2x1x32xf32>
    %742 = vector.broadcast %741 : vector<2x1x32xf32> to vector<2x8x32xf32>
    %743 = arith.mulf %713, %742 : vector<2x8x32xf32>
    %cst_140 = arith.constant dense<0.000000e+00> : vector<2x8xf32>
    %744 = vector.multi_reduction <add>, %743, %cst_140 [2] : vector<2x8x32xf32> to vector<2x8xf32>
    %745 = vector.shape_cast %744 : vector<2x8xf32> to vector<2x8x1xf32>
    %c2_i32_141 = arith.constant 2 : i32
    %746 = vector.broadcast %c2_i32_141 : i32 to vector<2x8x4xi32>
    %747 = arith.cmpi eq, %714, %746 : vector<2x8x4xi32>
    %cst_142 = arith.constant 0.000000e+00 : f32
    %748 = vector.shape_cast %745 : vector<2x8x1xf32> to vector<2x8x1xf32>
    %749 = vector.broadcast %748 : vector<2x8x1xf32> to vector<2x8x4xf32>
    %750 = vector.broadcast %cst_142 : f32 to vector<2x8x4xf32>
    %751 = arith.select %747, %749, %750 : vector<2x8x4xi1>, vector<2x8x4xf32>
    %752 = arith.addf %740, %751 : vector<2x8x4xf32>
    %753 = vector.extract_strided_slice %652 {offsets = [0, 3, 0], sizes = [2, 1, 32], strides = [1, 1, 1]} : vector<2x4x32xf32> to vector<2x1x32xf32>
    %754 = vector.broadcast %753 : vector<2x1x32xf32> to vector<2x8x32xf32>
    %755 = arith.mulf %713, %754 : vector<2x8x32xf32>
    %cst_143 = arith.constant dense<0.000000e+00> : vector<2x8xf32>
    %756 = vector.multi_reduction <add>, %755, %cst_143 [2] : vector<2x8x32xf32> to vector<2x8xf32>
    %757 = vector.shape_cast %756 : vector<2x8xf32> to vector<2x8x1xf32>
    %c3_i32_144 = arith.constant 3 : i32
    %758 = vector.broadcast %c3_i32_144 : i32 to vector<2x8x4xi32>
    %759 = arith.cmpi eq, %714, %758 : vector<2x8x4xi32>
    %cst_145 = arith.constant 0.000000e+00 : f32
    %760 = vector.shape_cast %757 : vector<2x8x1xf32> to vector<2x8x1xf32>
    %761 = vector.broadcast %760 : vector<2x8x1xf32> to vector<2x8x4xf32>
    %762 = vector.broadcast %cst_145 : f32 to vector<2x8x4xf32>
    %763 = arith.select %759, %761, %762 : vector<2x8x4xi1>, vector<2x8x4xf32>
    %764 = arith.addf %752, %763 : vector<2x8x4xf32>
    %cst_146 = arith.constant dense<0xFF800000> : vector<2x8xf32>
    %765 = vector.multi_reduction <maximumf>, %764, %cst_146 [2] : vector<2x8x4xf32> to vector<2x8xf32>
    %766 = vector.shape_cast %765 : vector<2x8xf32> to vector<2x8x1xf32>
    %767 = vector.broadcast %766 : vector<2x8x1xf32> to vector<2x8x4xf32>
    %768 = arith.subf %764, %767 : vector<2x8x4xf32>
    %769 = math.exp %768 : vector<2x8x4xf32>
    %cst_147 = arith.constant dense<0.000000e+00> : vector<2x8xf32>
    %770 = vector.multi_reduction <add>, %769, %cst_147 [2] : vector<2x8x4xf32> to vector<2x8xf32>
    %771 = vector.shape_cast %770 : vector<2x8xf32> to vector<2x8x1xf32>
    %772 = math.log %771 : vector<2x8x1xf32>
    %773 = arith.addf %772, %766 : vector<2x8x1xf32>
    %774 = tpu.iota {dimensions = array<i32: 2>} : vector<2x8x4xi32>
    %775 = vector.broadcast %3 : vector<2x8x1xi32> to vector<2x8x4xi32>
    %776 = arith.cmpi eq, %774, %775 : vector<2x8x4xi32>
    %777 = arith.extui %776 : vector<2x8x4xi1> to vector<2x8x4xi32>
    %778 = arith.sitofp %777 : vector<2x8x4xi32> to vector<2x8x4xf32>
    %779 = vector.broadcast %773 : vector<2x8x1xf32> to vector<2x8x4xf32>
    %780 = arith.subf %764, %779 : vector<2x8x4xf32>
    %781 = arith.mulf %778, %780 : vector<2x8x4xf32>
    %782 = vector.shape_cast %781 : vector<2x8x4xf32> to vector<1x2x8x4xf32>
    %cst_148 = arith.constant dense<0.000000e+00> : vector<1xf32>
    %783 = vector.multi_reduction <add>, %782, %cst_148 [1, 2, 3] : vector<1x2x8x4xf32> to vector<1xf32>
    %784 = vector.shape_cast %783 : vector<1xf32> to vector<1x1x1x1xf32>
    %785 = vector.extract %784[0, 0, 0, 0] : f32 from vector<1x1x1x1xf32>
    %cst_149 = arith.constant 0.000000e+00 : f32
    %786 = arith.subf %cst_149, %785 : f32
    %cst_150 = arith.constant 6.250000e-02 : f32
    %787 = arith.mulf %786, %cst_150 : f32
    %788 = vector.broadcast %766 : vector<2x8x1xf32> to vector<2x8x4xf32>
    %789 = arith.cmpf oge, %764, %788 : vector<2x8x4xf32>
    %c4_i32 = arith.constant 4 : i32
    %790 = vector.broadcast %c4_i32 : i32 to vector<2x8x4xi32>
    %791 = arith.select %789, %774, %790 : vector<2x8x4xi1>, vector<2x8x4xi32>
    %cst_151 = arith.constant dense<2147483647> : vector<2x8xi32>
    %792 = vector.multi_reduction <minsi>, %791, %cst_151 [2] : vector<2x8x4xi32> to vector<2x8xi32>
    %793 = vector.shape_cast %792 : vector<2x8xi32> to vector<2x8x1xi32>
    %794 = arith.cmpi eq, %793, %3 : vector<2x8x1xi32>
    %795 = arith.extui %794 : vector<2x8x1xi1> to vector<2x8x1xi32>
    %796 = arith.sitofp %795 : vector<2x8x1xi32> to vector<2x8x1xf32>
    %797 = vector.shape_cast %796 : vector<2x8x1xf32> to vector<1x2x8x1xf32>
    %cst_152 = arith.constant dense<0.000000e+00> : vector<1xf32>
    %798 = vector.multi_reduction <add>, %797, %cst_152 [1, 2, 3] : vector<1x2x8x1xf32> to vector<1xf32>
    %799 = vector.shape_cast %798 : vector<1xf32> to vector<1x1x1x1xf32>
    %800 = vector.extract %799[0, 0, 0, 0] : f32 from vector<1x1x1x1xf32>
    %cst_153 = arith.constant 0.000000e+00 : f32
    %801 = vector.broadcast %cst_153 : f32 to vector<1x1x128xf32>
    %802 = vector.broadcast %787 : f32 to vector<1x1x128xf32>
    %803 = arith.addf %801, %802 : vector<1x1x128xf32>
    %c0_154 = arith.constant 0 : index
    %c0_155 = arith.constant 0 : index
    %c0_156 = arith.constant 0 : index
    %804 = vector.load %arg9[%c0_154, %c0_155, %c0_156] : memref<1x1x128xf32, #tpu.memory_space<vmem>>, vector<1x1x128xf32>
    tpu.vector_store %arg9[%c0_154, %c0_155, %c0_156], %803 {strides = array<i32>} : memref<1x1x128xf32, #tpu.memory_space<vmem>>, vector<1x1x128xf32>,
    %cst_157 = arith.constant 0.000000e+00 : f32
    %805 = vector.broadcast %cst_157 : f32 to vector<1x1x128xf32>
    %806 = vector.broadcast %800 : f32 to vector<1x1x128xf32>
    %807 = arith.addf %805, %806 : vector<1x1x128xf32>
    %c0_158 = arith.constant 0 : index
    %c0_159 = arith.constant 0 : index
    %c0_160 = arith.constant 0 : index
    %808 = vector.load %arg10[%c0_158, %c0_159, %c0_160] : memref<1x1x128xf32, #tpu.memory_space<vmem>>, vector<1x1x128xf32>
    tpu.vector_store %arg10[%c0_158, %c0_159, %c0_160], %807 {strides = array<i32>} : memref<1x1x128xf32, #tpu.memory_space<vmem>>, vector<1x1x128xf32>,
    return
  }
  func.func @transform_0(%arg0: i32) -> (i32, i32, i32) {
    %c0_i32 = arith.constant 0 : i32
    %c0_i32_0 = arith.constant 0 : i32
    %c0_i32_1 = arith.constant 0 : i32
    return %arg0, %c0_i32, %c0_i32_0 : i32, i32, i32
  }
  func.func @transform_1(%arg0: i32) -> (i32, i32, i32) {
    %c0_i32 = arith.constant 0 : i32
    %c0_i32_0 = arith.constant 0 : i32
    %c0_i32_1 = arith.constant 0 : i32
    return %arg0, %c0_i32, %c0_i32_0 : i32, i32, i32
  }
  func.func @transform_2(%arg0: i32) -> (i32, i32, i32) {
    %c0_i32 = arith.constant 0 : i32
    %c0_i32_0 = arith.constant 0 : i32
    %c0_i32_1 = arith.constant 0 : i32
    return %arg0, %c0_i32, %c0_i32_0 : i32, i32, i32
  }
  func.func @transform_3(%arg0: i32) -> (i32, i32, i32) {
    %c0_i32 = arith.constant 0 : i32
    %c0_i32_0 = arith.constant 0 : i32
    %c0_i32_1 = arith.constant 0 : i32
    return %arg0, %c0_i32, %c0_i32_0 : i32, i32, i32
  }
  func.func @transform_4(%arg0: i32) -> (i32, i32) {
    %c0_i32 = arith.constant 0 : i32
    %c0_i32_0 = arith.constant 0 : i32
    %c0_i32_1 = arith.constant 0 : i32
    return %c0_i32, %c0_i32_0 : i32, i32
  }
  func.func @transform_5(%arg0: i32) -> (i32, i32) {
    %c0_i32 = arith.constant 0 : i32
    %c0_i32_0 = arith.constant 0 : i32
    %c0_i32_1 = arith.constant 0 : i32
    return %c0_i32, %c0_i32_0 : i32, i32
  }
  func.func @transform_6(%arg0: i32) -> (i32, i32) {
    %c0_i32 = arith.constant 0 : i32
    %c0_i32_0 = arith.constant 0 : i32
    %c0_i32_1 = arith.constant 0 : i32
    return %c0_i32, %c0_i32_0 : i32, i32
  }
  func.func @transform_7(%arg0: i32) -> (i32, i32) {
    %c0_i32 = arith.constant 0 : i32
    %c0_i32_0 = arith.constant 0 : i32
    %c0_i32_1 = arith.constant 0 : i32
    return %c0_i32, %c0_i32_0 : i32, i32
  }
  func.func @transform_8(%arg0: i32) -> (i32, i32, i32) {
    %c0_i32 = arith.constant 0 : i32
    %c0_i32_0 = arith.constant 0 : i32
    %c0_i32_1 = arith.constant 0 : i32
    return %arg0, %c0_i32, %c0_i32_0 : i32, i32, i32
  }
  func.func @transform_9(%arg0: i32) -> (i32, i32, i32) {
    %c0_i32 = arith.constant 0 : i32
    %c0_i32_0 = arith.constant 0 : i32
    %c0_i32_1 = arith.constant 0 : i32
    return %arg0, %c0_i32, %c0_i32_0 : i32, i32, i32
  }
}

</mosaic_0001>

<bundles_post_ra>
// kernel: tpu_custom_call.1
= control target key start
LH: loop header
LB: loop body
LE: loop exit
PB: predicated region body
PF: predicated region fallthrough
CT: control target
= control target key end

     0   :  { %15 = vsyncpa [#allocation3], 0  ;;  %s2924_s0 = inlined_call_operand.vmem [shape: f32[2,8,256], index: 0, kind: input, shape index: {}]   ;;  %s2925_s1 = inlined_call_operand.vmem [shape: s32[2,8,1], index: 1, kind: input, shape index: {}]   ;;  %s2926_s2 = inlined_call_operand.vmem [shape: f32[2,8,256], index: 2, kind: input, shape index: {}]   ;;  %s2927_s3 = inlined_call_operand.vmem [shape: s32[2,8,1], index: 3, kind: input, shape index: {}]   ;;  %s2928_s4 = inlined_call_operand.vmem [shape: f32[256,32], index: 4, kind: input, shape index: {}]   ;;  %s2929_s5 = inlined_call_operand.vmem [shape: f32[1,32], index: 5, kind: input, shape index: {}]   ;;  %s2930_s6 = inlined_call_operand.vmem [shape: f32[4,32], index: 6, kind: input, shape index: {}]   ;;  %s2931_s7 = inlined_call_operand.vmem [shape: f32[1,4], index: 7, kind: input, shape index: {}]   ;;  %s2932_s8 = inlined_call_operand.hbm [shape: f32[1,1,128], index: 8, kind: output, shape index: {0}]   ;;  %s2933_s9 = inlined_call_operand.hbm [shape: f32[1,1,128], index: 9, kind: output, shape index: {1}]  }
   0x1   :  { %v60_v0 = vld [vmem:[%s2928_s4 + $0x78] sm:$0xff]  ;;  %v59_v2 = vld [vmem:[%s2928_s4 + $0x70] sm:$0xff]  ;;  %v58_v4 = vld [vmem:[%s2928_s4 + $0x68] sm:$0xff] }
   0x2   :  { %v76_v1 = vld [vmem:[%s2928_s4 + $0xf8] sm:$0xff]  ;;  %78 = vmatpush.msra.mxu0 %v60_v0  ;;  %v75_v3 = vld [vmem:[%s2928_s4 + $0xf0] sm:$0xff]  ;;  %v74_v5 = vld [vmem:[%s2928_s4 + $0xe8] sm:$0xff]  ;;  %129 = vmatpush.msra.mxu2 %v60_v0 }
   0x3   :  { %101 = vmatpush.msra.mxu1 %v76_v1  ;;  %152 = vmatpush.msra.mxu3 %v76_v1  ;;  %v57_v6 = vld [vmem:[%s2928_s4 + $0x60] sm:$0xff]  ;;  %v56_v8 = vld [vmem:[%s2928_s4 + $0x58] sm:$0xff]  ;;  %v55_v10 = vld [vmem:[%s2928_s4 + $0x50] sm:$0xff] }
   0x4   :  { %79 = vmatpush.msra.mxu0 %v59_v2  ;;  %v73_v7 = vld [vmem:[%s2928_s4 + $0xe0] sm:$0xff]  ;;  %130 = vmatpush.msra.mxu2 %v59_v2  ;;  %v72_v9 = vld [vmem:[%s2928_s4 + $0xd8] sm:$0xff]  ;;  %v71_v11 = vld [vmem:[%s2928_s4 + $0xd0] sm:$0xff] }
   0x5   :  { %102 = vmatpush.msra.mxu1 %v75_v3  ;;  %153 = vmatpush.msra.mxu3 %v75_v3  ;;  %v54_v12 = vld [vmem:[%s2928_s4 + $0x48] sm:$0xff]  ;;  %v53_v14 = vld [vmem:[%s2928_s4 + $0x40] sm:$0xff] }
   0x6   :  { %80 = vmatpush.msra.mxu0 %v58_v4  ;;  %131 = vmatpush.msra.mxu2 %v58_v4  ;;  %v70_v13 = vld [vmem:[%s2928_s4 + $0xc8] sm:$0xff]  ;;  %v69_v15 = vld [vmem:[%s2928_s4 + $0xc0] sm:$0xff] }
   0x7   :  { %103 = vmatpush.msra.mxu1 %v74_v5  ;;  %154 = vmatpush.msra.mxu3 %v74_v5 }
   0x8   :  { %81 = vmatpush.msra.mxu0 %v57_v6  ;;  %132 = vmatpush.msra.mxu2 %v57_v6 }
   0x9   :  { %104 = vmatpush.msra.mxu1 %v73_v7  ;;  %155 = vmatpush.msra.mxu3 %v73_v7 }
   0xa   :  { %82 = vmatpush.msra.mxu0 %v56_v8  ;;  %133 = vmatpush.msra.mxu2 %v56_v8 }
   0xb   :  { %105 = vmatpush.msra.mxu1 %v72_v9  ;;  %156 = vmatpush.msra.mxu3 %v72_v9 }
   0xc   :  { %83 = vmatpush.msra.mxu0 %v55_v10  ;;  %134 = vmatpush.msra.mxu2 %v55_v10 }
   0xd   :  { %106 = vmatpush.msra.mxu1 %v71_v11  ;;  %157 = vmatpush.msra.mxu3 %v71_v11 }
   0xe   :  { %16 = vsyncpa [#allocation5], 0  ;;  %84 = vmatpush.msra.mxu0 %v54_v12  ;;  %v52_v16 = vld [vmem:[%s2928_s4 + $0x38] sm:$0xff]  ;;  %135 = vmatpush.msra.mxu2 %v54_v12  ;;  %v51_v18 = vld [vmem:[%s2928_s4 + $0x30] sm:$0xff]  ;;  %vm363_vm0 = vcmask 261120   ;;  %v2949_v8 = vmov 0   ;;  %v337_v9 = vlaneseq }
   0xf   :  { %107 = vmatpush.msra.mxu1 %v70_v13  ;;  %v68_v17 = vld [vmem:[%s2928_s4 + $0xb8] sm:$0xff]  ;;  %158 = vmatpush.msra.mxu3 %v70_v13  ;;  %v67_v19 = vld [vmem:[%s2928_s4 + $0xb0] sm:$0xff]  ;;  %v50_v20 = vld [vmem:[%s2928_s4 + $0x28] sm:$0xff]  ;;  %vm417_vm5 = vcmask 31744   ;;  %s1706_s17 = sshll.u32 %s2932_s8, 4  ;;  %s1911_s19 = smov [#allocation2]   ;;  %s1707_s17 = int_to_ptr.hbm [resolvable:$true] %s1706_s17 }
  0x10   :  { %85 = vmatpush.msra.mxu0 %v53_v14  ;;  %136 = vmatpush.msra.mxu2 %v53_v14  ;;  %v66_v21 = vld [vmem:[%s2928_s4 + $0xa8] sm:$0xff]  ;;  %v49_v22 = vld [vmem:[%s2928_s4 + $0x20] sm:$0xff]  ;;  %v48_v24 = vld [vmem:[%s2928_s4 + $0x18] sm:$0xff]  ;;  %v2141_v10 = vand.u32 127, %v337_v9  ;;  %s1704_s20 = sshll.u32 %s1911_s19, 4  ;;  %s1912_s21 = smov [#allocation4]   ;;  %s1705_s20 = int_to_ptr.vmem [resolvable:$true] %s1704_s20 }
  0x11   :  { %108 = vmatpush.msra.mxu1 %v69_v15  ;;  %159 = vmatpush.msra.mxu3 %v69_v15  ;;  %v65_v23 = vld [vmem:[%s2928_s4 + $0xa0] sm:$0xff]  ;;  %v64_v25 = vld [vmem:[%s2928_s4 + $0x98] sm:$0xff]  ;;  %v47_v26 = vld [vmem:[%s2928_s4 + $0x10] sm:$0xff]  ;;  %s1715_s22 = sshll.u32 %s1912_s21, 4  ;;  %s1717_s24 = sshll.u32 %s2933_s9, 4  ;;  %s1716_s22 = int_to_ptr.vmem [resolvable:$true] %s1715_s22  ;;  %s1718_s24 = int_to_ptr.hbm [resolvable:$true] %s1717_s24 }
  0x12   :  { %86 = vmatpush.msra.mxu0 %v52_v16  ;;  %137 = vmatpush.msra.mxu2 %v52_v16  ;;  %v63_v27 = vld [vmem:[%s2928_s4 + $0x90] sm:$0xff]  ;;  %v46_v28 = vld [vmem:[%s2928_s4 + $0x8] sm:$0xff]  ;;  %v45_v30 = vld [vmem:[%s2928_s4] sm:$0xff]  ;;  %vm370_vm1 = vcmp.eq.s32.totalorder %v2141_v10, 0  ;;  %vm384_vm2 = vcmp.eq.s32.totalorder %v2141_v10, 1  ;;  %vm2946_vm3 = vcmp.eq.s32.totalorder %v2141_v10, 2 }
  0x13   :  { %109 = vmatpush.msra.mxu1 %v68_v17  ;;  %160 = vmatpush.msra.mxu3 %v68_v17  ;;  %v62_v29 = vld [vmem:[%s2928_s4 + $0x88] sm:$0xff]  ;;  %v61_v31 = vld [vmem:[%s2928_s4 + $0x80] sm:$0xff]  ;;  %v35_v34 = vld [vmem:[%s2924_s0 + $0x10] sm:$0xff]  ;;  %vm2945_vm4 = vcmp.eq.s32.totalorder %v2141_v10, 3 }
  0x14   :  { %87 = vmatpush.msra.mxu0 %v51_v18  ;;  %138 = vmatpush.msra.mxu2 %v51_v18  ;;  %v33_v32 = vld [vmem:[%s2924_s0] sm:$0xff]  ;;  %v34_v33 = vld [vmem:[%s2924_s0 + $0x8] sm:$0xff]  ;;  %v36_v35 = vld [vmem:[%s2924_s0 + $0x18] sm:$0xff] }
  0x15   :  { %110 = vmatpush.msra.mxu1 %v67_v19  ;;  %161 = vmatpush.msra.mxu3 %v67_v19  ;;  %v37_v36 = vld [vmem:[%s2926_s2] sm:$0xff]  ;;  %v38_v37 = vld [vmem:[%s2926_s2 + $0x8] sm:$0xff]  ;;  %v39_v43 = vld [vmem:[%s2926_s2 + $0x10] sm:$0xff] }
  0x16   :  { %88 = vmatpush.msra.mxu0 %v50_v20  ;;  %139 = vmatpush.msra.mxu2 %v50_v20  ;;  %v1815_v38 = vld [vmem:[%s2929_s5] ss:$0 sm:$0xff]  ;;  %v40_v44 = vld [vmem:[%s2926_s2 + $0x18] sm:$0xff] }
  0x17   :  { %111 = vmatpush.msra.mxu1 %v66_v21  ;;  %162 = vmatpush.msra.mxu3 %v66_v21  ;;  %v2083_v41 = vld [vmem:[%s2930_s6] sm:$0xf] }
  0x18   :  { %89 = vmatpush.msra.mxu0 %v49_v22  ;;  %140 = vmatpush.msra.mxu2 %v49_v22  ;;  %v2094_v46 = vperm.slane %v2083_v41, 2  ;;  %v2097_v47 = vperm.slane %v2083_v41, 1  ;;  %v2100_v48 = vperm.slane %v2083_v41, 0  ;;  %v2129_v3 = vperm.slane %v2083_v41, 3  ;;  %v1816_v17 = vld [vmem:[%s2931_s7] ss:$0 sm:$0xff] }
  0x19   :  { %112 = vmatpush.msra.mxu1 %v65_v23  ;;  %163 = vmatpush.msra.mxu3 %v65_v23 }
  0x1a   :  { %90 = vmatpush.msra.mxu0 %v48_v24  ;;  %141 = vmatpush.msra.mxu2 %v48_v24 }
  0x1b   :  { %113 = vmatpush.msra.mxu1 %v64_v25  ;;  %164 = vmatpush.msra.mxu3 %v64_v25 }
  0x1c   :  { %91 = vmatpush.msra.mxu0 %v47_v26  ;;  %142 = vmatpush.msra.mxu2 %v47_v26 }
  0x1d   :  { %114 = vmatpush.msra.mxu1 %v63_v27  ;;  %165 = vmatpush.msra.mxu3 %v63_v27 }
  0x1e   :  { %92 = vmatpush.msra.mxu0 %v46_v28  ;;  %143 = vmatpush.msra.mxu2 %v46_v28 }
  0x1f   :  { %115 = vmatpush.msra.mxu1 %v62_v29  ;;  %166 = vmatpush.msra.mxu3 %v62_v29 }
  0x20   :  { %93 = vmatpush.msra.mxu0 %v45_v30  ;;  %144 = vmatpush.msra.mxu2 %v45_v30 }
  0x21   :  { %116 = vmatpush.msra.mxu1 %v61_v31  ;;  %94 = vmatmul.f32.vlgmr.msra.gmra.mxu0 %v33_v32 }
  0x22   :  { %117 = vmatmul.f32.vlgmr.msra.gmra.mxu1 %v34_v33  ;;  %167 = vmatpush.msra.mxu3 %v61_v31 }
  0x23   :  { %232 = vmatpush.xpose.msrb.mxu2 %v35_v34  ;;  %192 = vmatpush.xpose.msrb.mxu0 %v33_v32 }
  0x24   :  { %252 = vmatpush.xpose.msrb.mxu3 %v36_v35  ;;  %212 = vmatpush.xpose.msrb.mxu1 %v34_v33 }
  0x25   :  { %145 = vmatmul.f32.vlgmr.msra.gmra.mxu2 %v37_v36  ;;  %168 = vmatmul.f32.vlgmr.msra.gmra.mxu3 %v38_v37 }
  0x26   :  { %1760 = vset.pattern.permute.xlu2 %v2949_v8  ;;  %1759 = vset.pattern.permute.xlu1 %v2949_v8 }
  0x27   :  { %272 = vmatpush.xpose.msra.mxu0 %v33_v32  ;;  %312 = vmatpush.xpose.msra.mxu2 %v35_v34 }
  0x28   :  { %292 = vmatpush.xpose.msra.mxu1 %v34_v33  ;;  %332 = vmatpush.xpose.msra.mxu3 %v36_v35 }
  0x29   :  { %97 = vmatmul.f32.gmra.mxu0 %v35_v34  ;;  %1758 = vset.pattern.permute.xlu0 %v2949_v8 }
  0x2a   :  { %120 = vmatmul.f32.gmra.mxu1 %v36_v35 }
  0x2d   :  { %148 = vmatmul.f32.gmra.mxu2 %v39_v43  ;;  %171 = vmatmul.f32.gmra.mxu3 %v40_v44 }
  0x31   :  { %193 = vmatmul.f32.vlgmr.msrb.gmra.mxu0 %v33_v32  ;;  %v42_v32 = vld [vmem:[%s2925_s1 + $0x8] sm:$0xff] }
  0x32   :  { %213 = vmatmul.f32.vlgmr.msrb.gmra.mxu1 %v34_v33 }
  0x35   :  { %233 = vmatmul.f32.vlgmr.msrb.gmra.mxu2 %v35_v34  ;;  %253 = vmatmul.f32.vlgmr.msrb.gmra.mxu3 %v36_v35 }
  0x39   :  { %273 = vmatmul.f32.vlgmr.msra.gmra.mxu0 %v37_v36 }
  0x3a   :  { %293 = vmatmul.f32.vlgmr.msra.gmra.mxu1 %v38_v37 }
  0x3d   :  { %313 = vmatmul.f32.vlgmr.msra.gmra.mxu2 %v39_v43  ;;  %333 = vmatmul.f32.vlgmr.msra.gmra.mxu3 %v40_v44 }
  0x9e   :  { %v95_v39 = vpop.f32.mrf.mxu0 }
  0x9f   :  { %v118_v40 = vpop.f32.mrf.mxu1 }
  0xa0   :  { %v119_v42 = vadd.f32 %v118_v40, %v95_v39 }
  0xa2   :  { %v2091_v45 = vadd.f32 %v1815_v38, %v119_v42 }
  0xa4   :  { %v2103_v49 = vmax.f32 %v2091_v45, 0.0 }
  0xa6   :  { %v390_v50 = vmul.f32 %v2094_v46, %v2103_v49  ;;  %v376_v51 = vmul.f32 %v2097_v47, %v2103_v49  ;;  %v361_v52 = vmul.f32 %v2100_v48, %v2103_v49  ;;  %v98_v53 = vpop.f32.mrf.mxu0  ;;  %v404_v5 = vmul.f32 %v2129_v3, %v2103_v49 }
  0xa7   :  { %v121_v54 = vpop.f32.mrf.mxu1 }
  0xa8   :  { %v122_v55 = vadd.f32 %v121_v54, %v98_v53  ;;  %v392_v56 = vsel %vm363_vm0, %v390_v50, 0.0  ;;  %v378_v57 = vsel %vm363_vm0, %v376_v51, 0.0  ;;  %v364_v58 = vsel %vm363_vm0, %v361_v52, 0.0  ;;  %v146_v14 = vpop.f32.mrf.mxu2  ;;  %v169_v15 = vpop.f32.mrf.mxu3 }
  0xa9   :  { %393 = vadd.xlane.f32.xlu2 %v392_v56  ;;  %379 = vadd.xlane.f32.xlu1 %v378_v57  ;;  %v406_v7 = vsel %vm363_vm0, %v404_v5, 0.0  ;;  %v2144_v16 = vadd.f32 %v169_v15, %v146_v14  ;;  %v2953_v57 = vmov 2  }
  0xaa   :  { %v2114_v59 = vadd.f32 %v1815_v38, %v122_v55  ;;  %365 = vadd.xlane.f32.xlu0 %v364_v58  ;;  %v41_v58 = vld [vmem:[%s2925_s1] sm:$0xff] }
  0xac   :  { %v2117_v60 = vmax.f32 %v2114_v59, 0.0 }
  0xae   :  { %v391_v61 = vmul.f32 %v2094_v46, %v2117_v60  ;;  %v377_v62 = vmul.f32 %v2097_v47, %v2117_v60  ;;  %v362_v63 = vmul.f32 %v2100_v48, %v2117_v60  ;;  %v405_v4 = vmul.f32 %v2129_v3, %v2117_v60  ;;  %v194_v54 = vpop.f32.mrf.mxu0 }
  0xaf   :  { %v214_v55 = vpop.f32.mrf.mxu1 }
  0xb0   :  { %v395_v0 = vsel %vm363_vm0, %v391_v61, 0.0  ;;  %v381_v1 = vsel %vm363_vm0, %v377_v62, 0.0  ;;  %v367_v2 = vsel %vm363_vm0, %v362_v63, 0.0  ;;  %v409_v6 = vsel %vm363_vm0, %v405_v4, 0.0  ;;  %v149_v23 = vpop.f32.mrf.mxu2  ;;  %v172_v24 = vpop.f32.mrf.mxu3 }
  0xb1   :  { %396 = vadd.xlane.f32.xlu2 %v395_v0  ;;  %382 = vadd.xlane.f32.xlu1 %v381_v1  ;;  %v2154_v26 = vadd.f32 %v172_v24, %v149_v23  ;;  %v2178_v56 = vadd.f32 %v214_v55, %v194_v54  ;;  %v2947_v61 = vmov 1   ;;  %v2951_v62 = vmov 3  }
  0xb2   :  { %368 = vadd.xlane.f32.xlu0 %v367_v2 }
  0xb8   :  { %v234_v43 = vpop.f32.mrf.mxu2  ;;  %v254_v44 = vpop.f32.mrf.mxu3 }
  0xb9   :  { %410 = vadd.xlane.f32.xlu1 %v409_v6  ;;  %v2173_v51 = vadd.f32 %v254_v44, %v234_v43  ;;  %v1906_v44 = vmov 0.0  }
  0xba   :  { %407 = vadd.xlane.f32.xlu0 %v406_v7 }
  0xd2   :  { %343 = vperm.xlu1 %1759, %v42_v32  }
  0xda   :  { %631 = vperm.xlu1 %1759, %v2173_v51  }
  0xe2   :  { %1763 = vset.pattern.permute.xlu1 %v2953_v57 }
  0xe3   :  { %655 = vperm.xlu1 %1763, %v2178_v56  }
  0xeb   :  { %1765 = vset.pattern.permute.xlu1 %v2951_v62 }
 0x11c   :  { %v380_v11 = vpop.xlane.xlu1 %379  ;;  %v394_v12 = vpop.xlane.xlu2 %393 }
 0x11d   :  { %v366_v13 = vpop.xlane.xlu0 %365  ;;  %v385_v27 = vsel %vm384_vm2, %v380_v11, 0.0  ;;  %v399_v34 = vsel %vm2946_vm3, %v394_v12, 0.0 }
 0x11e   :  { %v371_v18 = vsel %vm370_vm1, %v366_v13, 0.0 }
 0x11f   :  { %v373_v20 = vadd.f32 %v1816_v17, %v371_v18 }
 0x121   :  { %v387_v30 = vadd.f32 %v385_v27, %v373_v20 }
 0x123   :  { %v401_v38 = vadd.f32 %v399_v34, %v387_v30 }
 0x124   :  { %v383_v19 = vpop.xlane.xlu1 %382  ;;  %v397_v28 = vpop.xlane.xlu2 %396 }
 0x125   :  { %v369_v21 = vpop.xlane.xlu0 %368  ;;  %v386_v29 = vsel %vm384_vm2, %v383_v19, 0.0  ;;  %v400_v33 = vsel %vm2946_vm3, %v397_v28, 0.0 }
 0x126   :  { %v372_v22 = vsel %vm370_vm1, %v369_v21, 0.0 }
 0x127   :  { %v374_v25 = vadd.f32 %v1816_v17, %v372_v22 }
 0x129   :  { %v388_v31 = vadd.f32 %v386_v29, %v374_v25 }
 0x12b   :  { %v402_v36 = vadd.f32 %v400_v33, %v388_v31 }
 0x12c   :  { %v411_v35 = vpop.xlane.xlu1 %410 }
 0x12d   :  { %v414_v37 = vsel %vm2945_vm4, %v411_v35, 0.0  ;;  %v408_v39 = vpop.xlane.xlu0 %407 }
 0x12e   :  { %v416_v40 = vadd.f32 %v414_v37, %v402_v36  ;;  %v413_v42 = vsel %vm2945_vm4, %v408_v39, 0.0 }
 0x12f   :  { %v415_v50 = vadd.f32 %v413_v42, %v401_v38 }
 0x130   :  { %v421_v52 = vsel %vm417_vm5, %v416_v40, -inf }
 0x131   :  { %422 = vmax.xlane.f32.xlu0 %v421_v52  ;;  %v418_v53 = vsel %vm417_vm5, %v415_v50, -inf }
 0x132   :  { %419 = vmax.xlane.f32.xlu2 %v418_v53 }
 0x144   :  { %v344_v14 = vpop.permute.xlu1 %343 }
 0x145   :  { %340 = vperm.xlu0 %1758, %v41_v58   ;;  %vm346_vm12 = vcmp.eq.s32.totalorder %v2141_v10, %v344_v14 }
 0x146   :  { %v2215_v54 = vsel %vm346_vm12, 1.0, %v1906_v44 }
 0x14a   :  { %626 = vperm.xlu2 %1760, %v2178_v56  }
 0x14c   :  { %v2203_v17 = vpop.permute.xlu1 %631 }
 0x14d   :  { %1761 = vset.pattern.permute.xlu0 %v2947_v61 }
 0x14e   :  { %641 = vperm.xlu0 %1761, %v2178_v56  }
 0x152   :  { %1762 = vset.pattern.permute.xlu2 %v2947_v61 }
 0x153   :  { %645 = vperm.xlu2 %1762, %v2173_v51  }
 0x155   :  { %v2207_v19 = vpop.permute.xlu1 %655 }
 0x156   :  { %1772 = vset.pattern.permute.xlu0 %v2953_v57 }
 0x15b   :  { %1764 = vset.pattern.permute.xlu2 %v2953_v57 }
 0x15c   :  { %659 = vperm.xlu2 %1764, %v2173_v51  }
 0x164   :  { %1766 = vset.pattern.permute.xlu2 %v2949_v8 }
 0x1a4   :  { %v423_v63 = vpop.xlane.xlu0 %422 }
 0x1a5   :  { %v420_v0 = vpop.xlane.xlu2 %419  ;;  %v425_v1 = vsub.f32 %v416_v40, %v423_v63 }
 0x1a6   :  { %v424_v2 = vsub.f32 %v415_v50, %v420_v0  ;;  %v2938_v0 = vmov 6  }
 0x1a7   :  { %v428_v4 = vmul.f32 1.442695, %v425_v1  ;;  %v2940_v1 = vmov 4  }
 0x1a8   :  { %v426_v5 = vmul.f32 1.442695, %v424_v2  ;;  %v2936_v2 = vmov 5  }
 0x1a9   :  { %1817 = vpow2.f32 %v428_v4  ;;  %v2934_v4 = vmov 7  }
 0x1aa   :  { %1819 = vpow2.f32 %v426_v5 }
 0x1ad   :  { %v2199_v13 = vpop.permute.xlu2 %626 }
 0x1af   :  { %v1818_v6 = vpop.eup %1817 }
 0x1b0   :  { %v1820_v7 = vpop.eup %1819  ;;  %v433_v11 = vsel %vm417_vm5, %v1818_v6, 0.0 }
 0x1b1   :  { %v430_v12 = vsel %vm417_vm5, %v1820_v7, 0.0  ;;  %434 = vadd.xlane.f32.xlu2 %v433_v11 }
 0x1b2   :  { %431 = vadd.xlane.f32.xlu1 %v430_v12 }
 0x1b5   :  { %v2201_v15 = vpop.permute.xlu2 %645 }
 0x1b7   :  { %v341_v35 = vpop.permute.xlu0 %340 }
 0x1b8   :  { %vm345_vm9 = vcmp.eq.s32.totalorder %v2141_v10, %v341_v35 }
 0x1b9   :  { %v2212_v50 = vsel %vm345_vm9, 1.0, %v1906_v44 }
 0x1bd   :  { %v2205_v18 = vpop.permute.xlu2 %659 }
 0x1cb   :  { %669 = vperm.xlu1 %1765, %v2178_v56  }
 0x1d3   :  { %1767 = vset.pattern.permute.xlu1 %v2947_v61 }
 0x224   :  { %v435_v20 = vpop.xlane.xlu2 %434 }
 0x225   :  { %v432_v21 = vpop.xlane.xlu1 %431  ;;  %1821 = vrcp.f32 %v435_v20  ;;  %v462_v29 = vand.u32 2147483648, %v435_v20  ;;  %v460_v32 = vand.u32 2147483647, %v435_v20  ;;  %vm456_vm8 = vweird.f32 %v435_v20 }
 0x226   :  { %1823 = vrcp.f32 %v432_v21  ;;  %v447_v30 = vand.u32 2147483648, %v432_v21  ;;  %v445_v34 = vand.u32 2147483647, %v432_v21  ;;  %vm441_vm10 = vweird.f32 %v432_v21 }
 0x227   :  { %v463_v38 = vor.u32 1.1754944e-38, %v462_v29  ;;  %vm461_vm14 = vcmp.eq.f32.partialorder %v460_v32, 8.507059e+37 }
 0x228   :  { %v448_v39 = vor.u32 1.1754944e-38, %v447_v30  ;;  %vm446_vm15 = vcmp.eq.f32.partialorder %v445_v34, 8.507059e+37 }
 0x22b   :  { %v1822_v22 = vpop.eup %1821 }
 0x22c   :  { %v1824_v23 = vpop.eup %1823  ;;  %v452_v24 = vmul.f32 %v1822_v22, %v435_v20  ;;  %vm457_vm6 = vweird.f32 %v1822_v22 }
 0x22d   :  { %v437_v25 = vmul.f32 %v1824_v23, %v432_v21  ;;  %vm442_vm7 = vweird.f32 %v1824_v23  ;;  %vm458_vm11 = vmor %vm456_vm8, %vm457_vm6  ;;  %vm518_vm6 = vcmp.gt.f32.partialorder %v2091_v45, 0.0 }
 0x22e   :  { %v453_v27 = vsub.f32 1.0, %v452_v24  ;;  %vm443_vm13 = vmor %vm441_vm10, %vm442_vm7  ;;  %vm519_vm7 = vcmp.gt.f32.partialorder %v2114_v59, 0.0 }
 0x22f   :  { %v438_v28 = vsub.f32 1.0, %v437_v25 }
 0x230   :  { %v454_v31 = vmul.f32 %v1822_v22, %v453_v27 }
 0x231   :  { %v439_v33 = vmul.f32 %v1824_v23, %v438_v28 }
 0x232   :  { %v455_v36 = vadd.f32 %v1822_v22, %v454_v31 }
 0x233   :  { %v440_v37 = vadd.f32 %v1824_v23, %v439_v33 }
 0x234   :  { %v459_v40 = vsel %vm458_vm11, %v1822_v22, %v455_v36 }
 0x235   :  { %v444_v42 = vsel %vm443_vm13, %v1824_v23, %v440_v37  ;;  %v464_v43 = vsel %vm461_vm14, %v463_v38, %v459_v40 }
 0x236   :  { %v449_v52 = vsel %vm446_vm15, %v448_v39, %v444_v42  ;;  %v465_v53 = vmul.f32 %v1818_v6, %v464_v43 }
 0x237   :  { %v450_v55 = vmul.f32 %v1820_v7, %v449_v52  ;;  %v2257_v7 = vpop.permute.xlu0 %641 }
 0x238   :  { %v2218_v58 = vsub.f32 %v465_v53, %v2215_v54 }
 0x239   :  { %v2221_v63 = vsub.f32 %v450_v55, %v2212_v50 }
 0x23a   :  { %499 = vperm.xlu0 %1772, %v2218_v58  }
 0x23b   :  { %483 = vperm.xlu1 %1767, %v2221_v63   ;;  %470 = vperm.xlu2 %1766, %v2221_v63  }
 0x23d   :  { %v2259_v11 = vpop.permute.xlu1 %669 }
 0x242   :  { %1773 = vset.pattern.permute.xlu0 %v2951_v62 }
 0x243   :  { %1768 = vset.pattern.permute.xlu1 %v2953_v57  ;;  %1769 = vset.pattern.permute.xlu2 %v2951_v62 }
 0x244   :  { %673 = vperm.xlu0 %1773, %v2173_v51   ;;  %495 = vperm.xlu1 %1768, %v2221_v63  }
 0x245   :  { %507 = vperm.xlu2 %1769, %v2221_v63  }
 0x24c   :  { %1779 = vset.pattern.permute.xlu0 %v2938_v0  ;;  %1775 = vset.pattern.permute.xlu1 %v2951_v62 }
 0x24d   :  { %1770 = vset.pattern.permute.xlu2 %v2949_v8  ;;  %711 = vperm.xlu0 %1779, %v2178_v56  }
 0x24e   :  { %511 = vperm.xlu1 %1775, %v2218_v58   ;;  %475 = vperm.xlu2 %1770, %v2218_v58  }
 0x255   :  { %1784 = vset.pattern.permute.xlu0 %v2947_v61 }
 0x256   :  { %1776 = vset.pattern.permute.xlu1 %v2940_v1  ;;  %1771 = vset.pattern.permute.xlu2 %v2947_v61 }
 0x257   :  { %687 = vperm.xlu1 %1776, %v2173_v51   ;;  %487 = vperm.xlu2 %1771, %v2218_v58  }
 0x25f   :  { %1778 = vset.pattern.permute.xlu1 %v2936_v2  ;;  %1774 = vset.pattern.permute.xlu2 %v2940_v1 }
 0x260   :  { %701 = vperm.xlu1 %1778, %v2173_v51   ;;  %683 = vperm.xlu2 %1774, %v2178_v56  }
 0x268   :  { %1781 = vset.pattern.permute.xlu1 %v2934_v4  ;;  %1777 = vset.pattern.permute.xlu2 %v2936_v2 }
 0x269   :  { %725 = vperm.xlu1 %1781, %v2178_v56   ;;  %697 = vperm.xlu2 %1777, %v2178_v56  }
 0x271   :  { %1780 = vset.pattern.permute.xlu2 %v2938_v0  ;;  %1783 = vset.pattern.permute.xlu1 %v2949_v8 }
 0x272   :  { %715 = vperm.xlu2 %1780, %v2173_v51  }
 0x27a   :  { %1782 = vset.pattern.permute.xlu2 %v2934_v4 }
 0x27b   :  { %729 = vperm.xlu2 %1782, %v2173_v51  }
 0x283   :  { %1785 = vset.pattern.permute.xlu2 %v2953_v57 }
 0x295   :  { %v471_v5 = vpop.permute.xlu2 %470 }
 0x296   :  { %v526_v56 = vmul.f32 %v471_v5, %v2103_v49  ;;  %v478_v39 = vmul.f32 %v471_v5, %v2100_v48 }
 0x298   :  { %v528_v20 = vsel %vm363_vm0, %v526_v56, 0.0 }
 0x299   :  { %v529_v23 = vrot.slane %v528_v20, 4 }
 0x29b   :  { %v530_v31 = vadd.f32 %v529_v23, %v528_v20 }
 0x29d   :  { %v531_v52 = vrot.slane %v530_v31, 2 }
 0x29f   :  { %v508_v6 = vpop.permute.xlu2 %507 }
 0x2a0   :  { %v589_v21 = vmul.f32 %v508_v6, %v2103_v49  ;;  %v514_v5 = vmul.f32 %v508_v6, %v2129_v3  ;;  %v2289_v6 = vshrl.u32 %v337_v9, 7 }
 0x2a2   :  { %v591_v29 = vsel %vm363_vm0, %v589_v21, 0.0  ;;  %vm542_vm8 = vcmp.eq.s32.totalorder %v2289_v6, 0  ;;  %vm563_vm9 = vcmp.eq.s32.totalorder %v2289_v6, 1  ;;  %vm584_vm10 = vcmp.eq.s32.totalorder %v2289_v6, 2 }
 0x2a3   :  { %v592_v34 = vrot.slane %v591_v29, 4  ;;  %vm605_vm11 = vcmp.eq.s32.totalorder %v2289_v6, 3 }
 0x2a5   :  { %v593_v53 = vadd.f32 %v592_v34, %v591_v29 }
 0x2a7   :  { %v594_v29 = vrot.slane %v593_v53, 2 }
 0x2a8   :  { %v476_v12 = vpop.permute.xlu2 %475 }
 0x2a9   :  { %v527_v14 = vmul.f32 %v476_v12, %v2117_v60 }
 0x2ab   :  { %v535_v22 = vsel %vm363_vm0, %v527_v14, 0.0 }
 0x2ac   :  { %v2266_v51 = vpop.permute.xlu0 %499  ;;  %v536_v27 = vrot.slane %v535_v22, 4 }
 0x2ad   :  { %v484_v24 = vpop.permute.xlu1 %483  ;;  %v569_v25 = vmul.f32 %v2266_v51, %v2117_v60 }
 0x2ae   :  { %v547_v28 = vmul.f32 %v484_v24, %v2103_v49  ;;  %v537_v35 = vadd.f32 %v536_v27, %v535_v22  ;;  %v490_v36 = vmul.f32 %v484_v24, %v2097_v47 }
 0x2af   :  { %v577_v32 = vsel %vm363_vm0, %v569_v25, 0.0 }
 0x2b0   :  { %v549_v30 = vsel %vm363_vm0, %v547_v28, 0.0  ;;  %v578_v40 = vrot.slane %v577_v32, 4  ;;  %v538_v55 = vrot.slane %v537_v35, 2  ;;  %v492_v56 = vadd.f32 %v490_v36, %v478_v39 }
 0x2b1   :  { %v488_v33 = vpop.permute.xlu2 %487  ;;  %v550_v38 = vrot.slane %v549_v30, 4 }
 0x2b2   :  { %v548_v37 = vmul.f32 %v488_v33, %v2117_v60  ;;  %v579_v24 = vadd.f32 %v578_v40, %v577_v32  ;;  %v539_v34 = vadd.f32 %v538_v55, %v537_v35  ;;  %v479_v40 = vmul.f32 %v476_v12, %v2100_v48 }
 0x2b3   :  { %v551_v20 = vadd.f32 %v550_v38, %v549_v30  ;;  %v491_v38 = vmul.f32 %v488_v33, %v2097_v47  ;;  %v503_v48 = vmul.f32 %v2266_v51, %v2094_v46 }
 0x2b4   :  { %v556_v42 = vsel %vm363_vm0, %v548_v37, 0.0  ;;  %v532_v37 = vadd.f32 %v531_v52, %v530_v31  ;;  %v580_v32 = vrot.slane %v579_v24, 2  ;;  %v595_v52 = vadd.f32 %v594_v29, %v593_v53 }
 0x2b5   :  { %v557_v43 = vrot.slane %v556_v42, 4  ;;  %v552_v30 = vrot.slane %v551_v20, 2  ;;  %v540_v55 = vrot.slane %v539_v34, 1  ;;  %v493_v47 = vadd.f32 %v491_v38, %v479_v40 }
 0x2b6   :  { %v496_v14 = vpop.permute.xlu1 %495  ;;  %v533_v35 = vrot.slane %v532_v37, 1  ;;  %v581_v33 = vadd.f32 %v580_v32, %v579_v24 }
 0x2b7   :  { %v558_v21 = vadd.f32 %v557_v43, %v556_v42  ;;  %v502_v22 = vmul.f32 %v496_v14, %v2094_v46  ;;  %v568_v23 = vmul.f32 %v496_v14, %v2103_v49  ;;  %v1733_v49 = vsel %vm518_vm6, 1.0, %v1906_v44 }
 0x2b8   :  { %v553_v14 = vadd.f32 %v552_v30, %v551_v20  ;;  %v534_v53 = vadd.f32 %v533_v35, %v532_v37  ;;  %v541_v20 = vadd.f32 %v540_v55, %v539_v34  ;;  %v582_v30 = vrot.slane %v581_v33, 1 }
 0x2b9   :  { %v559_v25 = vrot.slane %v558_v21, 2  ;;  %v504_v27 = vadd.f32 %v502_v22, %v492_v56  ;;  %v570_v28 = vsel %vm363_vm0, %v568_v23, 0.0 }
 0x2ba   :  { %v571_v36 = vrot.slane %v570_v28, 4  ;;  %v2283_v39 = vpop.permute.xlu2 %683  ;;  %v554_v24 = vrot.slane %v553_v14, 1  ;;  %v544_v40 = vsel %vm542_vm8, %v541_v20, 0.0 }
 0x2bb   :  { %v516_v42 = vadd.f32 %v514_v5, %v504_v27  ;;  %v560_v31 = vadd.f32 %v559_v25, %v558_v21  ;;  %v1734_v5 = vsel %vm519_vm7, 1.0, %v1906_v44  ;;  %v596_v21 = vrot.slane %v595_v52, 1 }
 0x2bc   :  { %v572_v56 = vadd.f32 %v571_v36, %v570_v28  ;;  %v505_v27 = vadd.f32 %v503_v48, %v493_v47  ;;  %v555_v35 = vadd.f32 %v554_v24, %v553_v14  ;;  %v583_v47 = vadd.f32 %v582_v30, %v581_v33 }
 0x2bd   :  { %v2292_v43 = vmul.f32 %v1733_v49, %v516_v42  ;;  %v561_v12 = vrot.slane %v560_v31, 1  ;;  %v2312_v49 = vadd.f32 %v596_v21, %v595_v52 }
 0x2be   :  { %v573_v25 = vrot.slane %v572_v56, 2  ;;  %v564_v20 = vsel %vm563_vm9, %v555_v35, 0.0 }
 0x2bf   :  { %v634_v22 = vperm.slane %v2292_v43, 0  ;;  %v648_v23 = vperm.slane %v2292_v43, 1  ;;  %v562_v51 = vadd.f32 %v561_v12, %v560_v31  ;;  %v662_v37 = vperm.slane %v2292_v43, 2 }
 0x2c0   :  { %v512_v9 = vpop.permute.xlu1 %511  ;;  %v738_v31 = vsel %vm363_vm0, %v2292_v43, 0.0 }
 0x2c1   :  { %v515_v28 = vmul.f32 %v512_v9, %v2129_v3  ;;  %v590_v29 = vmul.f32 %v512_v9, %v2117_v60  ;;  %v636_v38 = vmul.f32 %v634_v22, %v2199_v13  ;;  %v650_v46 = vmul.f32 %v648_v23, %v2257_v7 }
 0x2c2   :  { %v543_v3 = vsel %vm542_vm8, %v534_v53, 0.0  ;;  %v574_v60 = vadd.f32 %v573_v25, %v572_v56  ;;  %v676_v22 = vperm.slane %v2292_v43, 3  ;;  %v565_v52 = vsel %vm563_vm9, %v562_v51, 0.0  ;;  %v2338_v51 = vpop.permute.xlu0 %673 }
 0x2c3   :  { %v2303_v36 = vpop.permute.xlu2 %697  ;;  %v517_v34 = vadd.f32 %v515_v28, %v505_v27  ;;  %v598_v42 = vsel %vm363_vm0, %v590_v29, 0.0  ;;  %v652_v23 = vadd.f32 %v650_v46, %v636_v38  ;;  %v664_v56 = vmul.f32 %v662_v37, %v2207_v19 }
 0x2c4   :  { %v599_v32 = vrot.slane %v598_v42, 4  ;;  %v575_v12 = vrot.slane %v574_v60, 1  ;;  %v739_v21 = vrot.slane %v738_v31, 4  ;;  %v567_v28 = vadd.f32 %v565_v52, %v544_v40 }
 0x2c5   :  { %v2316_v55 = vmul.f32 %v1734_v5, %v517_v34  ;;  %v690_v29 = vperm.slane %v2292_v43, 4  ;;  %v666_v30 = vadd.f32 %v664_v56, %v652_v23  ;;  %v678_v37 = vmul.f32 %v676_v22, %v2259_v11 }
 0x2c6   :  { %v600_v9 = vadd.f32 %v599_v32, %v598_v42  ;;  %v576_v35 = vadd.f32 %v575_v12, %v574_v60  ;;  %v740_v52 = vadd.f32 %v739_v21, %v738_v31  ;;  %v586_v23 = vsel %vm584_vm10, %v583_v47, 0.0 }
 0x2c7   :  { %v635_v14 = vperm.slane %v2316_v55, 0  ;;  %v649_v5 = vperm.slane %v2316_v55, 1  ;;  %v663_v33 = vperm.slane %v2316_v55, 2  ;;  %v677_v27 = vperm.slane %v2316_v55, 3 }
 0x2c8   :  { %v601_v53 = vrot.slane %v600_v9, 2  ;;  %v691_v32 = vperm.slane %v2316_v55, 4  ;;  %v745_v40 = vsel %vm363_vm0, %v2316_v55, 0.0  ;;  %v680_v22 = vadd.f32 %v678_v37, %v666_v30 }
 0x2c9   :  { %v2325_v48 = vpop.permute.xlu1 %687  ;;  %v637_v25 = vmul.f32 %v635_v14, %v2203_v17  ;;  %v651_v24 = vmul.f32 %v649_v5, %v2201_v15  ;;  %v665_v42 = vmul.f32 %v663_v33, %v2205_v18  ;;  %v679_v56 = vmul.f32 %v677_v27, %v2338_v51 }
 0x2ca   :  { %v602_v38 = vadd.f32 %v601_v53, %v600_v9  ;;  %v746_v5 = vrot.slane %v745_v40, 4  ;;  %v566_v53 = vadd.f32 %v564_v20, %v543_v3  ;;  %v693_v60 = vmul.f32 %v691_v32, %v2325_v48 }
 0x2cb   :  { %v653_v34 = vadd.f32 %v651_v24, %v637_v25  ;;  %v692_v25 = vmul.f32 %v690_v29, %v2283_v39  ;;  %v705_v12 = vperm.slane %v2316_v55, 5  ;;  %v585_v31 = vsel %vm584_vm10, %v576_v35, 0.0 }
 0x2cc   :  { %v2336_v46 = vpop.permute.xlu2 %715  ;;  %v603_v14 = vrot.slane %v602_v38, 1  ;;  %v747_v4 = vadd.f32 %v746_v5, %v745_v40  ;;  %v588_v21 = vadd.f32 %v586_v23, %v567_v28  ;;  %v741_v3 = vrot.slane %v740_v52, 2 }
 0x2cd   :  { %v667_v9 = vadd.f32 %v665_v42, %v653_v34  ;;  %v719_v29 = vperm.slane %v2316_v55, 6  ;;  %v694_v37 = vadd.f32 %v692_v25, %v680_v22  ;;  %v718_v34 = vperm.slane %v2292_v43, 6  ;;  %v2367_v22 = vpop.permute.xlu0 %711 }
 0x2ce   :  { %v604_v33 = vadd.f32 %v603_v14, %v602_v38  ;;  %v748_v38 = vrot.slane %v747_v4, 2  ;;  %v704_v42 = vperm.slane %v2292_v43, 5  ;;  %v733_v32 = vperm.slane %v2316_v55, 7 }
 0x2cf   :  { %v681_v24 = vadd.f32 %v679_v56, %v667_v9  ;;  %v721_v35 = vmul.f32 %v719_v29, %v2336_v46  ;;  %v587_v9 = vadd.f32 %v585_v31, %v566_v53  ;;  %v732_v53 = vperm.slane %v2292_v43, 7 }
 0x2d0   :  { %v607_v47 = vsel %vm605_vm11, %v604_v33, 0.0  ;;  %v749_v23 = vadd.f32 %v748_v38, %v747_v4  ;;  %v706_v56 = vmul.f32 %v704_v42, %v2303_v36  ;;  %v742_v33 = vadd.f32 %v741_v3, %v740_v52 }
 0x2d1   :  { %v695_v20 = vadd.f32 %v693_v60, %v681_v24  ;;  %v609_v28 = vadd.f32 %v607_v47, %v588_v21  ;;  %v720_v4 = vmul.f32 %v718_v34, %v2367_v22 }
 0x2d2   :  { %v2355_v27 = vpop.permute.xlu1 %701  ;;  %v750_v24 = vrot.slane %v749_v23, 1  ;;  %v708_v60 = vadd.f32 %v706_v56, %v694_v37  ;;  %v743_v31 = vrot.slane %v742_v33, 1 }
 0x2d3   :  { %v707_v30 = vmul.f32 %v705_v12, %v2355_v27  ;;  %v606_v12 = vsel %vm605_vm11, %v2312_v49, 0.0  ;;  %v761_v21 = vmul.f32 0.00125, %v609_v28 }
 0x2d4   :  { %v608_v29 = vadd.f32 %v606_v12, %v587_v9  ;;  %v722_v3 = vadd.f32 %v720_v4, %v708_v60  ;;  %v744_v28 = vadd.f32 %v743_v31, %v742_v33 }
 0x2d5   :  { %v709_v14 = vadd.f32 %v707_v30, %v695_v20  ;;  %v2363_v40 = vpop.permute.xlu2 %729  ;;  %v751_v20 = vadd.f32 %v750_v24, %v749_v23  ;;  %v2378_v37 = vsub.f32 %v2083_v41, %v761_v21 }
 0x2d6   :  { %v735_v5 = vmul.f32 %v733_v32, %v2363_v40  ;;  %v760_v49 = vmul.f32 0.00125, %v608_v29 }
 0x2d7   :  { %v723_v25 = vadd.f32 %v721_v35, %v709_v14  ;;  %v2955_v23 = vperm.slane %v2378_v37, 0  ;;  %v2944_v4 = vperm.slane %v2378_v37, 1 }
 0x2d8   :  { %v2388_v9 = vsub.f32 %v2083_v41, %v760_v49  ;;  %v2943_v41 = vperm.slane %v2378_v37, 2 }
 0x2d9   :  { %v737_v47 = vadd.f32 %v735_v5, %v723_v25 }
 0x2da   :  { %v790_v24 = vperm.slane %v2388_v9, 1  ;;  %v776_v60 = vperm.slane %v2388_v9, 0  ;;  %v804_v29 = vperm.slane %v2388_v9, 2  ;;  %v818_v49 = vperm.slane %v2388_v9, 3 }
 0x2db   :  { %v753_v30 = vadd.f32 %v751_v20, %v737_v47  ;;  %v2374_v52 = vpop.permute.xlu1 %725 }
 0x2dc   :  { %v734_v38 = vmul.f32 %v732_v53, %v2374_v52 }
 0x2dd   :  { %v755_v42 = vmul.f32 0.00125, %v753_v30 }
 0x2de   :  { %v736_v32 = vadd.f32 %v734_v38, %v722_v3 }
 0x2df   :  { %v2381_v35 = vsub.f32 %v2114_v59, %v755_v42  ;;  %v2942_v42 = vperm.slane %v2378_v37, 3 }
 0x2e0   :  { %v752_v34 = vadd.f32 %v744_v28, %v736_v32 }
 0x2e1   :  { %v2384_v14 = vmax.f32 %v2381_v35, 0.0 }
 0x2e2   :  { %v754_v56 = vmul.f32 0.00125, %v752_v34 }
 0x2e3   :  { %v779_v5 = vmul.f32 %v2955_v23, %v2384_v14  ;;  %v807_v21 = vmul.f32 %v2943_v41, %v2384_v14  ;;  %v793_v30 = vmul.f32 %v2944_v4, %v2384_v14  ;;  %v821_v32 = vmul.f32 %v2942_v42, %v2384_v14 }
 0x2e4   :  { %v2394_v25 = vsub.f32 %v2091_v45, %v754_v56 }
 0x2e5   :  { %v783_v59 = vsel %vm363_vm0, %v779_v5, 0.0  ;;  %v811_v53 = vsel %vm363_vm0, %v807_v21, 0.0  ;;  %v797_v38 = vsel %vm363_vm0, %v793_v30, 0.0  ;;  %v825_v34 = vsel %vm363_vm0, %v821_v32, 0.0 }
 0x2e6   :  { %v2398_v33 = vmax.f32 %v2394_v25, 0.0  ;;  %784 = vadd.xlane.f32.xlu0 %v783_v59  ;;  %v617_v5 = vsel %vm417_vm5, %v2218_v58, 0.0  ;;  %v610_v59 = vsel %vm417_vm5, %v2221_v63, 0.0  ;;  %v354_v58 = vld [vmem:[%s2931_s7] sm:$0x1] }
 0x2e8   :  { %v792_v12 = vmul.f32 %v790_v24, %v2398_v33  ;;  %v778_v45 = vmul.f32 %v776_v60, %v2398_v33  ;;  %v806_v31 = vmul.f32 %v804_v29, %v2398_v33  ;;  %v820_v28 = vmul.f32 %v818_v49, %v2398_v33 }
 0x2ea   :  { %v794_v47 = vsel %vm363_vm0, %v792_v12, 0.0  ;;  %v780_v20 = vsel %vm363_vm0, %v778_v45, 0.0  ;;  %v808_v3 = vsel %vm363_vm0, %v806_v31, 0.0  ;;  %v822_v56 = vsel %vm363_vm0, %v820_v28, 0.0 }
 0x2eb   :  { %795 = vadd.xlane.f32.xlu2 %v794_v47  ;;  %781 = vadd.xlane.f32.xlu1 %v780_v20  ;;  %v618_v12 = vrot.slane %v617_v5, 4  ;;  %v611_v45 = vrot.slane %v610_v59, 4 }
 0x2ed   :  { %v619_v21 = vadd.f32 %v618_v12, %v617_v5  ;;  %v612_v47 = vadd.f32 %v611_v45, %v610_v59 }
 0x2ee   :  { %812 = vadd.xlane.f32.xlu0 %v811_v53 }
 0x2ef   :  { %v620_v20 = vrot.slane %v619_v21, 2  ;;  %v613_v53 = vrot.slane %v612_v47, 2 }
 0x2f1   :  { %v621_v31 = vadd.f32 %v620_v20, %v619_v21  ;;  %v614_v30 = vadd.f32 %v613_v53, %v612_v47 }
 0x2f3   :  { %809 = vadd.xlane.f32.xlu2 %v808_v3  ;;  %798 = vadd.xlane.f32.xlu1 %v797_v38  ;;  %v622_v3 = vrot.slane %v621_v31, 1  ;;  %v615_v38 = vrot.slane %v614_v30, 1 }
 0x2f5   :  { %v623_v32 = vadd.f32 %v622_v3, %v621_v31  ;;  %v616_v28 = vadd.f32 %v615_v38, %v614_v30 }
 0x2f7   :  { %v764_v2 = vmul.f32 0.00125, %v616_v28 }
 0x2f9   :  { %v2444_v5 = vsub.f32 %v354_v58, %v764_v2 }
 0x2fb   :  { %826 = vadd.xlane.f32.xlu2 %v825_v34  ;;  %823 = vadd.xlane.f32.xlu1 %v822_v56  ;;  %v765_v34 = vmul.f32 0.00125, %v623_v32  ;;  %v772_v21 = vperm.slane %v2444_v5, 0 }
 0x2fd   :  { %v2442_v1 = vsub.f32 %v354_v58, %v765_v34 }
 0x2ff   :  { %v773_v45 = vperm.slane %v2442_v1, 0 }
 0x359   :  { %v785_v63 = vpop.xlane.xlu0 %784 }
 0x35a   :  { %v787_v59 = vsel %vm370_vm1, %v785_v63, 0.0 }
 0x35b   :  { %v789_v31 = vadd.f32 %v787_v59, %v773_v45 }
 0x35e   :  { %v796_v56 = vpop.xlane.xlu2 %795  ;;  %v782_v0 = vpop.xlane.xlu1 %781 }
 0x35f   :  { %v786_v12 = vsel %vm370_vm1, %v782_v0, 0.0  ;;  %v800_v38 = vsel %vm384_vm2, %v796_v56, 0.0 }
 0x360   :  { %v788_v30 = vadd.f32 %v786_v12, %v772_v21 }
 0x361   :  { %v813_v3 = vpop.xlane.xlu0 %812 }
 0x362   :  { %v802_v0 = vadd.f32 %v800_v38, %v788_v30  ;;  %v815_v28 = vsel %vm2946_vm3, %v813_v3, 0.0 }
 0x366   :  { %v810_v47 = vpop.xlane.xlu2 %809  ;;  %v799_v20 = vpop.xlane.xlu1 %798 }
 0x367   :  { %v801_v53 = vsel %vm384_vm2, %v799_v20, 0.0  ;;  %v814_v32 = vsel %vm2946_vm3, %v810_v47, 0.0 }
 0x368   :  { %v803_v2 = vadd.f32 %v801_v53, %v789_v31  ;;  %v816_v34 = vadd.f32 %v814_v32, %v802_v0 }
 0x36a   :  { %v817_v63 = vadd.f32 %v815_v28, %v803_v2 }
 0x36e   :  { %v827_v58 = vpop.xlane.xlu2 %826  ;;  %v824_v42 = vpop.xlane.xlu1 %823 }
 0x36f   :  { %v829_v59 = vsel %vm2945_vm4, %v827_v58, 0.0  ;;  %v828_v12 = vsel %vm2945_vm4, %v824_v42, 0.0 }
 0x370   :  { %v831_v45 = vadd.f32 %v829_v59, %v817_v63  ;;  %v830_v21 = vadd.f32 %v828_v12, %v816_v34 }
 0x372   :  { %v832_v56 = vsel %vm417_vm5, %v830_v21, -inf  ;;  %v835_v47 = vsel %vm417_vm5, %v831_v45, -inf }
 0x373   :  { %833 = vmax.xlane.f32.xlu0 %v832_v56  ;;  %836 = vmax.xlane.f32.xlu1 %v835_v47 }
 0x3e6   :  { %v837_v20 = vpop.xlane.xlu1 %836  ;;  %v834_v53 = vpop.xlane.xlu0 %833 }
 0x3e7   :  { %v839_v31 = vsub.f32 %v831_v45, %v837_v20  ;;  %v838_v30 = vsub.f32 %v830_v21, %v834_v53 }
 0x3e9   :  { %v842_v3 = vmul.f32 1.442695, %v839_v31  ;;  %v840_v2 = vmul.f32 1.442695, %v838_v30 }
 0x3eb   :  { %1825 = vpow2.f32 %v842_v3 }
 0x3ec   :  { %1827 = vpow2.f32 %v840_v2 }
 0x3f1   :  { %v1826_v38 = vpop.eup %1825 }
 0x3f2   :  { %v1828_v32 = vpop.eup %1827  ;;  %v847_v42 = vsel %vm417_vm5, %v1826_v38, 0.0 }
 0x3f3   :  { %848 = vadd.xlane.f32.xlu0 %v847_v42  ;;  %v844_v0 = vsel %vm417_vm5, %v1828_v32, 0.0 }
 0x3f4   :  { %845 = vadd.xlane.f32.xlu2 %v844_v0 }
 0x466   :  { %v849_v28 = vpop.xlane.xlu0 %848 }
 0x467   :  { %v846_v34 = vpop.xlane.xlu2 %845  ;;  %1829 = vrcp.f32 %v849_v28  ;;  %v876_v42 = vand.u32 2147483648, %v849_v28  ;;  %vm870_vm7 = vweird.f32 %v849_v28  ;;  %v874_v41 = vand.u32 2147483647, %v849_v28 }
 0x468   :  { %1831 = vrcp.f32 %v846_v34  ;;  %v861_v56 = vand.u32 2147483648, %v846_v34  ;;  %v859_v53 = vand.u32 2147483647, %v846_v34  ;;  %vm855_vm13 = vweird.f32 %v846_v34 }
 0x469   :  { %vm875_vm3 = vcmp.eq.f32.partialorder %v874_v41, 8.507059e+37 }
 0x46a   :  { %v862_v30 = vor.u32 1.1754944e-38, %v861_v56  ;;  %vm860_vm6 = vcmp.eq.f32.partialorder %v859_v53, 8.507059e+37 }
 0x46d   :  { %v1830_v58 = vpop.eup %1829 }
 0x46e   :  { %v1832_v63 = vpop.eup %1831  ;;  %v866_v59 = vmul.f32 %v1830_v58, %v849_v28  ;;  %vm871_vm15 = vweird.f32 %v1830_v58 }
 0x46f   :  { %v851_v12 = vmul.f32 %v1832_v63, %v846_v34  ;;  %vm856_vm12 = vweird.f32 %v1832_v63  ;;  %vm872_vm4 = vmor %vm870_vm7, %vm871_vm15 }
 0x470   :  { %v867_v45 = vsub.f32 1.0, %v866_v59  ;;  %vm857_vm14 = vmor %vm855_vm13, %vm856_vm12  ;;  %vm2960_vm12 = vcmp.eq.s32.totalorder %v2141_v10, 2 }
 0x471   :  { %v852_v21 = vsub.f32 1.0, %v851_v12  ;;  %v877_v12 = vor.u32 1.1754944e-38, %v876_v42  ;;  %vm2961_vm13 = vmmov %vm2960_vm12 }
 0x472   :  { %v868_v47 = vmul.f32 %v1830_v58, %v867_v45 }
 0x473   :  { %v853_v20 = vmul.f32 %v1832_v63, %v852_v21 }
 0x474   :  { %v869_v3 = vadd.f32 %v1830_v58, %v868_v47 }
 0x475   :  { %v854_v31 = vadd.f32 %v1832_v63, %v853_v20 }
 0x476   :  { %v873_v59 = vsel %vm872_vm4, %v1830_v58, %v869_v3  ;;  %vm933_vm4 = vcmp.gt.f32.partialorder %v2381_v35, 0.0 }
 0x477   :  { %v858_v2 = vsel %vm857_vm14, %v1832_v63, %v854_v31  ;;  %v878_v21 = vsel %vm875_vm3, %v877_v12, %v873_v59  ;;  %vm932_vm3 = vcmp.gt.f32.partialorder %v2394_v25, 0.0  ;;  %vm2962_vm14 = vcmp.eq.s32.totalorder %v2141_v10, 3 }
 0x478   :  { %v863_v0 = vsel %vm860_vm6, %v862_v30, %v858_v2  ;;  %v879_v34 = vmul.f32 %v1826_v38, %v878_v21  ;;  %vm2963_vm15 = vmmov %vm2962_vm14 }
 0x479   :  { %v864_v4 = vmul.f32 %v1828_v32, %v863_v0 }
 0x47a   :  { %v2475_v63 = vsub.f32 %v879_v34, %v2215_v54 }
 0x47b   :  { %v2469_v45 = vsub.f32 %v864_v4, %v2212_v50 }
 0x47d   :  { %909 = vperm.xlu2 %1785, %v2469_v45   ;;  %897 = vperm.xlu0 %1784, %v2469_v45  }
 0x47e   :  { %884 = vperm.xlu1 %1783, %v2469_v45  }
 0x485   :  { %1786 = vset.pattern.permute.xlu2 %v2949_v8 }
 0x486   :  { %1788 = vset.pattern.permute.xlu1 %v2947_v61  ;;  %889 = vperm.xlu2 %1786, %v2475_v63  }
 0x487   :  { %901 = vperm.xlu1 %1788, %v2475_v63  }
 0x48e   :  { %1787 = vset.pattern.permute.xlu2 %v2951_v62 }
 0x48f   :  { %1789 = vset.pattern.permute.xlu1 %v2953_v57  ;;  %921 = vperm.xlu2 %1787, %v2469_v45  }
 0x490   :  { %913 = vperm.xlu1 %1789, %v2475_v63  }
 0x497   :  { %1792 = vset.pattern.permute.xlu2 %v2947_v61 }
 0x498   :  { %1790 = vset.pattern.permute.xlu1 %v2951_v62 }
 0x499   :  { %925 = vperm.xlu1 %1790, %v2475_v63  }
 0x4a1   :  { %1791 = vset.pattern.permute.xlu1 %v2949_v8 }
 0x4d7   :  { %v910_v41 = vpop.permute.xlu2 %909 }
 0x4d8   :  { %v980_v38 = vmul.f32 %v910_v41, %v2398_v33 }
 0x4da   :  { %v982_v32 = vsel %vm363_vm0, %v980_v38, 0.0  ;;  %v916_v38 = vmul.f32 %v910_v41, %v804_v29 }
 0x4db   :  { %v983_v58 = vrot.slane %v982_v32, 4 }
 0x4dd   :  { %v984_v20 = vadd.f32 %v983_v58, %v982_v32 }
 0x4df   :  { %v985_v12 = vrot.slane %v984_v20, 2 }
 0x4e0   :  { %v2489_v4 = vpop.permute.xlu2 %889 }
 0x4e1   :  { %v941_v42 = vmul.f32 %v2489_v4, %v2384_v14 }
 0x4e9   :  { %v922_v28 = vpop.permute.xlu2 %921 }
 0x4ea   :  { %v1000_v56 = vmul.f32 %v922_v28, %v2398_v33 }
 0x4ec   :  { %v1002_v47 = vsel %vm363_vm0, %v1000_v56, 0.0 }
 0x4ed   :  { %v1003_v53 = vrot.slane %v1002_v47, 4 }
 0x4ef   :  { %v898_v31 = vpop.permute.xlu0 %897  ;;  %v1004_v21 = vadd.f32 %v1003_v53, %v1002_v47  ;;  %v986_v47 = vadd.f32 %v985_v12, %v984_v20 }
 0x4f0   :  { %v885_v30 = vpop.permute.xlu1 %884  ;;  %v904_v3 = vmul.f32 %v898_v31, %v790_v24  ;;  %v960_v2 = vmul.f32 %v898_v31, %v2398_v33  ;;  %v949_v31 = vsel %vm363_vm0, %v941_v42, 0.0 }
 0x4f1   :  { %v892_v0 = vmul.f32 %v885_v30, %v776_v60  ;;  %v940_v59 = vmul.f32 %v885_v30, %v2398_v33  ;;  %v928_v60 = vmul.f32 %v922_v28, %v818_v49  ;;  %v1005_v53 = vrot.slane %v1004_v21, 2 }
 0x4f2   :  { %v962_v34 = vsel %vm363_vm0, %v960_v2, 0.0  ;;  %v950_v29 = vrot.slane %v949_v31, 4  ;;  %v987_v57 = vrot.slane %v986_v47, 1 }
 0x4f3   :  { %v942_v32 = vsel %vm363_vm0, %v940_v59, 0.0  ;;  %v906_v24 = vadd.f32 %v904_v3, %v892_v0  ;;  %v963_v58 = vrot.slane %v962_v34, 4  ;;  %v1735_v3 = vsel %vm932_vm3, 1.0, %v1906_v44 }
 0x4f4   :  { %v943_v56 = vrot.slane %v942_v32, 4  ;;  %v1006_v42 = vadd.f32 %v1005_v53, %v1004_v21 }
 0x4f5   :  { %v918_v33 = vadd.f32 %v916_v38, %v906_v24  ;;  %v964_v30 = vadd.f32 %v963_v58, %v962_v34  ;;  %v951_v38 = vadd.f32 %v950_v29, %v949_v31 }
 0x4f6   :  { %v944_v2 = vadd.f32 %v943_v56, %v942_v32  ;;  %v988_v56 = vadd.f32 %v987_v57, %v986_v47 }
 0x4f7   :  { %v930_v61 = vadd.f32 %v928_v60, %v918_v33  ;;  %v965_v8 = vrot.slane %v964_v30, 2  ;;  %v1007_v60 = vrot.slane %v1006_v42, 1 }
 0x4f8   :  { %v945_v41 = vrot.slane %v944_v2, 2 }
 0x4f9   :  { %v2512_v0 = vmul.f32 %v1735_v3, %v930_v61  ;;  %v966_v59 = vadd.f32 %v965_v8, %v964_v30  ;;  %v902_v62 = vpop.permute.xlu1 %901 }
 0x4fa   :  { %v946_v23 = vadd.f32 %v945_v41, %v944_v2  ;;  %v961_v49 = vmul.f32 %v902_v62, %v2384_v14 }
 0x4fb   :  { %v967_v28 = vrot.slane %v966_v59, 1  ;;  %v1034_v20 = vperm.slane %v2512_v0, 0  ;;  %v1040_v12 = vperm.slane %v2512_v0, 1  ;;  %v1046_v34 = vperm.slane %v2512_v0, 2 }
 0x4fc   :  { %v947_v32 = vrot.slane %v946_v23, 1  ;;  %v969_v24 = vsel %vm363_vm0, %v961_v49, 0.0  ;;  %v1052_v30 = vperm.slane %v2512_v0, 3  ;;  %v1058_v3 = vperm.slane %v2512_v0, 4 }
 0x4fd   :  { %v968_v61 = vadd.f32 %v967_v28, %v966_v59  ;;  %v970_v58 = vrot.slane %v969_v24, 4  ;;  %v1036_v8 = vmul.f32 %v1034_v20, %v2199_v13  ;;  %v1042_v21 = vmul.f32 %v1040_v12, %v2257_v7 }
 0x4fe   :  { %v948_v33 = vadd.f32 %v947_v32, %v946_v23  ;;  %v1048_v31 = vmul.f32 %v1046_v34, %v2207_v19  ;;  %v952_v13 = vrot.slane %v951_v38, 2  ;;  %v2956_v23 = vperm.slane %v2378_v37, 0 }
 0x4ff   :  { %v976_v53 = vsel %vm563_vm9, %v968_v61, 0.0  ;;  %v971_v2 = vadd.f32 %v970_v58, %v969_v24  ;;  %v1044_v41 = vadd.f32 %v1042_v21, %v1036_v8  ;;  %v1054_v28 = vmul.f32 %v1052_v30, %v2259_v11 }
 0x500   :  { %v956_v29 = vsel %vm542_vm8, %v948_v33, 0.0  ;;  %v893_v47 = vmul.f32 %v2489_v4, %v2956_v23  ;;  %v1064_v20 = vperm.slane %v2512_v0, 5  ;;  %v1082_v19 = vsel %vm363_vm0, %v2512_v0, 0.0 }
 0x501   :  { %v978_v59 = vadd.f32 %v976_v53, %v956_v29  ;;  %v972_v7 = vrot.slane %v971_v2, 2  ;;  %v1050_v57 = vadd.f32 %v1048_v31, %v1044_v41  ;;  %v996_v12 = vsel %vm584_vm10, %v988_v56, 0.0 }
 0x502   :  { %v914_v49 = vpop.permute.xlu1 %913  ;;  %v1008_v34 = vadd.f32 %v1007_v60, %v1006_v42  ;;  %v1070_v24 = vperm.slane %v2512_v0, 6  ;;  %v1060_v4 = vmul.f32 %v1058_v3, %v2283_v39  ;;  %v1083_v8 = vrot.slane %v1082_v19, 4 }
 0x503   :  { %v981_v32 = vmul.f32 %v914_v49, %v2384_v14  ;;  %v973_v61 = vadd.f32 %v972_v7, %v971_v2  ;;  %v1056_v58 = vadd.f32 %v1054_v28, %v1050_v57  ;;  %v953_v21 = vadd.f32 %v952_v13, %v951_v38 }
 0x504   :  { %v998_v11 = vadd.f32 %v996_v12, %v978_v59  ;;  %v2957_v33 = vperm.slane %v2378_v37, 1  ;;  %v1066_v42 = vmul.f32 %v1064_v20, %v2303_v36  ;;  %v1084_v56 = vadd.f32 %v1083_v8, %v1082_v19 }
 0x505   :  { %v989_v53 = vsel %vm363_vm0, %v981_v32, 0.0  ;;  %v1062_v31 = vadd.f32 %v1060_v4, %v1056_v58  ;;  %v1016_v60 = vsel %vm605_vm11, %v1008_v34, 0.0  ;;  %v2958_v2 = vperm.slane %v2378_v37, 2 }
 0x506   :  { %v905_v30 = vmul.f32 %v902_v62, %v2957_v33  ;;  %v990_v41 = vrot.slane %v989_v53, 4  ;;  %v1072_v39 = vmul.f32 %v1070_v24, %v2367_v22  ;;  %v1076_v38 = vperm.slane %v2512_v0, 7 }
 0x507   :  { %v917_v29 = vmul.f32 %v914_v49, %v2958_v2  ;;  %v974_v3 = vrot.slane %v973_v61, 1  ;;  %v1068_v62 = vadd.f32 %v1066_v42, %v1062_v31  ;;  %v1085_v59 = vrot.slane %v1084_v56, 2 }
 0x508   :  { %v991_v13 = vadd.f32 %v990_v41, %v989_v53  ;;  %v1018_v7 = vadd.f32 %v1016_v60, %v998_v11  ;;  %v907_v57 = vadd.f32 %v905_v30, %v893_v47  ;;  %v954_v23 = vrot.slane %v953_v21, 1 }
 0x509   :  { %v1074_v36 = vadd.f32 %v1072_v39, %v1068_v62  ;;  %v1086_v20 = vadd.f32 %v1085_v59, %v1084_v56  ;;  %v1078_v49 = vmul.f32 %v1076_v38, %v2374_v52  ;;  %v975_v34 = vadd.f32 %v974_v3, %v973_v61 }
 0x50a   :  { %v992_v28 = vrot.slane %v991_v13, 2  ;;  %v919_v19 = vadd.f32 %v917_v29, %v907_v57  ;;  %v2959_v32 = vperm.slane %v2378_v37, 3  ;;  %v1104_v4 = vmul.f32 0.00125, %v1018_v7 }
 0x50b   :  { %v926_v12 = vpop.permute.xlu1 %925  ;;  %v1080_v8 = vadd.f32 %v1078_v49, %v1074_v36  ;;  %v1087_v47 = vrot.slane %v1086_v20, 1  ;;  %v955_v11 = vadd.f32 %v954_v23, %v953_v21  ;;  %v1736_v41 = vsel %vm933_vm4, 1.0, %v1906_v44 }
 0x50c   :  { %v993_v22 = vadd.f32 %v992_v28, %v991_v13  ;;  %v929_v24 = vmul.f32 %v926_v12, %v2959_v32  ;;  %v1001_v58 = vmul.f32 %v926_v12, %v2384_v14  ;;  %v977_v52 = vsel %vm563_vm9, %v975_v34, 0.0 }
 0x50d   :  { %v1088_v42 = vadd.f32 %v1087_v47, %v1086_v20  ;;  %v2562_v2 = vsub.f32 %v2388_v9, %v1104_v4  ;;  %v957_v21 = vsel %vm542_vm8, %v955_v11, 0.0 }
 0x50e   :  { %v994_v33 = vrot.slane %v993_v22, 1  ;;  %v931_v30 = vadd.f32 %v929_v24, %v919_v19  ;;  %v1009_v53 = vsel %vm363_vm0, %v1001_v58, 0.0  ;;  %v979_v3 = vadd.f32 %v977_v52, %v957_v21 }
 0x50f   :  { %v1010_v31 = vrot.slane %v1009_v53, 4  ;;  %v1096_v14 = vadd.f32 %v1088_v42, %v1080_v8  ;;  %v1148_v36 = vperm.slane %v2562_v2, 2  ;;  %v1134_v20 = vperm.slane %v2562_v2, 1 }
 0x510   :  { %v995_v61 = vadd.f32 %v994_v33, %v993_v22  ;;  %v2559_v56 = vmul.f32 %v1736_v41, %v931_v30  ;;  %v1120_v19 = vperm.slane %v2562_v2, 0 }
 0x511   :  { %v1011_v60 = vadd.f32 %v1010_v31, %v1009_v53  ;;  %v1098_v62 = vmul.f32 0.00125, %v1096_v14 }
 0x512   :  { %v1035_v29 = vperm.slane %v2559_v56, 0  ;;  %v1041_v39 = vperm.slane %v2559_v56, 1  ;;  %v1047_v38 = vperm.slane %v2559_v56, 2  ;;  %v997_v59 = vsel %vm584_vm10, %v995_v61, 0.0 }
 0x513   :  { %v1012_v13 = vrot.slane %v1011_v60, 2  ;;  %v1053_v57 = vperm.slane %v2559_v56, 3  ;;  %v2575_v28 = vsub.f32 %v2394_v25, %v1098_v62  ;;  %v1059_v34 = vperm.slane %v2559_v56, 4 }
 0x514   :  { %v1037_v7 = vmul.f32 %v1035_v29, %v2203_v17  ;;  %v1043_v9 = vmul.f32 %v1041_v39, %v2201_v15  ;;  %v1049_v49 = vmul.f32 %v1047_v38, %v2205_v18  ;;  %v999_v17 = vadd.f32 %v997_v59, %v979_v3 }
 0x515   :  { %v1013_v23 = vadd.f32 %v1012_v13, %v1011_v60  ;;  %v2583_v15 = vmax.f32 %v2575_v28, 0.0  ;;  %v1089_v25 = vsel %vm363_vm0, %v2559_v56, 0.0  ;;  %v1055_v24 = vmul.f32 %v1053_v57, %v2338_v51 }
 0x516   :  { %v1045_v12 = vadd.f32 %v1043_v9, %v1037_v7  ;;  %v1065_v58 = vperm.slane %v2559_v56, 5  ;;  %v1090_v4 = vrot.slane %v1089_v25, 4  ;;  %v1061_v30 = vmul.f32 %v1059_v34, %v2325_v48 }
 0x517   :  { %v1014_v22 = vrot.slane %v1013_v23, 1  ;;  %v1150_v18 = vmul.f32 %v1148_v36, %v2583_v15  ;;  %v1136_v47 = vmul.f32 %v1134_v20, %v2583_v15  ;;  %v1122_v11 = vmul.f32 %v1120_v19, %v2583_v15 }
 0x518   :  { %v1051_v32 = vadd.f32 %v1049_v49, %v1045_v12  ;;  %v1071_v51 = vperm.slane %v2559_v56, 6  ;;  %v1091_v53 = vadd.f32 %v1090_v4, %v1089_v25  ;;  %v1067_v60 = vmul.f32 %v1065_v58, %v2355_v27 }
 0x519   :  { %v1015_v8 = vadd.f32 %v1014_v22, %v1013_v23  ;;  %v1152_v31 = vsel %vm363_vm0, %v1150_v18, 0.0  ;;  %v1138_v42 = vsel %vm363_vm0, %v1136_v47, 0.0  ;;  %v1124_v52 = vsel %vm363_vm0, %v1122_v11, 0.0 }
 0x51a   :  { %v1057_v33 = vadd.f32 %v1055_v24, %v1051_v32  ;;  %1153 = vadd.xlane.f32.xlu0 %v1152_v31  ;;  %1139 = vadd.xlane.f32.xlu1 %v1138_v42  ;;  %v1077_v14 = vperm.slane %v2559_v56, 7  ;;  %v1092_v48 = vrot.slane %v1091_v53, 2  ;;  %v1073_v39 = vmul.f32 %v1071_v51, %v2336_v46 }
 0x51b   :  { %v1017_v41 = vsel %vm605_vm11, %v1015_v8, 0.0  ;;  %1125 = vadd.xlane.f32.xlu2 %v1124_v52  ;;  %v1162_v58 = vperm.slane %v2562_v2, 3  ;;  %v1020_v11 = vsel %vm417_vm5, %v2469_v45, 0.0 }
 0x51c   :  { %v1063_v61 = vadd.f32 %v1061_v30, %v1057_v33  ;;  %v1019_v21 = vadd.f32 %v1017_v41, %v999_v17  ;;  %v1093_v38 = vadd.f32 %v1092_v48, %v1091_v53  ;;  %v1079_v13 = vmul.f32 %v1077_v14, %v2363_v40 }
 0x51d   :  { %v1164_v8 = vmul.f32 %v1162_v58, %v2583_v15  ;;  %v1027_v33 = vsel %vm417_vm5, %v2475_v63, 0.0  ;;  %v1021_v30 = vrot.slane %v1020_v11, 4 }
 0x51e   :  { %v1069_v29 = vadd.f32 %v1067_v60, %v1063_v61  ;;  %v1094_v62 = vrot.slane %v1093_v38, 1  ;;  %v1105_v59 = vmul.f32 0.00125, %v1019_v21  ;;  %v1028_v51 = vrot.slane %v1027_v33, 4 }
 0x51f   :  { %v1166_v47 = vsel %vm363_vm0, %v1164_v8, 0.0  ;;  %v1022_v53 = vadd.f32 %v1021_v30, %v1020_v11 }
 0x520   :  { %v1075_v3 = vadd.f32 %v1073_v39, %v1069_v29  ;;  %v1095_v9 = vadd.f32 %v1094_v62, %v1093_v38  ;;  %v2610_v23 = vsub.f32 %v2378_v37, %v1105_v59  ;;  %v1029_v41 = vadd.f32 %v1028_v51, %v1027_v33 }
 0x521   :  { %v1023_v31 = vrot.slane %v1022_v53, 2 }
 0x522   :  { %v1081_v7 = vadd.f32 %v1079_v13, %v1075_v3  ;;  %v1121_v46 = vperm.slane %v2610_v23, 0  ;;  %v1149_v34 = vperm.slane %v2610_v23, 2  ;;  %v1135_v40 = vperm.slane %v2610_v23, 1 }
 0x523   :  { %v1163_v24 = vperm.slane %v2610_v23, 3  ;;  %v1030_v42 = vrot.slane %v1029_v41, 2  ;;  %v1024_v52 = vadd.f32 %v1023_v31, %v1022_v53 }
 0x524   :  { %v1097_v57 = vadd.f32 %v1095_v9, %v1081_v7 }
 0x525   :  { %v1031_v61 = vadd.f32 %v1030_v42, %v1029_v41  ;;  %v1025_v60 = vrot.slane %v1024_v52, 1  ;;  %v274_v42 = vpop.f32.mrf.mxu0 }
 0x526   :  { %v1099_v27 = vmul.f32 0.00125, %v1097_v57 }
 0x527   :  { %v1032_v14 = vrot.slane %v1031_v61, 1  ;;  %v1026_v48 = vadd.f32 %v1025_v60, %v1024_v52  ;;  %v294_v52 = vpop.f32.mrf.mxu1  ;;  %v334_v60 = vpop.f32.mrf.mxu3 }
 0x528   :  { %v2613_v12 = vsub.f32 %v2381_v35, %v1099_v27 }
 0x529   :  { %v1033_v21 = vadd.f32 %v1032_v14, %v1031_v61  ;;  %v1108_v29 = vmul.f32 0.00125, %v1026_v48  ;;  %v314_v61 = vpop.f32.mrf.mxu2  ;;  %v2673_v14 = vadd.f32 %v294_v52, %v274_v42 }
 0x52a   :  { %v2616_v49 = vmax.f32 %v2613_v12, 0.0  ;;  %v2675_v48 = vadd.f32 %v334_v60, %v314_v61 }
 0x52b   :  { %v1109_v38 = vmul.f32 0.00125, %v1033_v21  ;;  %v2648_v45 = vsub.f32 %v2444_v5, %v1108_v29  ;;  %v2964_v21 = vmov 2   ;;  %v2965_v29 = vmov 3  }
 0x52c   :  { %v1123_v17 = vmul.f32 %v1121_v46, %v2616_v49  ;;  %v1151_v37 = vmul.f32 %v1149_v34, %v2616_v49  ;;  %v1137_v35 = vmul.f32 %v1135_v40, %v2616_v49  ;;  %v1165_v4 = vmul.f32 %v1163_v24, %v2616_v49 }
 0x52d   :  { %v2651_v13 = vsub.f32 %v2442_v1, %v1109_v38  ;;  %v1116_v59 = vperm.slane %v2648_v45, 0 }
 0x52e   :  { %v1127_v22 = vsel %vm363_vm0, %v1123_v17, 0.0  ;;  %v1155_v25 = vsel %vm363_vm0, %v1151_v37, 0.0  ;;  %v1141_v32 = vsel %vm363_vm0, %v1137_v35, 0.0  ;;  %v1169_v18 = vsel %vm363_vm0, %v1165_v4, 0.0 }
 0x52f   :  { %1128 = vadd.xlane.f32.xlu0 %v1127_v22  ;;  %1156 = vadd.xlane.f32.xlu1 %v1155_v25  ;;  %v1117_v7 = vperm.slane %v2651_v13, 0 }
 0x530   :  { %1142 = vadd.xlane.f32.xlu2 %v1141_v32 }
 0x537   :  { %1170 = vadd.xlane.f32.xlu0 %v1169_v18 }
 0x538   :  { %1167 = vadd.xlane.f32.xlu2 %v1166_v47 }
 0x58d   :  { %v1154_v39 = vpop.xlane.xlu0 %1153  ;;  %v1140_v63 = vpop.xlane.xlu1 %1139 }
 0x58e   :  { %v1126_v3 = vpop.xlane.xlu2 %1125  ;;  %v1144_v1 = vsel %vm384_vm2, %v1140_v63, 0.0  ;;  %v1158_v4 = vsel %vm2961_vm13, %v1154_v39, 0.0  ;;  %v2966_v39 = vmov 0  }
 0x58f   :  { %v1130_v62 = vsel %vm370_vm1, %v1126_v3, 0.0 }
 0x590   :  { %v1132_v57 = vadd.f32 %v1130_v62, %v1116_v59 }
 0x592   :  { %v1146_v25 = vadd.f32 %v1144_v1, %v1132_v57 }
 0x594   :  { %v1160_v11 = vadd.f32 %v1158_v4, %v1146_v25 }
 0x5a2   :  { %v1129_v9 = vpop.xlane.xlu0 %1128  ;;  %v1157_v35 = vpop.xlane.xlu1 %1156 }
 0x5a3   :  { %v1131_v27 = vsel %vm370_vm1, %v1129_v9, 0.0  ;;  %v1143_v17 = vpop.xlane.xlu2 %1142  ;;  %v1159_v32 = vsel %vm2960_vm12, %v1157_v35, 0.0 }
 0x5a4   :  { %v1133_v37 = vadd.f32 %v1131_v27, %v1117_v7  ;;  %v1145_v5 = vsel %vm384_vm2, %v1143_v17, 0.0 }
 0x5a6   :  { %v1147_v22 = vadd.f32 %v1145_v5, %v1133_v37  ;;  %v2967_v37 = vmov 1  }
 0x5a8   :  { %v1161_v18 = vadd.f32 %v1159_v32, %v1147_v22 }
 0x5aa   :  { %v1171_v8 = vpop.xlane.xlu0 %1170 }
 0x5ab   :  { %v1173_v47 = vsel %vm2962_vm14, %v1171_v8, 0.0  ;;  %v1168_v33 = vpop.xlane.xlu2 %1167 }
 0x5ac   :  { %v1175_v30 = vadd.f32 %v1173_v47, %v1161_v18  ;;  %v1172_v51 = vsel %vm2963_vm15, %v1168_v33, 0.0 }
 0x5ad   :  { %v1174_v53 = vadd.f32 %v1172_v51, %v1160_v11 }
 0x5ae   :  { %v1179_v41 = vsel %vm417_vm5, %v1175_v30, -inf }
 0x5af   :  { %1180 = vmax.xlane.f32.xlu2 %v1179_v41  ;;  %v1176_v31 = vsel %vm417_vm5, %v1174_v53, -inf }
 0x5b0   :  { %1177 = vmax.xlane.f32.xlu1 %v1176_v31 }
 0x5c7   :  { %1405 = vperm.xlu2 %1792, %v2673_v14  }
 0x5c9   :  { %1395 = vperm.xlu1 %1791, %v2675_v48  }
 0x5cf   :  { %1795 = vset.pattern.permute.xlu2 %v2964_v21 }
 0x5d0   :  { %1423 = vperm.xlu2 %1795, %v2675_v48  }
 0x5d1   :  { %1794 = vset.pattern.permute.xlu1 %v2964_v21 }
 0x5d2   :  { %1419 = vperm.xlu1 %1794, %v2673_v14  }
 0x5d8   :  { %1797 = vset.pattern.permute.xlu2 %v2965_v29 }
 0x5d9   :  { %1437 = vperm.xlu2 %1797, %v2675_v48  }
 0x5da   :  { %1796 = vset.pattern.permute.xlu1 %v2965_v29 }
 0x5e1   :  { %1798 = vset.pattern.permute.xlu2 %v2966_v39 }
 0x622   :  { %v1181_v38 = vpop.xlane.xlu2 %1180 }
 0x623   :  { %v1178_v3 = vpop.xlane.xlu1 %1177  ;;  %v1183_v63 = vsub.f32 %v1175_v30, %v1181_v38 }
 0x624   :  { %v1182_v62 = vsub.f32 %v1174_v53, %v1178_v3 }
 0x625   :  { %v1186_v59 = vmul.f32 1.442695, %v1183_v63 }
 0x626   :  { %v1184_v7 = vmul.f32 1.442695, %v1182_v62 }
 0x627   :  { %1833 = vpow2.f32 %v1186_v59 }
 0x628   :  { %1835 = vpow2.f32 %v1184_v7 }
 0x62d   :  { %v1834_v9 = vpop.eup %1833 }
 0x62e   :  { %v1836_v57 = vpop.eup %1835  ;;  %v1191_v27 = vsel %vm417_vm5, %v1834_v9, 0.0 }
 0x62f   :  { %v1188_v17 = vsel %vm417_vm5, %v1836_v57, 0.0  ;;  %1192 = vadd.xlane.f32.xlu1 %v1191_v27 }
 0x630   :  { %1189 = vadd.xlane.f32.xlu0 %v1188_v17  ;;  %v2968_v17 = vmov 4  }
 0x63b   :  { %v2694_v5 = vpop.permute.xlu1 %1395 }
 0x644   :  { %1409 = vperm.xlu0 %1784, %v2675_v48   ;;  %v2696_v1 = vpop.permute.xlu1 %1419 }
 0x648   :  { %1433 = vperm.xlu1 %1796, %v2673_v14  }
 0x64c   :  { %1793 = vset.pattern.permute.xlu0 %v2966_v39 }
 0x64d   :  { %1390 = vperm.xlu0 %1793, %v2673_v14  }
 0x650   :  { %1799 = vset.pattern.permute.xlu1 %v2967_v37 }
 0x6a2   :  { %v1193_v35 = vpop.xlane.xlu1 %1192 }
 0x6a3   :  { %v1190_v22 = vpop.xlane.xlu0 %1189  ;;  %1837 = vrcp.f32 %v1193_v35  ;;  %v1220_v11 = vand.u32 2147483648, %v1193_v35  ;;  %v1218_v51 = vand.u32 2147483647, %v1193_v35  ;;  %vm1214_vm3 = vweird.f32 %v1193_v35 }
 0x6a4   :  { %1839 = vrcp.f32 %v1190_v22  ;;  %v1205_v33 = vand.u32 2147483648, %v1190_v22  ;;  %v1203_v41 = vand.u32 2147483647, %v1190_v22  ;;  %vm1199_vm4 = vweird.f32 %v1190_v22 }
 0x6a5   :  { %v1221_v52 = vor.u32 1.1754944e-38, %v1220_v11  ;;  %vm1219_vm14 = vcmp.eq.f32.partialorder %v1218_v51, 8.507059e+37 }
 0x6a6   :  { %v1206_v61 = vor.u32 1.1754944e-38, %v1205_v33  ;;  %vm1204_vm15 = vcmp.eq.f32.partialorder %v1203_v41, 8.507059e+37 }
 0x6a9   :  { %v1838_v25 = vpop.eup %1837 }
 0x6aa   :  { %v1840_v32 = vpop.eup %1839  ;;  %v1210_v4 = vmul.f32 %v1838_v25, %v1193_v35  ;;  %vm1215_vm6 = vweird.f32 %v1838_v25 }
 0x6ab   :  { %v1195_v8 = vmul.f32 %v1840_v32, %v1190_v22  ;;  %vm1200_vm7 = vweird.f32 %v1840_v32  ;;  %vm1216_vm12 = vmor %vm1214_vm3, %vm1215_vm6  ;;  %vm1277_vm6 = vcmp.gt.f32.partialorder %v2613_v12, 0.0 }
 0x6ac   :  { %v1211_v18 = vsub.f32 1.0, %v1210_v4  ;;  %vm1201_vm13 = vmor %vm1199_vm4, %vm1200_vm7  ;;  %vm1276_vm7 = vcmp.gt.f32.partialorder %v2575_v28, 0.0 }
 0x6ad   :  { %v1196_v47 = vsub.f32 1.0, %v1195_v8 }
 0x6ae   :  { %v1212_v30 = vmul.f32 %v1838_v25, %v1211_v18 }
 0x6af   :  { %v1197_v53 = vmul.f32 %v1840_v32, %v1196_v47 }
 0x6b0   :  { %v1213_v31 = vadd.f32 %v1838_v25, %v1212_v30 }
 0x6b1   :  { %v1198_v42 = vadd.f32 %v1840_v32, %v1197_v53 }
 0x6b2   :  { %v1217_v60 = vsel %vm1216_vm12, %v1838_v25, %v1213_v31 }
 0x6b3   :  { %v1202_v38 = vsel %vm1201_vm13, %v1840_v32, %v1198_v42  ;;  %v1222_v3 = vsel %vm1219_vm14, %v1221_v52, %v1217_v60  ;;  %vm1680_vm14 = vcmask 7168  }
 0x6b4   :  { %v1207_v63 = vsel %vm1204_vm15, %v1206_v61, %v1202_v38  ;;  %v1223_v62 = vmul.f32 %v1834_v9, %v1222_v3 }
 0x6b5   :  { %v1208_v59 = vmul.f32 %v1836_v57, %v1207_v63 }
 0x6b6   :  { %v2699_v7 = vsub.f32 %v1223_v62, %v2215_v54  ;;  %v2970_v54 = vmov 5   ;;  %v2741_v35 = vpop.permute.xlu0 %1409 }
 0x6b7   :  { %v2702_v27 = vsub.f32 %v1208_v59, %v2212_v50  ;;  %v2969_v50 = vmov 6  }
 0x6b8   :  { %1233 = vperm.xlu0 %1793, %v2699_v7  }
 0x6b9   :  { %1228 = vperm.xlu2 %1798, %v2702_v27   ;;  %1241 = vperm.xlu1 %1799, %v2702_v27  }
 0x6ba   :  { %v2745_v32 = vpop.permute.xlu1 %1433 }
 0x6bf   :  { %v2743_v25 = vpop.permute.xlu0 %1390 }
 0x6c0   :  { %1802 = vset.pattern.permute.xlu0 %v2968_v17 }
 0x6c1   :  { %1804 = vset.pattern.permute.xlu2 %v2967_v37  ;;  %1800 = vset.pattern.permute.xlu1 %v2964_v21 }
 0x6c2   :  { %1253 = vperm.xlu1 %1800, %v2702_v27   ;;  %1245 = vperm.xlu2 %1804, %v2699_v7  }
 0x6c3   :  { %1447 = vperm.xlu0 %1802, %v2673_v14  }
 0x6ca   :  { %1801 = vset.pattern.permute.xlu1 %v2965_v29  ;;  %1805 = vset.pattern.permute.xlu2 %v2964_v21  ;;  %v2971_v21 = vmov 7  }
 0x6cb   :  { %1810 = vset.pattern.permute.xlu0 %v2969_v50  ;;  %1265 = vperm.xlu1 %1801, %v2702_v27  }
 0x6cc   :  { %1257 = vperm.xlu2 %1805, %v2699_v7   ;;  %1479 = vperm.xlu0 %1810, %v2675_v48  }
 0x6d3   :  { %1803 = vset.pattern.permute.xlu1 %v2968_v17  ;;  %v1738_v17 = vsel %vm1277_vm6, 1.0, %v1906_v44 }
 0x6d4   :  { %1806 = vset.pattern.permute.xlu2 %v2965_v29  ;;  %1451 = vperm.xlu1 %1803, %v2675_v48   ;;  %v2735_v29 = vpop.permute.xlu2 %1405 }
 0x6d5   :  { %1269 = vperm.xlu2 %1806, %v2699_v7   ;;  %1813 = vset.pattern.permute.xlu0 %v2966_v39 }
 0x6dc   :  { %1808 = vset.pattern.permute.xlu1 %v2970_v54  ;;  %v2737_v9 = vpop.permute.xlu2 %1423 }
 0x6dd   :  { %1807 = vset.pattern.permute.xlu2 %v2970_v54  ;;  %1465 = vperm.xlu1 %1808, %v2675_v48  }
 0x6de   :  { %1461 = vperm.xlu2 %1807, %v2673_v14  }
 0x6e4   :  { %v2739_v57 = vpop.permute.xlu2 %1437 }
 0x6e5   :  { %1811 = vset.pattern.permute.xlu1 %v2971_v21 }
 0x6e6   :  { %1809 = vset.pattern.permute.xlu2 %v2969_v50  ;;  %1489 = vperm.xlu1 %1811, %v2673_v14  }
 0x6e7   :  { %1475 = vperm.xlu2 %1809, %v2673_v14  }
 0x6ee   :  { %1814 = vset.pattern.permute.xlu1 %v2966_v39 }
 0x6ef   :  { %1812 = vset.pattern.permute.xlu2 %v2971_v21  ;;  %v1103_v21 = vadd.f32 %v2559_v56, %v2316_v55 }
 0x6f0   :  { %1493 = vperm.xlu2 %1812, %v2675_v48  }
 0x713   :  { %v1229_v37 = vpop.permute.xlu2 %1228 }
 0x714   :  { %v1284_v14 = vmul.f32 %v1229_v37, %v2583_v15  ;;  %v1236_v56 = vmul.f32 %v1229_v37, %v1120_v19  ;;  %v1737_v19 = vsel %vm1276_vm7, 1.0, %v1906_v44 }
 0x716   :  { %v1286_v48 = vsel %vm363_vm0, %v1284_v14, 0.0 }
 0x717   :  { %v1287_v18 = vrot.slane %v1286_v48, 4 }
 0x719   :  { %v1288_v52 = vadd.f32 %v1287_v18, %v1286_v48 }
 0x71b   :  { %v1289_v63 = vrot.slane %v1288_v52, 2 }
 0x71c   :  { %v1246_v22 = vpop.permute.xlu2 %1245 }
 0x71d   :  { %v1305_v39 = vmul.f32 %v1246_v22, %v2616_v49  ;;  %v1249_v11 = vmul.f32 %v1246_v22, %v1135_v40 }
 0x71f   :  { %v1313_v8 = vsel %vm363_vm0, %v1305_v39, 0.0  ;;  %v1290_v39 = vadd.f32 %v1289_v63, %v1288_v52 }
 0x720   :  { %v1314_v33 = vrot.slane %v1313_v8, 4 }
 0x722   :  { %v1315_v61 = vadd.f32 %v1314_v33, %v1313_v8 }
 0x724   :  { %v1316_v59 = vrot.slane %v1315_v61, 2 }
 0x726   :  { %v1258_v4 = vpop.permute.xlu2 %1257  ;;  %v1317_v48 = vadd.f32 %v1316_v59, %v1315_v61 }
 0x727   :  { %v1261_v41 = vmul.f32 %v1258_v4, %v1149_v34  ;;  %v1325_v50 = vmul.f32 %v1258_v4, %v2616_v49 }
 0x72a   :  { %v1234_v47 = vpop.permute.xlu0 %1233 }
 0x72b   :  { %v1237_v30 = vmul.f32 %v1234_v47, %v1121_v46  ;;  %v1242_v51 = vpop.permute.xlu1 %1241  ;;  %v1285_v53 = vmul.f32 %v1234_v47, %v2616_v49  ;;  %v1333_v47 = vsel %vm363_vm0, %v1325_v50, 0.0 }
 0x72c   :  { %v1304_v42 = vmul.f32 %v1242_v51, %v2583_v15  ;;  %v1248_v4 = vmul.f32 %v1242_v51, %v1134_v20 }
 0x72d   :  { %v1251_v31 = vadd.f32 %v1249_v11, %v1237_v30  ;;  %v1293_v3 = vsel %vm363_vm0, %v1285_v53, 0.0  ;;  %v1291_v30 = vrot.slane %v1290_v39, 1 }
 0x72e   :  { %v1306_v40 = vsel %vm363_vm0, %v1304_v42, 0.0  ;;  %v1294_v34 = vrot.slane %v1293_v3, 4  ;;  %v1250_v52 = vadd.f32 %v1248_v4, %v1236_v56 }
 0x72f   :  { %v1263_v60 = vadd.f32 %v1261_v41, %v1251_v31  ;;  %v1270_v38 = vpop.permute.xlu2 %1269  ;;  %v1307_v54 = vrot.slane %v1306_v40, 4  ;;  %v1318_v41 = vrot.slane %v1317_v48, 1  ;;  %v1334_v31 = vrot.slane %v1333_v47, 4 }
 0x730   :  { %v1273_v46 = vmul.f32 %v1270_v38, %v1163_v24  ;;  %v1295_v8 = vadd.f32 %v1294_v34, %v1293_v3  ;;  %v1345_v33 = vmul.f32 %v1270_v38, %v2616_v49 }
 0x731   :  { %v1308_v11 = vadd.f32 %v1307_v54, %v1306_v40  ;;  %v1319_v40 = vadd.f32 %v1318_v41, %v1317_v48  ;;  %v1335_v63 = vadd.f32 %v1334_v31, %v1333_v47 }
 0x732   :  { %v1275_v62 = vadd.f32 %v1273_v46, %v1263_v60  ;;  %v1296_v42 = vrot.slane %v1295_v8, 2  ;;  %v1353_v20 = vsel %vm363_vm0, %v1345_v33, 0.0 }
 0x733   :  { %v1309_v61 = vrot.slane %v1308_v11, 2  ;;  %v1354_v59 = vrot.slane %v1353_v20, 4  ;;  %v2804_v47 = vsel %vm563_vm9, %v1319_v40, 0.0 }
 0x734   :  { %v1283_v22 = vmul.f32 %v1738_v17, %v1275_v62  ;;  %v1254_v14 = vpop.permute.xlu1 %1253  ;;  %v1297_v62 = vadd.f32 %v1296_v42, %v1295_v8  ;;  %v1336_v8 = vrot.slane %v1335_v63, 2 }
 0x735   :  { %v1324_v12 = vmul.f32 %v1254_v14, %v2583_v15  ;;  %v1260_v53 = vmul.f32 %v1254_v14, %v1148_v36  ;;  %v1292_v36 = vadd.f32 %v1291_v30, %v1290_v39  ;;  %v1310_v34 = vadd.f32 %v1309_v61, %v1308_v11 }
 0x736   :  { %v2769_v24 = vadd.f32 %v1283_v22, %v1103_v21  ;;  %v1355_v4 = vadd.f32 %v1354_v59, %v1353_v20 }
 0x737   :  { %v1326_v18 = vsel %vm363_vm0, %v1324_v12, 0.0  ;;  %v1262_v3 = vadd.f32 %v1260_v53, %v1250_v52  ;;  %v2799_v48 = vsel %vm542_vm8, %v1292_v36, 0.0  ;;  %v1311_v33 = vrot.slane %v1310_v34, 1 }
 0x738   :  { %v1327_v55 = vrot.slane %v1326_v18, 4  ;;  %v1399_v51 = vperm.slane %v2769_v24, 0  ;;  %v2783_v60 = vpop.permute.xlu2 %1461  ;;  %v1413_v38 = vperm.slane %v2769_v24, 1  ;;  %v1509_v12 = vsel %vm363_vm0, %v2769_v24, 0.0 }
 0x739   :  { %v1510_v39 = vrot.slane %v1509_v12, 4  ;;  %v1337_v52 = vadd.f32 %v1336_v8, %v1335_v63  ;;  %v1455_v40 = vperm.slane %v2769_v24, 4 }
 0x73a   :  { %v1328_v49 = vadd.f32 %v1327_v55, %v1326_v18  ;;  %v1401_v54 = vmul.f32 %v1399_v51, %v2694_v5  ;;  %v1415_v14 = vmul.f32 %v1413_v38, %v2741_v35  ;;  %v1427_v5 = vperm.slane %v2769_v24, 2 }
 0x73b   :  { %v1298_v35 = vrot.slane %v1297_v62, 1  ;;  %v1511_v42 = vadd.f32 %v1510_v39, %v1509_v12 }
 0x73c   :  { %v1329_v21 = vrot.slane %v1328_v49, 2  ;;  %v1417_v56 = vadd.f32 %v1415_v14, %v1401_v54  ;;  %v1429_v20 = vmul.f32 %v1427_v5, %v2737_v9  ;;  %v1338_v14 = vrot.slane %v1337_v52, 1 }
 0x73d   :  { %v1266_v37 = vpop.permute.xlu1 %1265  ;;  %v1483_v5 = vperm.slane %v2769_v24, 6 }
 0x73e   :  { %v1272_v28 = vmul.f32 %v1266_v37, %v1162_v58  ;;  %v1344_v46 = vmul.f32 %v1266_v37, %v2583_v15  ;;  %v1102_v15 = vadd.f32 %v2512_v0, %v2292_v43  ;;  %v1448_v43 = vpop.permute.xlu0 %1447  ;;  %v1330_v0 = vadd.f32 %v1329_v21, %v1328_v49 }
 0x73f   :  { %v1356_v49 = vrot.slane %v1355_v4, 2 }
 0x740   :  { %v1274_v17 = vadd.f32 %v1272_v28, %v1262_v3  ;;  %v1346_v50 = vsel %vm363_vm0, %v1344_v46, 0.0  ;;  %v1299_v3 = vadd.f32 %v1298_v35, %v1297_v62  ;;  %v1312_v28 = vadd.f32 %v1311_v33, %v1310_v34 }
 0x741   :  { %v1347_v22 = vrot.slane %v1346_v50, 4  ;;  %v2812_v51 = vpop.permute.xlu2 %1475  ;;  %v1431_v46 = vadd.f32 %v1429_v20, %v1417_v56  ;;  %v1331_v63 = vrot.slane %v1330_v0, 1  ;;  %v1357_v12 = vadd.f32 %v1356_v49, %v1355_v4 }
 0x742   :  { %v1282_v58 = vmul.f32 %v1737_v19, %v1274_v17  ;;  %v1441_v19 = vperm.slane %v2769_v24, 3  ;;  %v1320_v4 = vsel %vm563_vm9, %v1312_v28, 0.0  ;;  %v1339_v28 = vadd.f32 %v1338_v14, %v1337_v52 }
 0x743   :  { %v1348_v18 = vadd.f32 %v1347_v22, %v1346_v50  ;;  %v1512_v50 = vrot.slane %v1511_v42, 2 }
 0x744   :  { %v2806_v11 = vadd.f32 %v1282_v58, %v1102_v15  ;;  %v1443_v21 = vmul.f32 %v1441_v19, %v2739_v57  ;;  %v1469_v58 = vperm.slane %v2769_v24, 5  ;;  %v1341_v52 = vsel %vm584_vm10, %v1339_v28, 0.0 }
 0x745   :  { %v1349_v55 = vrot.slane %v1348_v18, 2  ;;  %v1513_v8 = vadd.f32 %v1512_v50, %v1511_v42 }
 0x746   :  { %v1398_v30 = vperm.slane %v2806_v11, 0  ;;  %v1412_v53 = vperm.slane %v2806_v11, 1  ;;  %v1426_v41 = vperm.slane %v2806_v11, 2  ;;  %v1452_v31 = vpop.permute.xlu1 %1451  ;;  %v1440_v61 = vperm.slane %v2806_v11, 3  ;;  %v1480_v57 = vpop.permute.xlu0 %1479 }
 0x747   :  { %v1350_v37 = vadd.f32 %v1349_v55, %v1348_v18  ;;  %v1454_v54 = vperm.slane %v2806_v11, 4  ;;  %v1457_v34 = vmul.f32 %v1455_v40, %v1452_v31  ;;  %v1445_v15 = vadd.f32 %v1443_v21, %v1431_v46 }
 0x748   :  { %v1400_v38 = vmul.f32 %v1398_v30, %v2743_v25  ;;  %v1414_v36 = vmul.f32 %v1412_v53, %v2735_v29  ;;  %v1428_v17 = vmul.f32 %v1426_v41, %v2696_v1  ;;  %v1442_v9 = vmul.f32 %v1440_v61, %v2745_v32 }
 0x749   :  { %v1502_v25 = vsel %vm363_vm0, %v2806_v11, 0.0  ;;  %v1351_v29 = vrot.slane %v1350_v37, 1  ;;  %v1332_v1 = vadd.f32 %v1331_v63, %v1330_v0  ;;  %v1301_v18 = vsel %vm542_vm8, %v1299_v3, 0.0 }
 0x74a   :  { %v1416_v59 = vadd.f32 %v1414_v36, %v1400_v38  ;;  %v1503_v22 = vrot.slane %v1502_v25, 4  ;;  %v1456_v35 = vmul.f32 %v1454_v54, %v1448_v43  ;;  %v1468_v33 = vperm.slane %v2806_v11, 5  ;;  %v1494_v42 = vpop.permute.xlu2 %1493 }
 0x74b   :  { %v1352_v56 = vadd.f32 %v1351_v29, %v1350_v37  ;;  %v1459_v30 = vadd.f32 %v1457_v34, %v1445_v15  ;;  %v1358_v0 = vrot.slane %v1357_v12, 1  ;;  %v1497_v31 = vperm.slane %v2769_v24, 7 }
 0x74c   :  { %v1430_v62 = vadd.f32 %v1428_v17, %v1416_v59  ;;  %v1504_v32 = vadd.f32 %v1503_v22, %v1502_v25  ;;  %v1340_v20 = vsel %vm584_vm10, %v1332_v1, 0.0  ;;  %v1485_v19 = vmul.f32 %v1483_v5, %v1480_v57 }
 0x74d   :  { %v1514_v49 = vrot.slane %v1513_v8, 1  ;;  %v1322_v38 = vadd.f32 %v1320_v4, %v2799_v48  ;;  %v1470_v36 = vmul.f32 %v1468_v33, %v2783_v60  ;;  %v1482_v37 = vperm.slane %v2806_v11, 6 }
 0x74e   :  { %v1444_v39 = vadd.f32 %v1442_v9, %v1430_v62  ;;  %v1505_v61 = vrot.slane %v1504_v32, 2  ;;  %v1360_v46 = vsel %vm605_vm11, %v1352_v56, 0.0  ;;  %v1499_v24 = vmul.f32 %v1497_v31, %v1494_v42 }
 0x74f   :  { %v1466_v55 = vpop.permute.xlu1 %1465  ;;  %v1323_v63 = vadd.f32 %v2804_v47, %v1301_v18  ;;  %v1342_v59 = vadd.f32 %v1340_v20, %v1322_v38  ;;  %v1359_v50 = vadd.f32 %v1358_v0, %v1357_v12  ;;  %v1515_v54 = vadd.f32 %v1514_v49, %v1513_v8  ;;  %v1849_v47 = vld [vmem:[%s2929_s5] ss:$0 sm:$0xff] }
 0x750   :  { %v1471_v53 = vmul.f32 %v1469_v58, %v1466_v55  ;;  %v1458_v41 = vadd.f32 %v1456_v35, %v1444_v39  ;;  %v1506_v3 = vadd.f32 %v1505_v61, %v1504_v32  ;;  %v1484_v48 = vmul.f32 %v1482_v37, %v2812_v51 }
 0x751   :  { %v1362_v21 = vadd.f32 %v1360_v46, %v1342_v59  ;;  %v1496_v60 = vperm.slane %v2806_v11, 7  ;;  %v1343_v34 = vadd.f32 %v1341_v52, %v1323_v63  ;;  %v176_v12 = vadd.f32 %v1849_v47, %v2154_v26 }
 0x752   :  { %v1473_v43 = vadd.f32 %v1471_v53, %v1459_v30  ;;  %v1472_v17 = vadd.f32 %v1470_v36, %v1458_v41  ;;  %v1507_v25 = vrot.slane %v1506_v3, 1  ;;  %v1361_v51 = vsel %vm605_vm11, %v1359_v50, 0.0 }
 0x753   :  { %v1380_v11 = vmul.f32 0.00125, %v1362_v21  ;;  %v1363_v8 = vadd.f32 %v1361_v51, %v1343_v34  ;;  %v175_v18 = vadd.f32 %v1849_v47, %v2144_v16  ;;  %v1364_v63 = vsel %vm417_vm5, %v2702_v27, 0.0 }
 0x754   :  { %v1487_v40 = vadd.f32 %v1485_v19, %v1473_v43  ;;  %v1486_v22 = vadd.f32 %v1484_v48, %v1472_v17  ;;  %v1508_v1 = vadd.f32 %v1507_v25, %v1506_v3  ;;  %v1371_v59 = vsel %vm417_vm5, %v2699_v7, 0.0 }
 0x755   :  { %v1382_v5 = vsub.f32 %v2562_v2, %v1380_v11  ;;  %v1381_v35 = vmul.f32 0.00125, %v1363_v8  ;;  %v1365_v17 = vrot.slane %v1364_v63, 4  ;;  %v1372_v50 = vrot.slane %v1371_v59, 4 }
 0x756   :  { %v1501_v9 = vadd.f32 %v1499_v24, %v1487_v40 }
 0x757   :  { %v1558_v4 = vperm.slane %v1382_v5, 2  ;;  %v1544_v26 = vperm.slane %v1382_v5, 1  ;;  %v1530_v56 = vperm.slane %v1382_v5, 0  ;;  %v1383_v0 = vsub.f32 %v2610_v23, %v1381_v35 }
 0x758   :  { %v1517_v29 = vadd.f32 %v1515_v54, %v1501_v9  ;;  %v1490_v62 = vpop.permute.xlu1 %1489  ;;  %v1572_v3 = vperm.slane %v1382_v5, 3  ;;  %v1366_v9 = vadd.f32 %v1365_v17, %v1364_v63  ;;  %v1373_v54 = vadd.f32 %v1372_v50, %v1371_v59  ;;  %v43_v17 = vld [vmem:[%s2927_s3] sm:$0xff]  ;;  %v44_v50 = vld [vmem:[%s2927_s3 + $0x8] sm:$0xff] }
 0x759   :  { %v1498_v14 = vmul.f32 %v1496_v60, %v1490_v62  ;;  %v1559_v2 = vperm.slane %v1383_v0, 2  ;;  %v1531_v61 = vperm.slane %v1383_v0, 0  ;;  %v1545_v20 = vperm.slane %v1383_v0, 1 }
 0x75a   :  { %v1519_v15 = vmul.f32 0.00125, %v1517_v29  ;;  %v1573_v37 = vperm.slane %v1383_v0, 3  ;;  %v1367_v21 = vrot.slane %v1366_v9, 2  ;;  %v1374_v48 = vrot.slane %v1373_v54, 2 }
 0x75b   :  { %v1500_v58 = vadd.f32 %v1498_v14, %v1486_v22 }
 0x75c   :  { %v1521_v39 = vsub.f32 %v176_v12, %v1519_v15  ;;  %v1368_v60 = vadd.f32 %v1367_v21, %v1366_v9  ;;  %v1375_v25 = vadd.f32 %v1374_v48, %v1373_v54 }
 0x75d   :  { %v1516_v32 = vadd.f32 %v1508_v1, %v1500_v58 }
 0x75e   :  { %v1523_v42 = vmax.f32 %v1521_v39, 0.0  ;;  %v1369_v52 = vrot.slane %v1368_v60, 1  ;;  %v1376_v29 = vrot.slane %v1375_v25, 1 }
 0x75f   :  { %v1518_v57 = vmul.f32 0.00125, %v1516_v32 }
 0x760   :  { %v1561_v19 = vmul.f32 %v1559_v2, %v1523_v42  ;;  %v1533_v43 = vmul.f32 %v1531_v61, %v1523_v42  ;;  %v1547_v49 = vmul.f32 %v1545_v20, %v1523_v42  ;;  %v1575_v28 = vmul.f32 %v1573_v37, %v1523_v42 }
 0x761   :  { %v1520_v33 = vsub.f32 %v175_v18, %v1518_v57  ;;  %v1370_v62 = vadd.f32 %v1369_v52, %v1368_v60  ;;  %v1377_v34 = vadd.f32 %v1376_v29, %v1375_v25 }
 0x762   :  { %v1565_v38 = vsel %vm363_vm0, %v1561_v19, 0.0  ;;  %v1537_v23 = vsel %vm363_vm0, %v1533_v43, 0.0  ;;  %v1551_v36 = vsel %vm363_vm0, %v1547_v49, 0.0  ;;  %v1579_v24 = vsel %vm363_vm0, %v1575_v28, 0.0 }
 0x763   :  { %v1522_v55 = vmax.f32 %v1520_v33, 0.0  ;;  %v1384_v22 = vmul.f32 0.00125, %v1370_v62  ;;  %v1385_v47 = vmul.f32 0.00125, %v1377_v34 }
 0x765   :  { %v1560_v6 = vmul.f32 %v1558_v4, %v1522_v55  ;;  %v1546_v30 = vmul.f32 %v1544_v26, %v1522_v55  ;;  %v1532_v53 = vmul.f32 %v1530_v56, %v1522_v55  ;;  %v1574_v46 = vmul.f32 %v1572_v3, %v1522_v55 }
 0x766   :  { %v1386_v51 = vsub.f32 %v2648_v45, %v1384_v22  ;;  %v1387_v7 = vsub.f32 %v2651_v13, %v1385_v47 }
 0x767   :  { %v1562_v41 = vsel %vm363_vm0, %v1560_v6, 0.0  ;;  %v1548_v31 = vsel %vm363_vm0, %v1546_v30, 0.0  ;;  %v1534_v16 = vsel %vm363_vm0, %v1532_v53, 0.0  ;;  %v1576_v40 = vsel %vm363_vm0, %v1574_v46, 0.0 }
 0x768   :  { %1563 = vadd.xlane.f32.xlu2 %v1562_v41  ;;  %1549 = vadd.xlane.f32.xlu0 %v1548_v31  ;;  %v1526_v11 = vperm.slane %v1386_v51, 0  ;;  %v1527_v58 = vperm.slane %v1387_v7, 0  ;;  %vm2972_vm0 = vcmp.eq.s32.totalorder %v2141_v10, 2 }
 0x769   :  { %1535 = vadd.xlane.f32.xlu1 %v1534_v16  ;;  %vm2973_vm8 = vmmov %vm2972_vm0 }
 0x770   :  { %1566 = vadd.xlane.f32.xlu0 %v1565_v38  ;;  %1538 = vadd.xlane.f32.xlu2 %v1537_v23 }
 0x771   :  { %1552 = vadd.xlane.f32.xlu1 %v1551_v36 }
 0x778   :  { %1580 = vadd.xlane.f32.xlu2 %v1579_v24 }
 0x779   :  { %1577 = vadd.xlane.f32.xlu1 %v1576_v40 }
 0x7db   :  { %v1564_v14 = vpop.xlane.xlu2 %1563  ;;  %v1550_v27 = vpop.xlane.xlu0 %1549 }
 0x7dc   :  { %v1536_v12 = vpop.xlane.xlu1 %1535  ;;  %v1554_v45 = vsel %vm384_vm2, %v1550_v27, 0.0  ;;  %v1568_v55 = vsel %vm2973_vm8, %v1564_v14, 0.0 }
 0x7dd   :  { %v1540_v15 = vsel %vm370_vm1, %v1536_v12, 0.0 }
 0x7de   :  { %v1542_v39 = vadd.f32 %v1540_v15, %v1526_v11 }
 0x7e0   :  { %v1556_v35 = vadd.f32 %v1554_v45, %v1542_v39 }
 0x7e2   :  { %v1570_v56 = vadd.f32 %v1568_v55, %v1556_v35 }
 0x7e3   :  { %v1539_v1 = vpop.xlane.xlu2 %1538  ;;  %v1567_v5 = vpop.xlane.xlu0 %1566 }
 0x7e4   :  { %v1553_v8 = vpop.xlane.xlu1 %1552  ;;  %v1541_v32 = vsel %vm370_vm1, %v1539_v1, 0.0  ;;  %v1569_v33 = vsel %vm2972_vm0, %v1567_v5, 0.0  ;;  %vm2974_vm1 = vcmp.eq.s32.totalorder %v2141_v10, 3 }
 0x7e5   :  { %v1543_v18 = vadd.f32 %v1541_v32, %v1527_v58  ;;  %v1555_v57 = vsel %vm384_vm2, %v1553_v8, 0.0  ;;  %vm2975_vm9 = vmmov %vm2974_vm1 }
 0x7e7   :  { %v1557_v13 = vadd.f32 %v1555_v57, %v1543_v18 }
 0x7e9   :  { %v1571_v4 = vadd.f32 %v1569_v33, %v1557_v13 }
 0x7eb   :  { %v1581_v26 = vpop.xlane.xlu2 %1580 }
 0x7ec   :  { %v1578_v6 = vpop.xlane.xlu1 %1577  ;;  %v1583_v30 = vsel %vm2974_vm1, %v1581_v26, 0.0 }
 0x7ed   :  { %v1582_v53 = vsel %vm2975_vm9, %v1578_v6, 0.0  ;;  %v2884_v0 = vadd.f32 %v1583_v30, %v1571_v4 }
 0x7ee   :  { %v2886_v41 = vadd.f32 %v1582_v53, %v1570_v56 }
 0x7ef   :  { %v1589_v31 = vsel %vm417_vm5, %v2884_v0, -inf }
 0x7f0   :  { %v1586_v16 = vsel %vm417_vm5, %v2886_v41, -inf  ;;  %1590 = vmax.xlane.f32.xlu1 %v1589_v31 }
 0x7f1   :  { %1587 = vmax.xlane.f32.xlu0 %v1586_v16 }
 0x863   :  { %v1591_v42 = vpop.xlane.xlu1 %1590 }
 0x864   :  { %v1588_v2 = vpop.xlane.xlu0 %1587  ;;  %v1593_v61 = vsub.f32 %v2884_v0, %v1591_v42  ;;  %vm1641_vm2 = vcmp.ge.f32.partialorder %v2884_v0, %v1591_v42 }
 0x865   :  { %v1592_v20 = vsub.f32 %v2886_v41, %v1588_v2  ;;  %vm1640_vm10 = vcmp.ge.f32.partialorder %v2886_v41, %v1588_v2  ;;  %v1643_v19 = vsel %vm1641_vm2, %v2141_v10, 4 }
 0x866   :  { %v1596_v43 = vmul.f32 1.442695, %v1593_v61  ;;  %v1642_v49 = vsel %vm1640_vm10, %v2141_v10, 4  ;;  %v1659_v38 = vsel %vm417_vm5, %v1643_v19, 2147483647 }
 0x867   :  { %v1594_v23 = vmul.f32 1.442695, %v1592_v20  ;;  %v1644_v36 = vsel %vm417_vm5, %v1642_v49, 2147483647  ;;  %v1661_v37 = vshra.s32 %v1659_v38, 16  ;;  %v1660_v25 = vand.u32 65535, %v1659_v38 }
 0x868   :  { %v1646_v3 = vshra.s32 %v1644_v36, 16  ;;  %v1645_v9 = vand.u32 65535, %v1644_v36 }
 0x869   :  { %1841 = vpow2.f32 %v1594_v23  ;;  %v1663_v28 = vcvt.s32.f32 %v1661_v37  ;;  %v1662_v29 = vcvt.s32.f32 %v1660_v25 }
 0x86a   :  { %1843 = vpow2.f32 %v1596_v43  ;;  %v1648_v46 = vcvt.s32.f32 %v1646_v3  ;;  %v1647_v21 = vcvt.s32.f32 %v1645_v9 }
 0x86b   :  { %1664 = vmin.xlane.f32.xlu0 %v1663_v28 }
 0x86c   :  { %1649 = vmin.xlane.f32.xlu2 %v1648_v46 }
 0x86f   :  { %v1842_v24 = vpop.eup %1841 }
 0x870   :  { %v1844_v40 = vpop.eup %1843  ;;  %v1598_v63 = vsel %vm417_vm5, %v1842_v24, 0.0 }
 0x871   :  { %1599 = vadd.xlane.f32.xlu1 %v1598_v63  ;;  %v1601_v59 = vsel %vm417_vm5, %v1844_v40, 0.0 }
 0x874   :  { %1602 = vadd.xlane.f32.xlu2 %v1601_v59 }
 0x87f   :  { %1611 = vperm.xlu0 %1813, %v43_v17  }
 0x88a   :  { %1614 = vperm.xlu1 %1814, %v44_v50  }
 0x8de   :  { %v1665_v60 = vpop.xlane.xlu0 %1664 }
 0x8df   :  { %v1650_v54 = vpop.xlane.xlu2 %1649  ;;  %vm1666_vm3 = vcmp.eq.f32.partialorder %v1663_v28, %v1665_v60  ;;  %v1671_v55 = vcvt.f32.s32 %v1665_v60 }
 0x8e0   :  { %vm1651_vm11 = vcmp.eq.f32.partialorder %v1648_v46, %v1650_v54  ;;  %v1667_v34 = vsel %vm1666_vm3, %v1662_v29, inf  ;;  %v1656_v5 = vcvt.f32.s32 %v1650_v54 }
 0x8e1   :  { %v1652_v48 = vsel %vm1651_vm11, %v1647_v21, inf  ;;  %v1672_v56 = vshll.u32 %v1671_v55, 16 }
 0x8e2   :  { %1653 = vmin.xlane.f32.xlu2 %v1652_v48  ;;  %v1657_v33 = vshll.u32 %v1656_v5, 16 }
 0x8e4   :  { %v1600_v52 = vpop.xlane.xlu1 %1599 }
 0x8e5   :  { %1845 = vlog2.f32 %v1600_v52 }
 0x8e7   :  { %v1603_v62 = vpop.xlane.xlu2 %1602 }
 0x8e8   :  { %1847 = vlog2.f32 %v1603_v62 }
 0x8ea   :  { %1668 = vmin.xlane.f32.xlu2 %v1667_v34 }
 0x8eb   :  { %v1846_v22 = vpop.eup %1845 }
 0x8ec   :  { %v1605_v47 = vmul.f32 0.6931472, %v1846_v22 }
 0x8ee   :  { %v1848_v14 = vpop.eup %1847  ;;  %v1608_v51 = vadd.f32 %v1605_v47, %v1588_v2 }
 0x8ef   :  { %v1607_v27 = vmul.f32 0.6931472, %v1848_v14 }
 0x8f0   :  { %v1622_v11 = vsub.f32 %v2886_v41, %v1608_v51 }
 0x8f1   :  { %v1612_v12 = vpop.permute.xlu0 %1611  ;;  %v1609_v7 = vadd.f32 %v1607_v27, %v1591_v42 }
 0x8f2   :  { %vm1616_vm4 = vcmp.eq.s32.totalorder %v2141_v10, %v1612_v12 }
 0x8f3   :  { %v1739_v15 = vsel %vm1616_vm4, 1.0, %v1906_v44  ;;  %v1623_v39 = vsub.f32 %v2884_v0, %v1609_v7 }
 0x8f4   :  { %v1624_v1 = vmul.f32 %v1739_v15, %v1622_v11 }
 0x8f6   :  { %v1626_v18 = vsel %vm417_vm5, %v1624_v1, 0.0 }
 0x8fc   :  { %v1615_v58 = vpop.permute.xlu1 %1614 }
 0x8fd   :  { %vm1617_vm12 = vcmp.eq.s32.totalorder %v2141_v10, %v1615_v58 }
 0x8fe   :  { %v1740_v8 = vsel %vm1617_vm12, 1.0, %v1906_v44 }
 0x8ff   :  { %v1625_v32 = vmul.f32 %v1740_v8, %v1623_v39 }
 0x901   :  { %v1627_v57 = vsel %vm417_vm5, %v1625_v32, 0.0 }
 0x902   :  { %v1628_v45 = vadd.f32 %v1627_v57, %v1626_v18 }
 0x904   :  { %1629 = vadd.xlane.f32.xlu2 %v1628_v45 }
 0x955   :  { %v1654_v13 = vpop.xlane.xlu2 %1653 }
 0x956   :  { %v1655_v35 = vcvt.f32.s32 %v1654_v13 }
 0x958   :  { %v1658_v4 = vadd.s32 %v1657_v33, %v1655_v35 }
 0x95a   :  { %vm1674_vm13 = vcmp.eq.s32.totalorder %v1658_v4, %v43_v17 }
 0x95b   :  { %v1741_v30 = vsel %vm1674_vm13, 1.0, %v1906_v44 }
 0x95c   :  { %v1681_v0 = vsel %vm1680_vm14, %v1741_v30, 0.0 }
 0x95d   :  { %v1669_v26 = vpop.xlane.xlu2 %1668 }
 0x95e   :  { %v1670_v10 = vcvt.f32.s32 %v1669_v26 }
 0x960   :  { %v1673_v6 = vadd.s32 %v1672_v56, %v1670_v10 }
 0x962   :  { %vm1675_vm15 = vcmp.eq.s32.totalorder %v1673_v6, %v44_v50 }
 0x963   :  { %v1742_v53 = vsel %vm1675_vm15, 1.0, %v1906_v44 }
 0x964   :  { %v1682_v41 = vsel %vm1680_vm14, %v1742_v53, 0.0 }
 0x965   :  { %v1683_v31 = vadd.f32 %v1682_v41, %v1681_v0 }
 0x967   :  { %1684 = vadd.xlane.f32.xlu1 %v1683_v31 }
 0x977   :  { %v1630_v16 = vpop.xlane.xlu2 %1629 }
 0x978   :  { %v1631_v42 = vrot.slane %v1630_v16, 4 }
 0x97a   :  { %v1632_v2 = vadd.f32 %v1631_v42, %v1630_v16 }
 0x97c   :  { %v1633_v61 = vrot.slane %v1632_v2, 2 }
 0x97e   :  { %v1634_v20 = vadd.f32 %v1633_v61, %v1632_v2 }
 0x980   :  { %v1635_v19 = vrot.slane %v1634_v20, 1 }
 0x982   :  { %v1636_v43 = vadd.f32 %v1635_v19, %v1634_v20 }
 0x984   :  { %1743 = vpush %v1636_v43 }
 0x9b5   :  { %s1744_s3 = spop %1743 }
 0x9b6   :  { %s1638_s18 = ssub.f32 0.0, %s1744_s3 }
 0x9b8   :  { %s1639_s0 = smul.f32 0.0625, %s1638_s18 }
 0x9ba   :  { %v1693_v44 = vstv %s1639_s0 }
 0x9bb   :  { %1695 = vst [vmem:[#allocation2] sm:$0x1] %v1693_v44 }
 0x9bc   :  { %1709 = dma.vmem_to_hbm [thread:$0]  %s1705_s20, 16, %s1707_s17, [#allocation3]  }
 0x9da   :  { %v1685_v49 = vpop.xlane.xlu1 %1684 }
 0x9db   :  { %v1686_v38 = vrot.slane %v1685_v49, 4 }
 0x9dd   :  { %v1687_v23 = vadd.f32 %v1686_v38, %v1685_v49 }
 0x9df   :  { %v1688_v36 = vrot.slane %v1687_v23, 2 }
 0x9e1   :  { %v1689_v37 = vadd.f32 %v1688_v36, %v1687_v23 }
 0x9e3   :  { %v1690_v3 = vrot.slane %v1689_v37, 1 }
 0x9e5   :  { %v1691_v28 = vadd.f32 %v1690_v3, %v1689_v37 }
 0x9e7   :  { %1745 = vpush %v1691_v28 }
 0xa18   :  { %s1746_s25 = spop %1745 }
 0xa19   :  { %v1696_v46 = vstv %s1746_s25 }
 0xa1a   :  { %1698 = vst [vmem:[#allocation4] sm:$0x1] %v1696_v46 }
 0xa1b   :  { %1720 = dma.vmem_to_hbm [thread:$0]  %s1716_s22, 16, %s1718_s24, [#allocation5]  }
 0xa1c   :  { %1898 = dma.done.wait [#allocation3], 16  }
 0xa1d   :  { %1899 = vsyncadd [#allocation3], 4294967280 }
 0xa1e   :  { %1900 = dma.done.wait [#allocation5], 16  }
 0xa1f   :  { %1901 = vsyncadd [#allocation5], 4294967280 }
 0xa20   :  { %1729 = vsyncpa [#allocation3], 1 }
 0xa21   :  { %1730 = vsyncpa [#allocation5], 1 }

</bundles_post_ra>
